<compile_context>
chip_gen: v7x
topology: tpu7x:2x2x1
jax: 0.10.0
libtpu: 0.0.40
codegen_flags: <defaults>
</compile_context>

<pallas_src>
import functools
from dataclasses import dataclass

import numpy as np
import jax
import jax.numpy as jnp
from jax.experimental import pallas as pl
from jax.experimental.pallas import tpu as pltpu


# --------------------------------------------------------------------------
# Static configuration (trace-time constants closed over by the kernel)
# --------------------------------------------------------------------------
@dataclass(frozen=True)
class _BlockCfg:
    cin: int
    cout: int
    h_in: int
    w_in: int
    up: int          # 1 or 2 (nearest upsample factor, applied before conv1)
    use_roll: bool   # lane extent multiple of 128 -> pltpu.roll tap path


@dataclass(frozen=True)
class _GenCfg:
    d_model: int
    batch: int
    blocks: tuple


# --------------------------------------------------------------------------
# Host-side constant builders (tiny 0/1 matrices, built once with numpy)
# --------------------------------------------------------------------------
def _slab_expand(batch, s):
    """(B, B*S): expands a per-batch column to a per-batch lane slab."""
    m = np.zeros((batch, batch * s), np.float32)
    for b in range(batch):
        m[b, b * s:(b + 1) * s] = 1.0
    return jnp.asarray(m)


def _upsample_matrix(batch, h_in, w_in):
    """(B*S_in, B*S_out): nearest-x2 upsample as a block-diagonal 0/1 matmul."""
    h_out, w_out = 2 * h_in, 2 * w_in
    s_in, s_out = h_in * w_in, h_out * w_out
    m = np.zeros((batch * s_in, batch * s_out), np.float32)
    for b in range(batch):
        for yo in range(h_out):
            for xo in range(w_out):
                src = (yo // 2) * w_in + (xo // 2)
                m[b * s_in + src, b * s_out + yo * w_out + xo] = 1.0
    return jnp.asarray(m)


def _tap_masks(batch, h, w):
    """(9, 1, B*S) 0/1 validity of each 3x3 tap per output lane (zero pad)."""
    s = h * w
    m = np.zeros((9, 1, batch * s), np.float32)
    for t in range(9):
        dy, dx = t // 3 - 1, t % 3 - 1
        for b in range(batch):
            for y in range(h):
                for x in range(w):
                    if 0 <= y + dy < h and 0 <= x + dx < w:
                        m[t, 0, b * s + y * w + x] = 1.0
    return jnp.asarray(m)


def _tap_sels(batch, h, w):
    """(9, B*S, B*S) per-tap gather matrices (x @ sel) for sub-128-lane sizes."""
    s = h * w
    n = batch * s
    m = np.zeros((9, n, n), np.float32)
    for t in range(9):
        dy, dx = t // 3 - 1, t % 3 - 1
        for b in range(batch):
            for y in range(h):
                for x in range(w):
                    ys, xs = y + dy, x + dx
                    if 0 <= ys < h and 0 <= xs < w:
                        m[t, b * s + ys * w + xs, b * s + y * w + x] = 1.0
    return jnp.asarray(m)


# --------------------------------------------------------------------------
# In-kernel 3x3 conv: 9 accumulated per-tap matmuls on rolled/gathered lanes
# --------------------------------------------------------------------------
def _conv3x3(x, w_ref, tap_ref, w_spatial, n_lanes, use_roll):
    """x: (Cin, B*H*W) channel-major.  w_ref: (9, Cout, Cin) tap-major.
    tap_ref: (9, 1, N) edge masks (roll path) or (9, N, N) gathers (sel path).
    Returns (Cout, B*H*W)."""
    acc = None
    for t in range(9):
        dy, dx = t // 3 - 1, t % 3 - 1
        if use_roll:
            off = dy * w_spatial + dx
            # result[l] = x[l + off]  (jnp.roll semantics -> shift = -off)
            src = x if off == 0 else pltpu.roll(x, (-off) % n_lanes, axis=1)
            contrib = jnp.dot(w_ref[t], src, preferred_element_type=jnp.float32)
            if off != 0:
                contrib = contrib * tap_ref[t]      # (1, N) zero-padding mask
        else:
            gathered = jnp.dot(x, tap_ref[t], preferred_element_type=jnp.float32)
            contrib = jnp.dot(w_ref[t], gathered,
                              preferred_element_type=jnp.float32)
        acc = contrib if acc is None else acc + contrib
    return acc


# --------------------------------------------------------------------------
# The fused generator kernel (single program, batch folded onto lanes)
# --------------------------------------------------------------------------
def _generator_kernel(cfg, *refs):
    f32 = jnp.float32
    out_ref = refs[-1]
    it = iter(refs[:-1])
    z_ref, mapw_ref, mapb_ref, sw_ref, sb_ref, eb0_ref = (
        next(it) for _ in range(6))

    d = cfg.d_model
    z = z_ref[...]                                                  # (D, B)

    # Mapping network: style = ReLU(W z + b), all batch columns at once.
    style = jnp.maximum(
        jnp.dot(mapw_ref[...], z, preferred_element_type=f32) + mapb_ref[...],
        0.0)                                                        # (D, B)

    # Every style affine (style1 + all blocks) in a single matmul -> (Ntot, B)
    st = jnp.dot(sw_ref[...], style, preferred_element_type=f32) + sb_ref[...]

    # out = z.view(B, D, 1, 1).repeat(1, 1, 2, 2), batch folded onto lanes.
    eb0 = eb0_ref[...]                                              # (B, B*4)
    act = jnp.dot(z, eb0, preferred_element_type=f32)               # (D, B*4)
    st1 = jnp.dot(st[0:2 * d, :], eb0, preferred_element_type=f32)  # (2D, B*4)
    act = act * st1[0:d, :] + st1[d:2 * d, :]

    soff = 2 * d
    for bc in cfg.blocks:
        if bc.up == 2:
            eu_ref = next(it)
        (eb_ref, w1_ref, b1_ref, w2_ref, b2_ref,
         noise_ref, tap_ref) = (next(it) for _ in range(7))

        h_out, w_out = bc.h_in * bc.up, bc.w_in * bc.up
        n_lanes = cfg.batch * h_out * w_out

        # nearest-x2 upsample (decoupled from the conv), 0/1 expansion matmul
        if bc.up == 2:
            act = jnp.dot(act, eu_ref[...], preferred_element_type=f32)

        # conv1 + bias + noise + ReLU
        h = _conv3x3(act, w1_ref, tap_ref, w_out, n_lanes, bc.use_roll)
        h = jnp.maximum(h + b1_ref[...] + noise_ref[...], 0.0)

        # StyleMod: x * scale + shift  (scale = first Cout rows of the affine)
        st_blk = jnp.dot(st[soff:soff + 2 * bc.cout, :], eb_ref[...],
                         preferred_element_type=f32)                # (2C, B*S)
        h = h * st_blk[0:bc.cout, :] + st_blk[bc.cout:2 * bc.cout, :]
        soff += 2 * bc.cout

        # conv2 + bias + ReLU
        act = _conv3x3(h, w2_ref, tap_ref, w_out, n_lanes, bc.use_roll)
        act = jnp.maximum(act + b2_ref[...], 0.0)

    # to_rgb: 1x1 conv + tanh, lane-dense (C_rgb, B*H*W) output.
    rgbw_ref, rgbb_ref = next(it), next(it)
    rgb = jnp.dot(rgbw_ref[...], act, preferred_element_type=f32) + rgbb_ref[...]
    out_ref[...] = jnp.tanh(rgb).astype(out_ref.dtype)


# --------------------------------------------------------------------------
# Host wrapper: parameter repacking + pallas_call
# --------------------------------------------------------------------------
def generator_forward(params, z, noises, height, width):
    """noises: one (B, Cout, H, W) tensor per block, already scaled by the
    per-channel noise weight (i.e. noise_param * randn_like)."""
    batch, d_model = z.shape
    blocks = params["blocks"]
    c_rgb = params["rgb_b"].shape[0]

    # ---- static per-block geometry ----------------------------------------
    blk_cfgs = []
    h = w = 2
    cin = d_model
    for blk in blocks:
        cout = blk["conv1_b"].shape[0]
        up = 2 if (h < height and w < width) else 1
        h_out, w_out = h * up, w * up
        n_lanes = batch * h_out * w_out
        blk_cfgs.append(_BlockCfg(cin=cin, cout=cout, h_in=h, w_in=w, up=up,
                                  use_roll=(n_lanes % 128 == 0)))
        h, w, cin = h_out, w_out, cout
    if (h, w) != (height, width):
        # TODO(synk): F.interpolate(bilinear, align_corners=False) fallback for
        # target sizes not reachable by 2x nearest growth from 2x2 is not
        # implemented in the fused kernel.
        raise NotImplementedError("bilinear resize fallback not implemented")
    cfg = _GenCfg(d_model=d_model, batch=batch, blocks=tuple(blk_cfgs))

    # ---- repack parameters / constants (host, one-off, all tiny) ----------
    def pack_conv(wc):      # (Cout, Cin, 3, 3) OIHW -> (9, Cout, Cin) tap-major
        co, ci = wc.shape[0], wc.shape[1]
        return jnp.transpose(wc, (2, 3, 0, 1)).reshape(9, co, ci)

    sw = jnp.concatenate([params["s1_w"]] + [b["style_w"] for b in blocks],
                         axis=0)                                    # (Ntot, D)
    sb = jnp.concatenate([params["s1_b"]]
                         + [b["style_b"] for b in blocks])[:, None]  # (Ntot, 1)

    inputs = [jnp.transpose(z),                       # (D, B) latent columns
              params["map_w"], params["map_b"][:, None],
              sw, sb,
              _slab_expand(batch, 4)]                 # style1 / initial 2x2 slab
    for bc, blk, nz in zip(blk_cfgs, blocks, noises):
        h_out, w_out = bc.h_in * bc.up, bc.w_in * bc.up
        s_out = h_out * w_out
        if bc.up == 2:
            inputs.append(_upsample_matrix(batch, bc.h_in, bc.w_in))
        inputs.append(_slab_expand(batch, s_out))
        inputs.append(pack_conv(blk["conv1_w"]))
        inputs.append(blk["conv1_b"][:, None])
        inputs.append(pack_conv(blk["conv2_w"]))
        inputs.append(blk["conv2_b"][:, None])
        inputs.append(jnp.transpose(nz, (1, 0, 2, 3))
                      .reshape(bc.cout, batch * s_out))
        inputs.append(_tap_masks(batch, h_out, w_out) if bc.use_roll
                      else _tap_sels(batch, h_out, w_out))
    inputs += [params["rgb_w"], params["rgb_b"][:, None]]

    out_flat = pl.pallas_call(
        functools.partial(_generator_kernel, cfg),
        out_shape=jax.ShapeDtypeStruct((c_rgb, batch * height * width),
                                       jnp.float32),
    )(*inputs)
    # (C, B*H*W) lane-dense kernel output -> NCHW on the host (tiny transpose).
    return out_flat.reshape(c_rgb, batch, height, width).transpose(1, 0, 2, 3)


# --------------------------------------------------------------------------
# Pure-JAX reference of the PyTorch forward (for correctness checking)
# --------------------------------------------------------------------------
def reference_forward(params, z, noises, height, width):
    hp = jax.lax.Precision.HIGHEST
    B, D = z.shape
    style = jax.nn.relu(jnp.dot(z, params["map_w"].T, precision=hp)
                        + params["map_b"])
    out = jnp.broadcast_to(z[:, :, None, None], (B, D, 2, 2))
    st1 = jnp.dot(style, params["s1_w"].T, precision=hp) + params["s1_b"]
    out = out * st1[:, :D, None, None] + st1[:, D:, None, None]
    for blk, nz in zip(params["blocks"], noises):
        C = blk["conv1_b"].shape[0]
        if out.shape[2] < height and out.shape[3] < width:
            out = jnp.repeat(jnp.repeat(out, 2, axis=2), 2, axis=3)
        out = jax.lax.conv_general_dilated(
            out, blk["conv1_w"], (1, 1), "SAME",
            dimension_numbers=("NCHW", "OIHW", "NCHW"), precision=hp)
        out = out + blk["conv1_b"][None, :, None, None] + nz
        out = jax.nn.relu(out)
        stb = jnp.dot(style, blk["style_w"].T, precision=hp) + blk["style_b"]
        out = out * stb[:, :C, None, None] + stb[:, C:, None, None]
        out = jax.lax.conv_general_dilated(
            out, blk["conv2_w"], (1, 1), "SAME",
            dimension_numbers=("NCHW", "OIHW", "NCHW"), precision=hp)
        out = jax.nn.relu(out + blk["conv2_b"][None, :, None, None])
    rgb = jnp.einsum("oc,bchw->bohw", params["rgb_w"], out,
                     precision=hp) + params["rgb_b"][None, :, None, None]
    return jnp.tanh(rgb)


# --------------------------------------------------------------------------
# Parameter init (deterministic, synthetic — shapes mirror the PyTorch module)
# --------------------------------------------------------------------------
def init_params(key, d_model, num_channels, num_layers):
    keys = iter(jax.random.split(key, 3 + 4 * num_layers))

    def nrm(shape, std):
        return (std * jax.random.normal(next(keys), shape)).astype(jnp.float32)

    params = {
        "map_w": nrm((d_model, d_model), (2.0 / d_model) ** 0.5),
        "map_b": jnp.zeros((d_model,), jnp.float32),
        "s1_w": nrm((2 * d_model, d_model), (1.0 / d_model) ** 0.5),
        "s1_b": jnp.concatenate([jnp.ones((d_model,)),
                                 jnp.zeros((d_model,))]).astype(jnp.float32),
        "blocks": [],
    }
    cur = d_model
    for _ in range(num_layers):
        nxt = max(num_channels, cur // 2)
        params["blocks"].append(dict(
            conv1_w=nrm((nxt, cur, 3, 3), (2.0 / (9 * cur)) ** 0.5),   # OIHW
            conv1_b=jnp.zeros((nxt,), jnp.float32),
            noise_w=nrm((nxt,), 0.1),                 # (1, C, 1, 1) in torch
            style_w=nrm((2 * nxt, d_model), (1.0 / d_model) ** 0.5),
            style_b=jnp.concatenate([jnp.ones((nxt,)),
                                     jnp.zeros((nxt,))]).astype(jnp.float32),
            conv2_w=nrm((nxt, nxt, 3, 3), (2.0 / (9 * nxt)) ** 0.5),
            conv2_b=jnp.zeros((nxt,), jnp.float32),
        ))
        cur = nxt
    params["rgb_w"] = nrm((num_channels, cur), (1.0 / cur) ** 0.5)  # 1x1 conv
    params["rgb_b"] = jnp.zeros((num_channels,), jnp.float32)
    return params


# --------------------------------------------------------------------------
if __name__ == "__main__":
    d_model = 32
    num_channels, height, width = 4, 16, 16
    num_layers = 3
    batch = 2

    key = jax.random.PRNGKey(0)
    pkey, zkey, nkey = jax.random.split(key, 3)

    params = init_params(pkey, d_model, num_channels, num_layers)
    z = jax.random.normal(zkey, (batch, d_model), jnp.float32)

    # Per-forward noise (torch.randn_like equivalent), pre-scaled by noise_w,
    # shared by the kernel and the reference so results match exactly.
    noises = []
    h = w = 2
    nkeys = jax.random.split(nkey, num_layers)
    for i, blk in enumerate(params["blocks"]):
        if h < height and w < width:
            h, w = 2 * h, 2 * w
        cout = blk["conv1_b"].shape[0]
        raw = jax.random.normal(nkeys[i], (batch, cout, h, w), jnp.float32)
        noises.append(blk["noise_w"][None, :, None, None] * raw)

    out = generator_forward(params, z, noises, height, width)
    out = jax.block_until_ready(out)

    assert out.shape == (batch, num_channels, height, width), out.shape
    assert bool(jnp.all(jnp.isfinite(out)))

    ref = reference_forward(params, z, noises, height, width)
    max_err = float(jnp.max(jnp.abs(out - ref)))
    assert max_err < 1e-1, f"max abs error vs reference: {max_err}"

    print("KERNEL_OK")
</pallas_src>

<mosaic_0001>
module attributes {stable_mosaic.version = 11 : i64} {
  func.func @_generator_kernel(%arg0: memref<32x2xf32, #tpu.memory_space<vmem>>, %arg1: memref<32x32xf32, #tpu.memory_space<vmem>>, %arg2: memref<32x1xf32, #tpu.memory_space<vmem>>, %arg3: memref<120x32xf32, #tpu.memory_space<vmem>>, %arg4: memref<120x1xf32, #tpu.memory_space<vmem>>, %arg5: memref<2x8xf32, #tpu.memory_space<vmem>>, %arg6: memref<8x32xf32, #tpu.memory_space<vmem>>, %arg7: memref<2x32xf32, #tpu.memory_space<vmem>>, %arg8: memref<9x16x32xf32, #tpu.memory_space<vmem>>, %arg9: memref<16x1xf32, #tpu.memory_space<vmem>>, %arg10: memref<9x16x16xf32, #tpu.memory_space<vmem>>, %arg11: memref<16x1xf32, #tpu.memory_space<vmem>>, %arg12: memref<16x32xf32, #tpu.memory_space<vmem>>, %arg13: memref<9x32x32xf32, #tpu.memory_space<vmem>>, %arg14: memref<32x128xf32, #tpu.memory_space<vmem>>, %arg15: memref<2x128xf32, #tpu.memory_space<vmem>>, %arg16: memref<9x8x16xf32, #tpu.memory_space<vmem>>, %arg17: memref<8x1xf32, #tpu.memory_space<vmem>>, %arg18: memref<9x8x8xf32, #tpu.memory_space<vmem>>, %arg19: memref<8x1xf32, #tpu.memory_space<vmem>>, %arg20: memref<8x128xf32, #tpu.memory_space<vmem>>, %arg21: memref<9x1x128xf32, #tpu.memory_space<vmem>>, %arg22: memref<128x512xf32, #tpu.memory_space<vmem>>, %arg23: memref<2x512xf32, #tpu.memory_space<vmem>>, %arg24: memref<9x4x8xf32, #tpu.memory_space<vmem>>, %arg25: memref<4x1xf32, #tpu.memory_space<vmem>>, %arg26: memref<9x4x4xf32, #tpu.memory_space<vmem>>, %arg27: memref<4x1xf32, #tpu.memory_space<vmem>>, %arg28: memref<4x512xf32, #tpu.memory_space<vmem>>, %arg29: memref<9x1x512xf32, #tpu.memory_space<vmem>>, %arg30: memref<4x4xf32, #tpu.memory_space<vmem>>, %arg31: memref<4x1xf32, #tpu.memory_space<vmem>>, %arg32: memref<4x512xf32, #tpu.memory_space<vmem>>) attributes {dimension_semantics = [], scalar_prefetch = 0 : i64, scratch_operands = 0 : i64, tpu.core_type = #tpu.core_type<tc>} {
    %c0 = arith.constant 0 : index
    %c0_0 = arith.constant 0 : index
    %0 = vector.load %arg0[%c0, %c0_0] : memref<32x2xf32, #tpu.memory_space<vmem>>, vector<32x2xf32>
    %c0_1 = arith.constant 0 : index
    %c0_2 = arith.constant 0 : index
    %1 = vector.load %arg1[%c0_1, %c0_2] : memref<32x32xf32, #tpu.memory_space<vmem>>, vector<32x32xf32>
    %cst = arith.constant dense<0.000000e+00> : vector<32x2xf32>
    %2 = tpu.matmul %1, %0, %cst {dimension_numbers = #tpu.dot_dimension_numbers<[1], [0], [0], [1], [0, 0, 1, 1], [], []>} : vector<32x32xf32>, vector<32x2xf32>, vector<32x2xf32> -> vector<32x2xf32>
    %c0_3 = arith.constant 0 : index
    %c0_4 = arith.constant 0 : index
    %3 = vector.load %arg2[%c0_3, %c0_4] : memref<32x1xf32, #tpu.memory_space<vmem>>, vector<32x1xf32>
    %4 = vector.broadcast %3 : vector<32x1xf32> to vector<32x2xf32>
    %5 = arith.addf %2, %4 : vector<32x2xf32>
    %cst_5 = arith.constant 0.000000e+00 : f32
    %6 = vector.broadcast %cst_5 : f32 to vector<32x2xf32>
    %7 = arith.maximumf %5, %6 : vector<32x2xf32>
    %c0_6 = arith.constant 0 : index
    %c0_7 = arith.constant 0 : index
    %8 = vector.load %arg3[%c0_6, %c0_7] : memref<120x32xf32, #tpu.memory_space<vmem>>, vector<120x32xf32>
    %cst_8 = arith.constant dense<0.000000e+00> : vector<120x2xf32>
    %9 = tpu.matmul %8, %7, %cst_8 {dimension_numbers = #tpu.dot_dimension_numbers<[1], [0], [0], [1], [0, 0, 1, 1], [], []>} : vector<120x32xf32>, vector<32x2xf32>, vector<120x2xf32> -> vector<120x2xf32>
    %c0_9 = arith.constant 0 : index
    %c0_10 = arith.constant 0 : index
    %10 = vector.load %arg4[%c0_9, %c0_10] : memref<120x1xf32, #tpu.memory_space<vmem>>, vector<120x1xf32>
    %11 = vector.broadcast %10 : vector<120x1xf32> to vector<120x2xf32>
    %12 = arith.addf %9, %11 : vector<120x2xf32>
    %c0_11 = arith.constant 0 : index
    %c0_12 = arith.constant 0 : index
    %13 = vector.load %arg5[%c0_11, %c0_12] : memref<2x8xf32, #tpu.memory_space<vmem>>, vector<2x8xf32>
    %cst_13 = arith.constant dense<0.000000e+00> : vector<32x8xf32>
    %14 = tpu.matmul %0, %13, %cst_13 {dimension_numbers = #tpu.dot_dimension_numbers<[1], [0], [0], [1], [0, 0, 1, 1], [], []>} : vector<32x2xf32>, vector<2x8xf32>, vector<32x8xf32> -> vector<32x8xf32>
    %15 = vector.extract_strided_slice %12 {offsets = [0, 0], sizes = [64, 2], strides = [1, 1]} : vector<120x2xf32> to vector<64x2xf32>
    %cst_14 = arith.constant dense<0.000000e+00> : vector<64x8xf32>
    %16 = tpu.matmul %15, %13, %cst_14 {dimension_numbers = #tpu.dot_dimension_numbers<[1], [0], [0], [1], [0, 0, 1, 1], [], []>} : vector<64x2xf32>, vector<2x8xf32>, vector<64x8xf32> -> vector<64x8xf32>
    %17 = vector.extract_strided_slice %16 {offsets = [0, 0], sizes = [32, 8], strides = [1, 1]} : vector<64x8xf32> to vector<32x8xf32>
    %18 = arith.mulf %14, %17 : vector<32x8xf32>
    %19 = vector.extract_strided_slice %16 {offsets = [32, 0], sizes = [32, 8], strides = [1, 1]} : vector<64x8xf32> to vector<32x8xf32>
    %20 = arith.addf %18, %19 : vector<32x8xf32>
    %c0_15 = arith.constant 0 : index
    %c0_16 = arith.constant 0 : index
    %21 = vector.load %arg6[%c0_15, %c0_16] : memref<8x32xf32, #tpu.memory_space<vmem>>, vector<8x32xf32>
    %cst_17 = arith.constant dense<0.000000e+00> : vector<32x32xf32>
    %22 = tpu.matmul %20, %21, %cst_17 {dimension_numbers = #tpu.dot_dimension_numbers<[1], [0], [0], [1], [0, 0, 1, 1], [], []>} : vector<32x8xf32>, vector<8x32xf32>, vector<32x32xf32> -> vector<32x32xf32>
    %c0_18 = arith.constant 0 : index
    %c0_19 = arith.constant 0 : index
    %c0_20 = arith.constant 0 : index
    %23 = vector.load %arg13[%c0_18, %c0_19, %c0_20] : memref<9x32x32xf32, #tpu.memory_space<vmem>>, vector<1x32x32xf32>
    %24 = vector.shape_cast %23 : vector<1x32x32xf32> to vector<32x32xf32>
    %cst_21 = arith.constant dense<0.000000e+00> : vector<32x32xf32>
    %25 = tpu.matmul %22, %24, %cst_21 {dimension_numbers = #tpu.dot_dimension_numbers<[1], [0], [0], [1], [0, 0, 1, 1], [], []>} : vector<32x32xf32>, vector<32x32xf32>, vector<32x32xf32> -> vector<32x32xf32>
    %c0_22 = arith.constant 0 : index
    %c0_23 = arith.constant 0 : index
    %c0_24 = arith.constant 0 : index
    %26 = vector.load %arg8[%c0_22, %c0_23, %c0_24] : memref<9x16x32xf32, #tpu.memory_space<vmem>>, vector<1x16x32xf32>
    %27 = vector.shape_cast %26 : vector<1x16x32xf32> to vector<16x32xf32>
    %cst_25 = arith.constant dense<0.000000e+00> : vector<16x32xf32>
    %28 = tpu.matmul %27, %25, %cst_25 {dimension_numbers = #tpu.dot_dimension_numbers<[1], [0], [0], [1], [0, 0, 1, 1], [], []>} : vector<16x32xf32>, vector<32x32xf32>, vector<16x32xf32> -> vector<16x32xf32>
    %c1 = arith.constant 1 : index
    %c0_26 = arith.constant 0 : index
    %c0_27 = arith.constant 0 : index
    %29 = vector.load %arg13[%c1, %c0_26, %c0_27] : memref<9x32x32xf32, #tpu.memory_space<vmem>>, vector<1x32x32xf32>
    %30 = vector.shape_cast %29 : vector<1x32x32xf32> to vector<32x32xf32>
    %cst_28 = arith.constant dense<0.000000e+00> : vector<32x32xf32>
    %31 = tpu.matmul %22, %30, %cst_28 {dimension_numbers = #tpu.dot_dimension_numbers<[1], [0], [0], [1], [0, 0, 1, 1], [], []>} : vector<32x32xf32>, vector<32x32xf32>, vector<32x32xf32> -> vector<32x32xf32>
    %c1_29 = arith.constant 1 : index
    %c0_30 = arith.constant 0 : index
    %c0_31 = arith.constant 0 : index
    %32 = vector.load %arg8[%c1_29, %c0_30, %c0_31] : memref<9x16x32xf32, #tpu.memory_space<vmem>>, vector<1x16x32xf32>
    %33 = vector.shape_cast %32 : vector<1x16x32xf32> to vector<16x32xf32>
    %cst_32 = arith.constant dense<0.000000e+00> : vector<16x32xf32>
    %34 = tpu.matmul %33, %31, %cst_32 {dimension_numbers = #tpu.dot_dimension_numbers<[1], [0], [0], [1], [0, 0, 1, 1], [], []>} : vector<16x32xf32>, vector<32x32xf32>, vector<16x32xf32> -> vector<16x32xf32>
    %35 = arith.addf %28, %34 : vector<16x32xf32>
    %c2 = arith.constant 2 : index
    %c0_33 = arith.constant 0 : index
    %c0_34 = arith.constant 0 : index
    %36 = vector.load %arg13[%c2, %c0_33, %c0_34] : memref<9x32x32xf32, #tpu.memory_space<vmem>>, vector<1x32x32xf32>
    %37 = vector.shape_cast %36 : vector<1x32x32xf32> to vector<32x32xf32>
    %cst_35 = arith.constant dense<0.000000e+00> : vector<32x32xf32>
    %38 = tpu.matmul %22, %37, %cst_35 {dimension_numbers = #tpu.dot_dimension_numbers<[1], [0], [0], [1], [0, 0, 1, 1], [], []>} : vector<32x32xf32>, vector<32x32xf32>, vector<32x32xf32> -> vector<32x32xf32>
    %c2_36 = arith.constant 2 : index
    %c0_37 = arith.constant 0 : index
    %c0_38 = arith.constant 0 : index
    %39 = vector.load %arg8[%c2_36, %c0_37, %c0_38] : memref<9x16x32xf32, #tpu.memory_space<vmem>>, vector<1x16x32xf32>
    %40 = vector.shape_cast %39 : vector<1x16x32xf32> to vector<16x32xf32>
    %cst_39 = arith.constant dense<0.000000e+00> : vector<16x32xf32>
    %41 = tpu.matmul %40, %38, %cst_39 {dimension_numbers = #tpu.dot_dimension_numbers<[1], [0], [0], [1], [0, 0, 1, 1], [], []>} : vector<16x32xf32>, vector<32x32xf32>, vector<16x32xf32> -> vector<16x32xf32>
    %42 = arith.addf %35, %41 : vector<16x32xf32>
    %c3 = arith.constant 3 : index
    %c0_40 = arith.constant 0 : index
    %c0_41 = arith.constant 0 : index
    %43 = vector.load %arg13[%c3, %c0_40, %c0_41] : memref<9x32x32xf32, #tpu.memory_space<vmem>>, vector<1x32x32xf32>
    %44 = vector.shape_cast %43 : vector<1x32x32xf32> to vector<32x32xf32>
    %cst_42 = arith.constant dense<0.000000e+00> : vector<32x32xf32>
    %45 = tpu.matmul %22, %44, %cst_42 {dimension_numbers = #tpu.dot_dimension_numbers<[1], [0], [0], [1], [0, 0, 1, 1], [], []>} : vector<32x32xf32>, vector<32x32xf32>, vector<32x32xf32> -> vector<32x32xf32>
    %c3_43 = arith.constant 3 : index
    %c0_44 = arith.constant 0 : index
    %c0_45 = arith.constant 0 : index
    %46 = vector.load %arg8[%c3_43, %c0_44, %c0_45] : memref<9x16x32xf32, #tpu.memory_space<vmem>>, vector<1x16x32xf32>
    %47 = vector.shape_cast %46 : vector<1x16x32xf32> to vector<16x32xf32>
    %cst_46 = arith.constant dense<0.000000e+00> : vector<16x32xf32>
    %48 = tpu.matmul %47, %45, %cst_46 {dimension_numbers = #tpu.dot_dimension_numbers<[1], [0], [0], [1], [0, 0, 1, 1], [], []>} : vector<16x32xf32>, vector<32x32xf32>, vector<16x32xf32> -> vector<16x32xf32>
    %49 = arith.addf %42, %48 : vector<16x32xf32>
    %c4 = arith.constant 4 : index
    %c0_47 = arith.constant 0 : index
    %c0_48 = arith.constant 0 : index
    %50 = vector.load %arg13[%c4, %c0_47, %c0_48] : memref<9x32x32xf32, #tpu.memory_space<vmem>>, vector<1x32x32xf32>
    %51 = vector.shape_cast %50 : vector<1x32x32xf32> to vector<32x32xf32>
    %cst_49 = arith.constant dense<0.000000e+00> : vector<32x32xf32>
    %52 = tpu.matmul %22, %51, %cst_49 {dimension_numbers = #tpu.dot_dimension_numbers<[1], [0], [0], [1], [0, 0, 1, 1], [], []>} : vector<32x32xf32>, vector<32x32xf32>, vector<32x32xf32> -> vector<32x32xf32>
    %c4_50 = arith.constant 4 : index
    %c0_51 = arith.constant 0 : index
    %c0_52 = arith.constant 0 : index
    %53 = vector.load %arg8[%c4_50, %c0_51, %c0_52] : memref<9x16x32xf32, #tpu.memory_space<vmem>>, vector<1x16x32xf32>
    %54 = vector.shape_cast %53 : vector<1x16x32xf32> to vector<16x32xf32>
    %cst_53 = arith.constant dense<0.000000e+00> : vector<16x32xf32>
    %55 = tpu.matmul %54, %52, %cst_53 {dimension_numbers = #tpu.dot_dimension_numbers<[1], [0], [0], [1], [0, 0, 1, 1], [], []>} : vector<16x32xf32>, vector<32x32xf32>, vector<16x32xf32> -> vector<16x32xf32>
    %56 = arith.addf %49, %55 : vector<16x32xf32>
    %c5 = arith.constant 5 : index
    %c0_54 = arith.constant 0 : index
    %c0_55 = arith.constant 0 : index
    %57 = vector.load %arg13[%c5, %c0_54, %c0_55] : memref<9x32x32xf32, #tpu.memory_space<vmem>>, vector<1x32x32xf32>
    %58 = vector.shape_cast %57 : vector<1x32x32xf32> to vector<32x32xf32>
    %cst_56 = arith.constant dense<0.000000e+00> : vector<32x32xf32>
    %59 = tpu.matmul %22, %58, %cst_56 {dimension_numbers = #tpu.dot_dimension_numbers<[1], [0], [0], [1], [0, 0, 1, 1], [], []>} : vector<32x32xf32>, vector<32x32xf32>, vector<32x32xf32> -> vector<32x32xf32>
    %c5_57 = arith.constant 5 : index
    %c0_58 = arith.constant 0 : index
    %c0_59 = arith.constant 0 : index
    %60 = vector.load %arg8[%c5_57, %c0_58, %c0_59] : memref<9x16x32xf32, #tpu.memory_space<vmem>>, vector<1x16x32xf32>
    %61 = vector.shape_cast %60 : vector<1x16x32xf32> to vector<16x32xf32>
    %cst_60 = arith.constant dense<0.000000e+00> : vector<16x32xf32>
    %62 = tpu.matmul %61, %59, %cst_60 {dimension_numbers = #tpu.dot_dimension_numbers<[1], [0], [0], [1], [0, 0, 1, 1], [], []>} : vector<16x32xf32>, vector<32x32xf32>, vector<16x32xf32> -> vector<16x32xf32>
    %63 = arith.addf %56, %62 : vector<16x32xf32>
    %c6 = arith.constant 6 : index
    %c0_61 = arith.constant 0 : index
    %c0_62 = arith.constant 0 : index
    %64 = vector.load %arg13[%c6, %c0_61, %c0_62] : memref<9x32x32xf32, #tpu.memory_space<vmem>>, vector<1x32x32xf32>
    %65 = vector.shape_cast %64 : vector<1x32x32xf32> to vector<32x32xf32>
    %cst_63 = arith.constant dense<0.000000e+00> : vector<32x32xf32>
    %66 = tpu.matmul %22, %65, %cst_63 {dimension_numbers = #tpu.dot_dimension_numbers<[1], [0], [0], [1], [0, 0, 1, 1], [], []>} : vector<32x32xf32>, vector<32x32xf32>, vector<32x32xf32> -> vector<32x32xf32>
    %c6_64 = arith.constant 6 : index
    %c0_65 = arith.constant 0 : index
    %c0_66 = arith.constant 0 : index
    %67 = vector.load %arg8[%c6_64, %c0_65, %c0_66] : memref<9x16x32xf32, #tpu.memory_space<vmem>>, vector<1x16x32xf32>
    %68 = vector.shape_cast %67 : vector<1x16x32xf32> to vector<16x32xf32>
    %cst_67 = arith.constant dense<0.000000e+00> : vector<16x32xf32>
    %69 = tpu.matmul %68, %66, %cst_67 {dimension_numbers = #tpu.dot_dimension_numbers<[1], [0], [0], [1], [0, 0, 1, 1], [], []>} : vector<16x32xf32>, vector<32x32xf32>, vector<16x32xf32> -> vector<16x32xf32>
    %70 = arith.addf %63, %69 : vector<16x32xf32>
    %c7 = arith.constant 7 : index
    %c0_68 = arith.constant 0 : index
    %c0_69 = arith.constant 0 : index
    %71 = vector.load %arg13[%c7, %c0_68, %c0_69] : memref<9x32x32xf32, #tpu.memory_space<vmem>>, vector<1x32x32xf32>
    %72 = vector.shape_cast %71 : vector<1x32x32xf32> to vector<32x32xf32>
    %cst_70 = arith.constant dense<0.000000e+00> : vector<32x32xf32>
    %73 = tpu.matmul %22, %72, %cst_70 {dimension_numbers = #tpu.dot_dimension_numbers<[1], [0], [0], [1], [0, 0, 1, 1], [], []>} : vector<32x32xf32>, vector<32x32xf32>, vector<32x32xf32> -> vector<32x32xf32>
    %c7_71 = arith.constant 7 : index
    %c0_72 = arith.constant 0 : index
    %c0_73 = arith.constant 0 : index
    %74 = vector.load %arg8[%c7_71, %c0_72, %c0_73] : memref<9x16x32xf32, #tpu.memory_space<vmem>>, vector<1x16x32xf32>
    %75 = vector.shape_cast %74 : vector<1x16x32xf32> to vector<16x32xf32>
    %cst_74 = arith.constant dense<0.000000e+00> : vector<16x32xf32>
    %76 = tpu.matmul %75, %73, %cst_74 {dimension_numbers = #tpu.dot_dimension_numbers<[1], [0], [0], [1], [0, 0, 1, 1], [], []>} : vector<16x32xf32>, vector<32x32xf32>, vector<16x32xf32> -> vector<16x32xf32>
    %77 = arith.addf %70, %76 : vector<16x32xf32>
    %c8 = arith.constant 8 : index
    %c0_75 = arith.constant 0 : index
    %c0_76 = arith.constant 0 : index
    %78 = vector.load %arg13[%c8, %c0_75, %c0_76] : memref<9x32x32xf32, #tpu.memory_space<vmem>>, vector<1x32x32xf32>
    %79 = vector.shape_cast %78 : vector<1x32x32xf32> to vector<32x32xf32>
    %cst_77 = arith.constant dense<0.000000e+00> : vector<32x32xf32>
    %80 = tpu.matmul %22, %79, %cst_77 {dimension_numbers = #tpu.dot_dimension_numbers<[1], [0], [0], [1], [0, 0, 1, 1], [], []>} : vector<32x32xf32>, vector<32x32xf32>, vector<32x32xf32> -> vector<32x32xf32>
    %c8_78 = arith.constant 8 : index
    %c0_79 = arith.constant 0 : index
    %c0_80 = arith.constant 0 : index
    %81 = vector.load %arg8[%c8_78, %c0_79, %c0_80] : memref<9x16x32xf32, #tpu.memory_space<vmem>>, vector<1x16x32xf32>
    %82 = vector.shape_cast %81 : vector<1x16x32xf32> to vector<16x32xf32>
    %cst_81 = arith.constant dense<0.000000e+00> : vector<16x32xf32>
    %83 = tpu.matmul %82, %80, %cst_81 {dimension_numbers = #tpu.dot_dimension_numbers<[1], [0], [0], [1], [0, 0, 1, 1], [], []>} : vector<16x32xf32>, vector<32x32xf32>, vector<16x32xf32> -> vector<16x32xf32>
    %84 = arith.addf %77, %83 : vector<16x32xf32>
    %c0_82 = arith.constant 0 : index
    %c0_83 = arith.constant 0 : index
    %85 = vector.load %arg9[%c0_82, %c0_83] : memref<16x1xf32, #tpu.memory_space<vmem>>, vector<16x1xf32>
    %86 = vector.broadcast %85 : vector<16x1xf32> to vector<16x32xf32>
    %87 = arith.addf %84, %86 : vector<16x32xf32>
    %c0_84 = arith.constant 0 : index
    %c0_85 = arith.constant 0 : index
    %88 = vector.load %arg12[%c0_84, %c0_85] : memref<16x32xf32, #tpu.memory_space<vmem>>, vector<16x32xf32>
    %89 = arith.addf %87, %88 : vector<16x32xf32>
    %cst_86 = arith.constant 0.000000e+00 : f32
    %90 = vector.broadcast %cst_86 : f32 to vector<16x32xf32>
    %91 = arith.maximumf %89, %90 : vector<16x32xf32>
    %92 = vector.extract_strided_slice %12 {offsets = [64, 0], sizes = [32, 2], strides = [1, 1]} : vector<120x2xf32> to vector<32x2xf32>
    %c0_87 = arith.constant 0 : index
    %c0_88 = arith.constant 0 : index
    %93 = vector.load %arg7[%c0_87, %c0_88] : memref<2x32xf32, #tpu.memory_space<vmem>>, vector<2x32xf32>
    %cst_89 = arith.constant dense<0.000000e+00> : vector<32x32xf32>
    %94 = tpu.matmul %92, %93, %cst_89 {dimension_numbers = #tpu.dot_dimension_numbers<[1], [0], [0], [1], [0, 0, 1, 1], [], []>} : vector<32x2xf32>, vector<2x32xf32>, vector<32x32xf32> -> vector<32x32xf32>
    %95 = vector.extract_strided_slice %94 {offsets = [0, 0], sizes = [16, 32], strides = [1, 1]} : vector<32x32xf32> to vector<16x32xf32>
    %96 = arith.mulf %91, %95 : vector<16x32xf32>
    %97 = vector.extract_strided_slice %94 {offsets = [16, 0], sizes = [16, 32], strides = [1, 1]} : vector<32x32xf32> to vector<16x32xf32>
    %98 = arith.addf %96, %97 : vector<16x32xf32>
    %c0_90 = arith.constant 0 : index
    %c0_91 = arith.constant 0 : index
    %c0_92 = arith.constant 0 : index
    %99 = vector.load %arg13[%c0_90, %c0_91, %c0_92] : memref<9x32x32xf32, #tpu.memory_space<vmem>>, vector<1x32x32xf32>
    %100 = vector.shape_cast %99 : vector<1x32x32xf32> to vector<32x32xf32>
    %cst_93 = arith.constant dense<0.000000e+00> : vector<16x32xf32>
    %101 = tpu.matmul %98, %100, %cst_93 {dimension_numbers = #tpu.dot_dimension_numbers<[1], [0], [0], [1], [0, 0, 1, 1], [], []>} : vector<16x32xf32>, vector<32x32xf32>, vector<16x32xf32> -> vector<16x32xf32>
    %c0_94 = arith.constant 0 : index
    %c0_95 = arith.constant 0 : index
    %c0_96 = arith.constant 0 : index
    %102 = vector.load %arg10[%c0_94, %c0_95, %c0_96] : memref<9x16x16xf32, #tpu.memory_space<vmem>>, vector<1x16x16xf32>
    %103 = vector.shape_cast %102 : vector<1x16x16xf32> to vector<16x16xf32>
    %cst_97 = arith.constant dense<0.000000e+00> : vector<16x32xf32>
    %104 = tpu.matmul %103, %101, %cst_97 {dimension_numbers = #tpu.dot_dimension_numbers<[1], [0], [0], [1], [0, 0, 1, 1], [], []>} : vector<16x16xf32>, vector<16x32xf32>, vector<16x32xf32> -> vector<16x32xf32>
    %c1_98 = arith.constant 1 : index
    %c0_99 = arith.constant 0 : index
    %c0_100 = arith.constant 0 : index
    %105 = vector.load %arg13[%c1_98, %c0_99, %c0_100] : memref<9x32x32xf32, #tpu.memory_space<vmem>>, vector<1x32x32xf32>
    %106 = vector.shape_cast %105 : vector<1x32x32xf32> to vector<32x32xf32>
    %cst_101 = arith.constant dense<0.000000e+00> : vector<16x32xf32>
    %107 = tpu.matmul %98, %106, %cst_101 {dimension_numbers = #tpu.dot_dimension_numbers<[1], [0], [0], [1], [0, 0, 1, 1], [], []>} : vector<16x32xf32>, vector<32x32xf32>, vector<16x32xf32> -> vector<16x32xf32>
    %c1_102 = arith.constant 1 : index
    %c0_103 = arith.constant 0 : index
    %c0_104 = arith.constant 0 : index
    %108 = vector.load %arg10[%c1_102, %c0_103, %c0_104] : memref<9x16x16xf32, #tpu.memory_space<vmem>>, vector<1x16x16xf32>
    %109 = vector.shape_cast %108 : vector<1x16x16xf32> to vector<16x16xf32>
    %cst_105 = arith.constant dense<0.000000e+00> : vector<16x32xf32>
    %110 = tpu.matmul %109, %107, %cst_105 {dimension_numbers = #tpu.dot_dimension_numbers<[1], [0], [0], [1], [0, 0, 1, 1], [], []>} : vector<16x16xf32>, vector<16x32xf32>, vector<16x32xf32> -> vector<16x32xf32>
    %111 = arith.addf %104, %110 : vector<16x32xf32>
    %c2_106 = arith.constant 2 : index
    %c0_107 = arith.constant 0 : index
    %c0_108 = arith.constant 0 : index
    %112 = vector.load %arg13[%c2_106, %c0_107, %c0_108] : memref<9x32x32xf32, #tpu.memory_space<vmem>>, vector<1x32x32xf32>
    %113 = vector.shape_cast %112 : vector<1x32x32xf32> to vector<32x32xf32>
    %cst_109 = arith.constant dense<0.000000e+00> : vector<16x32xf32>
    %114 = tpu.matmul %98, %113, %cst_109 {dimension_numbers = #tpu.dot_dimension_numbers<[1], [0], [0], [1], [0, 0, 1, 1], [], []>} : vector<16x32xf32>, vector<32x32xf32>, vector<16x32xf32> -> vector<16x32xf32>
    %c2_110 = arith.constant 2 : index
    %c0_111 = arith.constant 0 : index
    %c0_112 = arith.constant 0 : index
    %115 = vector.load %arg10[%c2_110, %c0_111, %c0_112] : memref<9x16x16xf32, #tpu.memory_space<vmem>>, vector<1x16x16xf32>
    %116 = vector.shape_cast %115 : vector<1x16x16xf32> to vector<16x16xf32>
    %cst_113 = arith.constant dense<0.000000e+00> : vector<16x32xf32>
    %117 = tpu.matmul %116, %114, %cst_113 {dimension_numbers = #tpu.dot_dimension_numbers<[1], [0], [0], [1], [0, 0, 1, 1], [], []>} : vector<16x16xf32>, vector<16x32xf32>, vector<16x32xf32> -> vector<16x32xf32>
    %118 = arith.addf %111, %117 : vector<16x32xf32>
    %c3_114 = arith.constant 3 : index
    %c0_115 = arith.constant 0 : index
    %c0_116 = arith.constant 0 : index
    %119 = vector.load %arg13[%c3_114, %c0_115, %c0_116] : memref<9x32x32xf32, #tpu.memory_space<vmem>>, vector<1x32x32xf32>
    %120 = vector.shape_cast %119 : vector<1x32x32xf32> to vector<32x32xf32>
    %cst_117 = arith.constant dense<0.000000e+00> : vector<16x32xf32>
    %121 = tpu.matmul %98, %120, %cst_117 {dimension_numbers = #tpu.dot_dimension_numbers<[1], [0], [0], [1], [0, 0, 1, 1], [], []>} : vector<16x32xf32>, vector<32x32xf32>, vector<16x32xf32> -> vector<16x32xf32>
    %c3_118 = arith.constant 3 : index
    %c0_119 = arith.constant 0 : index
    %c0_120 = arith.constant 0 : index
    %122 = vector.load %arg10[%c3_118, %c0_119, %c0_120] : memref<9x16x16xf32, #tpu.memory_space<vmem>>, vector<1x16x16xf32>
    %123 = vector.shape_cast %122 : vector<1x16x16xf32> to vector<16x16xf32>
    %cst_121 = arith.constant dense<0.000000e+00> : vector<16x32xf32>
    %124 = tpu.matmul %123, %121, %cst_121 {dimension_numbers = #tpu.dot_dimension_numbers<[1], [0], [0], [1], [0, 0, 1, 1], [], []>} : vector<16x16xf32>, vector<16x32xf32>, vector<16x32xf32> -> vector<16x32xf32>
    %125 = arith.addf %118, %124 : vector<16x32xf32>
    %c4_122 = arith.constant 4 : index
    %c0_123 = arith.constant 0 : index
    %c0_124 = arith.constant 0 : index
    %126 = vector.load %arg13[%c4_122, %c0_123, %c0_124] : memref<9x32x32xf32, #tpu.memory_space<vmem>>, vector<1x32x32xf32>
    %127 = vector.shape_cast %126 : vector<1x32x32xf32> to vector<32x32xf32>
    %cst_125 = arith.constant dense<0.000000e+00> : vector<16x32xf32>
    %128 = tpu.matmul %98, %127, %cst_125 {dimension_numbers = #tpu.dot_dimension_numbers<[1], [0], [0], [1], [0, 0, 1, 1], [], []>} : vector<16x32xf32>, vector<32x32xf32>, vector<16x32xf32> -> vector<16x32xf32>
    %c4_126 = arith.constant 4 : index
    %c0_127 = arith.constant 0 : index
    %c0_128 = arith.constant 0 : index
    %129 = vector.load %arg10[%c4_126, %c0_127, %c0_128] : memref<9x16x16xf32, #tpu.memory_space<vmem>>, vector<1x16x16xf32>
    %130 = vector.shape_cast %129 : vector<1x16x16xf32> to vector<16x16xf32>
    %cst_129 = arith.constant dense<0.000000e+00> : vector<16x32xf32>
    %131 = tpu.matmul %130, %128, %cst_129 {dimension_numbers = #tpu.dot_dimension_numbers<[1], [0], [0], [1], [0, 0, 1, 1], [], []>} : vector<16x16xf32>, vector<16x32xf32>, vector<16x32xf32> -> vector<16x32xf32>
    %132 = arith.addf %125, %131 : vector<16x32xf32>
    %c5_130 = arith.constant 5 : index
    %c0_131 = arith.constant 0 : index
    %c0_132 = arith.constant 0 : index
    %133 = vector.load %arg13[%c5_130, %c0_131, %c0_132] : memref<9x32x32xf32, #tpu.memory_space<vmem>>, vector<1x32x32xf32>
    %134 = vector.shape_cast %133 : vector<1x32x32xf32> to vector<32x32xf32>
    %cst_133 = arith.constant dense<0.000000e+00> : vector<16x32xf32>
    %135 = tpu.matmul %98, %134, %cst_133 {dimension_numbers = #tpu.dot_dimension_numbers<[1], [0], [0], [1], [0, 0, 1, 1], [], []>} : vector<16x32xf32>, vector<32x32xf32>, vector<16x32xf32> -> vector<16x32xf32>
    %c5_134 = arith.constant 5 : index
    %c0_135 = arith.constant 0 : index
    %c0_136 = arith.constant 0 : index
    %136 = vector.load %arg10[%c5_134, %c0_135, %c0_136] : memref<9x16x16xf32, #tpu.memory_space<vmem>>, vector<1x16x16xf32>
    %137 = vector.shape_cast %136 : vector<1x16x16xf32> to vector<16x16xf32>
    %cst_137 = arith.constant dense<0.000000e+00> : vector<16x32xf32>
    %138 = tpu.matmul %137, %135, %cst_137 {dimension_numbers = #tpu.dot_dimension_numbers<[1], [0], [0], [1], [0, 0, 1, 1], [], []>} : vector<16x16xf32>, vector<16x32xf32>, vector<16x32xf32> -> vector<16x32xf32>
    %139 = arith.addf %132, %138 : vector<16x32xf32>
    %c6_138 = arith.constant 6 : index
    %c0_139 = arith.constant 0 : index
    %c0_140 = arith.constant 0 : index
    %140 = vector.load %arg13[%c6_138, %c0_139, %c0_140] : memref<9x32x32xf32, #tpu.memory_space<vmem>>, vector<1x32x32xf32>
    %141 = vector.shape_cast %140 : vector<1x32x32xf32> to vector<32x32xf32>
    %cst_141 = arith.constant dense<0.000000e+00> : vector<16x32xf32>
    %142 = tpu.matmul %98, %141, %cst_141 {dimension_numbers = #tpu.dot_dimension_numbers<[1], [0], [0], [1], [0, 0, 1, 1], [], []>} : vector<16x32xf32>, vector<32x32xf32>, vector<16x32xf32> -> vector<16x32xf32>
    %c6_142 = arith.constant 6 : index
    %c0_143 = arith.constant 0 : index
    %c0_144 = arith.constant 0 : index
    %143 = vector.load %arg10[%c6_142, %c0_143, %c0_144] : memref<9x16x16xf32, #tpu.memory_space<vmem>>, vector<1x16x16xf32>
    %144 = vector.shape_cast %143 : vector<1x16x16xf32> to vector<16x16xf32>
    %cst_145 = arith.constant dense<0.000000e+00> : vector<16x32xf32>
    %145 = tpu.matmul %144, %142, %cst_145 {dimension_numbers = #tpu.dot_dimension_numbers<[1], [0], [0], [1], [0, 0, 1, 1], [], []>} : vector<16x16xf32>, vector<16x32xf32>, vector<16x32xf32> -> vector<16x32xf32>
    %146 = arith.addf %139, %145 : vector<16x32xf32>
    %c7_146 = arith.constant 7 : index
    %c0_147 = arith.constant 0 : index
    %c0_148 = arith.constant 0 : index
    %147 = vector.load %arg13[%c7_146, %c0_147, %c0_148] : memref<9x32x32xf32, #tpu.memory_space<vmem>>, vector<1x32x32xf32>
    %148 = vector.shape_cast %147 : vector<1x32x32xf32> to vector<32x32xf32>
    %cst_149 = arith.constant dense<0.000000e+00> : vector<16x32xf32>
    %149 = tpu.matmul %98, %148, %cst_149 {dimension_numbers = #tpu.dot_dimension_numbers<[1], [0], [0], [1], [0, 0, 1, 1], [], []>} : vector<16x32xf32>, vector<32x32xf32>, vector<16x32xf32> -> vector<16x32xf32>
    %c7_150 = arith.constant 7 : index
    %c0_151 = arith.constant 0 : index
    %c0_152 = arith.constant 0 : index
    %150 = vector.load %arg10[%c7_150, %c0_151, %c0_152] : memref<9x16x16xf32, #tpu.memory_space<vmem>>, vector<1x16x16xf32>
    %151 = vector.shape_cast %150 : vector<1x16x16xf32> to vector<16x16xf32>
    %cst_153 = arith.constant dense<0.000000e+00> : vector<16x32xf32>
    %152 = tpu.matmul %151, %149, %cst_153 {dimension_numbers = #tpu.dot_dimension_numbers<[1], [0], [0], [1], [0, 0, 1, 1], [], []>} : vector<16x16xf32>, vector<16x32xf32>, vector<16x32xf32> -> vector<16x32xf32>
    %153 = arith.addf %146, %152 : vector<16x32xf32>
    %c8_154 = arith.constant 8 : index
    %c0_155 = arith.constant 0 : index
    %c0_156 = arith.constant 0 : index
    %154 = vector.load %arg13[%c8_154, %c0_155, %c0_156] : memref<9x32x32xf32, #tpu.memory_space<vmem>>, vector<1x32x32xf32>
    %155 = vector.shape_cast %154 : vector<1x32x32xf32> to vector<32x32xf32>
    %cst_157 = arith.constant dense<0.000000e+00> : vector<16x32xf32>
    %156 = tpu.matmul %98, %155, %cst_157 {dimension_numbers = #tpu.dot_dimension_numbers<[1], [0], [0], [1], [0, 0, 1, 1], [], []>} : vector<16x32xf32>, vector<32x32xf32>, vector<16x32xf32> -> vector<16x32xf32>
    %c8_158 = arith.constant 8 : index
    %c0_159 = arith.constant 0 : index
    %c0_160 = arith.constant 0 : index
    %157 = vector.load %arg10[%c8_158, %c0_159, %c0_160] : memref<9x16x16xf32, #tpu.memory_space<vmem>>, vector<1x16x16xf32>
    %158 = vector.shape_cast %157 : vector<1x16x16xf32> to vector<16x16xf32>
    %cst_161 = arith.constant dense<0.000000e+00> : vector<16x32xf32>
    %159 = tpu.matmul %158, %156, %cst_161 {dimension_numbers = #tpu.dot_dimension_numbers<[1], [0], [0], [1], [0, 0, 1, 1], [], []>} : vector<16x16xf32>, vector<16x32xf32>, vector<16x32xf32> -> vector<16x32xf32>
    %160 = arith.addf %153, %159 : vector<16x32xf32>
    %c0_162 = arith.constant 0 : index
    %c0_163 = arith.constant 0 : index
    %161 = vector.load %arg11[%c0_162, %c0_163] : memref<16x1xf32, #tpu.memory_space<vmem>>, vector<16x1xf32>
    %162 = vector.broadcast %161 : vector<16x1xf32> to vector<16x32xf32>
    %163 = arith.addf %160, %162 : vector<16x32xf32>
    %cst_164 = arith.constant 0.000000e+00 : f32
    %164 = vector.broadcast %cst_164 : f32 to vector<16x32xf32>
    %165 = arith.maximumf %163, %164 : vector<16x32xf32>
    %c0_165 = arith.constant 0 : index
    %c0_166 = arith.constant 0 : index
    %166 = vector.load %arg14[%c0_165, %c0_166] : memref<32x128xf32, #tpu.memory_space<vmem>>, vector<32x128xf32>
    %cst_167 = arith.constant dense<0.000000e+00> : vector<16x128xf32>
    %167 = tpu.matmul %165, %166, %cst_167 {dimension_numbers = #tpu.dot_dimension_numbers<[1], [0], [0], [1], [0, 0, 1, 1], [], []>} : vector<16x32xf32>, vector<32x128xf32>, vector<16x128xf32> -> vector<16x128xf32>
    %c9_i32 = arith.constant 9 : i32
    %168 = tpu.dynamic_rotate %167 by %c9_i32 dim 1 : vector<16x128xf32>, i32 -> vector<16x128xf32>
    %c0_168 = arith.constant 0 : index
    %c0_169 = arith.constant 0 : index
    %c0_170 = arith.constant 0 : index
    %169 = vector.load %arg16[%c0_168, %c0_169, %c0_170] : memref<9x8x16xf32, #tpu.memory_space<vmem>>, vector<1x8x16xf32>
    %170 = vector.shape_cast %169 : vector<1x8x16xf32> to vector<8x16xf32>
    %cst_171 = arith.constant dense<0.000000e+00> : vector<8x128xf32>
    %171 = tpu.matmul %170, %168, %cst_171 {dimension_numbers = #tpu.dot_dimension_numbers<[1], [0], [0], [1], [0, 0, 1, 1], [], []>} : vector<8x16xf32>, vector<16x128xf32>, vector<8x128xf32> -> vector<8x128xf32>
    %c0_172 = arith.constant 0 : index
    %c0_173 = arith.constant 0 : index
    %c0_174 = arith.constant 0 : index
    %172 = vector.load %arg21[%c0_172, %c0_173, %c0_174] : memref<9x1x128xf32, #tpu.memory_space<vmem>>, vector<1x1x128xf32>
    %173 = vector.shape_cast %172 : vector<1x1x128xf32> to vector<1x128xf32>
    %174 = vector.broadcast %173 : vector<1x128xf32> to vector<8x128xf32>
    %175 = arith.mulf %171, %174 : vector<8x128xf32>
    %c8_i32 = arith.constant 8 : i32
    %176 = tpu.dynamic_rotate %167 by %c8_i32 dim 1 : vector<16x128xf32>, i32 -> vector<16x128xf32>
    %c1_175 = arith.constant 1 : index
    %c0_176 = arith.constant 0 : index
    %c0_177 = arith.constant 0 : index
    %177 = vector.load %arg16[%c1_175, %c0_176, %c0_177] : memref<9x8x16xf32, #tpu.memory_space<vmem>>, vector<1x8x16xf32>
    %178 = vector.shape_cast %177 : vector<1x8x16xf32> to vector<8x16xf32>
    %cst_178 = arith.constant dense<0.000000e+00> : vector<8x128xf32>
    %179 = tpu.matmul %178, %176, %cst_178 {dimension_numbers = #tpu.dot_dimension_numbers<[1], [0], [0], [1], [0, 0, 1, 1], [], []>} : vector<8x16xf32>, vector<16x128xf32>, vector<8x128xf32> -> vector<8x128xf32>
    %c1_179 = arith.constant 1 : index
    %c0_180 = arith.constant 0 : index
    %c0_181 = arith.constant 0 : index
    %180 = vector.load %arg21[%c1_179, %c0_180, %c0_181] : memref<9x1x128xf32, #tpu.memory_space<vmem>>, vector<1x1x128xf32>
    %181 = vector.shape_cast %180 : vector<1x1x128xf32> to vector<1x128xf32>
    %182 = vector.broadcast %181 : vector<1x128xf32> to vector<8x128xf32>
    %183 = arith.mulf %179, %182 : vector<8x128xf32>
    %184 = arith.addf %175, %183 : vector<8x128xf32>
    %c7_i32 = arith.constant 7 : i32
    %185 = tpu.dynamic_rotate %167 by %c7_i32 dim 1 : vector<16x128xf32>, i32 -> vector<16x128xf32>
    %c2_182 = arith.constant 2 : index
    %c0_183 = arith.constant 0 : index
    %c0_184 = arith.constant 0 : index
    %186 = vector.load %arg16[%c2_182, %c0_183, %c0_184] : memref<9x8x16xf32, #tpu.memory_space<vmem>>, vector<1x8x16xf32>
    %187 = vector.shape_cast %186 : vector<1x8x16xf32> to vector<8x16xf32>
    %cst_185 = arith.constant dense<0.000000e+00> : vector<8x128xf32>
    %188 = tpu.matmul %187, %185, %cst_185 {dimension_numbers = #tpu.dot_dimension_numbers<[1], [0], [0], [1], [0, 0, 1, 1], [], []>} : vector<8x16xf32>, vector<16x128xf32>, vector<8x128xf32> -> vector<8x128xf32>
    %c2_186 = arith.constant 2 : index
    %c0_187 = arith.constant 0 : index
    %c0_188 = arith.constant 0 : index
    %189 = vector.load %arg21[%c2_186, %c0_187, %c0_188] : memref<9x1x128xf32, #tpu.memory_space<vmem>>, vector<1x1x128xf32>
    %190 = vector.shape_cast %189 : vector<1x1x128xf32> to vector<1x128xf32>
    %191 = vector.broadcast %190 : vector<1x128xf32> to vector<8x128xf32>
    %192 = arith.mulf %188, %191 : vector<8x128xf32>
    %193 = arith.addf %184, %192 : vector<8x128xf32>
    %c1_i32 = arith.constant 1 : i32
    %194 = tpu.dynamic_rotate %167 by %c1_i32 dim 1 : vector<16x128xf32>, i32 -> vector<16x128xf32>
    %c3_189 = arith.constant 3 : index
    %c0_190 = arith.constant 0 : index
    %c0_191 = arith.constant 0 : index
    %195 = vector.load %arg16[%c3_189, %c0_190, %c0_191] : memref<9x8x16xf32, #tpu.memory_space<vmem>>, vector<1x8x16xf32>
    %196 = vector.shape_cast %195 : vector<1x8x16xf32> to vector<8x16xf32>
    %cst_192 = arith.constant dense<0.000000e+00> : vector<8x128xf32>
    %197 = tpu.matmul %196, %194, %cst_192 {dimension_numbers = #tpu.dot_dimension_numbers<[1], [0], [0], [1], [0, 0, 1, 1], [], []>} : vector<8x16xf32>, vector<16x128xf32>, vector<8x128xf32> -> vector<8x128xf32>
    %c3_193 = arith.constant 3 : index
    %c0_194 = arith.constant 0 : index
    %c0_195 = arith.constant 0 : index
    %198 = vector.load %arg21[%c3_193, %c0_194, %c0_195] : memref<9x1x128xf32, #tpu.memory_space<vmem>>, vector<1x1x128xf32>
    %199 = vector.shape_cast %198 : vector<1x1x128xf32> to vector<1x128xf32>
    %200 = vector.broadcast %199 : vector<1x128xf32> to vector<8x128xf32>
    %201 = arith.mulf %197, %200 : vector<8x128xf32>
    %202 = arith.addf %193, %201 : vector<8x128xf32>
    %c4_196 = arith.constant 4 : index
    %c0_197 = arith.constant 0 : index
    %c0_198 = arith.constant 0 : index
    %203 = vector.load %arg16[%c4_196, %c0_197, %c0_198] : memref<9x8x16xf32, #tpu.memory_space<vmem>>, vector<1x8x16xf32>
    %204 = vector.shape_cast %203 : vector<1x8x16xf32> to vector<8x16xf32>
    %cst_199 = arith.constant dense<0.000000e+00> : vector<8x128xf32>
    %205 = tpu.matmul %204, %167, %cst_199 {dimension_numbers = #tpu.dot_dimension_numbers<[1], [0], [0], [1], [0, 0, 1, 1], [], []>} : vector<8x16xf32>, vector<16x128xf32>, vector<8x128xf32> -> vector<8x128xf32>
    %206 = arith.addf %202, %205 : vector<8x128xf32>
    %c127_i32 = arith.constant 127 : i32
    %207 = tpu.dynamic_rotate %167 by %c127_i32 dim 1 : vector<16x128xf32>, i32 -> vector<16x128xf32>
    %c5_200 = arith.constant 5 : index
    %c0_201 = arith.constant 0 : index
    %c0_202 = arith.constant 0 : index
    %208 = vector.load %arg16[%c5_200, %c0_201, %c0_202] : memref<9x8x16xf32, #tpu.memory_space<vmem>>, vector<1x8x16xf32>
    %209 = vector.shape_cast %208 : vector<1x8x16xf32> to vector<8x16xf32>
    %cst_203 = arith.constant dense<0.000000e+00> : vector<8x128xf32>
    %210 = tpu.matmul %209, %207, %cst_203 {dimension_numbers = #tpu.dot_dimension_numbers<[1], [0], [0], [1], [0, 0, 1, 1], [], []>} : vector<8x16xf32>, vector<16x128xf32>, vector<8x128xf32> -> vector<8x128xf32>
    %c5_204 = arith.constant 5 : index
    %c0_205 = arith.constant 0 : index
    %c0_206 = arith.constant 0 : index
    %211 = vector.load %arg21[%c5_204, %c0_205, %c0_206] : memref<9x1x128xf32, #tpu.memory_space<vmem>>, vector<1x1x128xf32>
    %212 = vector.shape_cast %211 : vector<1x1x128xf32> to vector<1x128xf32>
    %213 = vector.broadcast %212 : vector<1x128xf32> to vector<8x128xf32>
    %214 = arith.mulf %210, %213 : vector<8x128xf32>
    %215 = arith.addf %206, %214 : vector<8x128xf32>
    %c121_i32 = arith.constant 121 : i32
    %216 = tpu.dynamic_rotate %167 by %c121_i32 dim 1 : vector<16x128xf32>, i32 -> vector<16x128xf32>
    %c6_207 = arith.constant 6 : index
    %c0_208 = arith.constant 0 : index
    %c0_209 = arith.constant 0 : index
    %217 = vector.load %arg16[%c6_207, %c0_208, %c0_209] : memref<9x8x16xf32, #tpu.memory_space<vmem>>, vector<1x8x16xf32>
    %218 = vector.shape_cast %217 : vector<1x8x16xf32> to vector<8x16xf32>
    %cst_210 = arith.constant dense<0.000000e+00> : vector<8x128xf32>
    %219 = tpu.matmul %218, %216, %cst_210 {dimension_numbers = #tpu.dot_dimension_numbers<[1], [0], [0], [1], [0, 0, 1, 1], [], []>} : vector<8x16xf32>, vector<16x128xf32>, vector<8x128xf32> -> vector<8x128xf32>
    %c6_211 = arith.constant 6 : index
    %c0_212 = arith.constant 0 : index
    %c0_213 = arith.constant 0 : index
    %220 = vector.load %arg21[%c6_211, %c0_212, %c0_213] : memref<9x1x128xf32, #tpu.memory_space<vmem>>, vector<1x1x128xf32>
    %221 = vector.shape_cast %220 : vector<1x1x128xf32> to vector<1x128xf32>
    %222 = vector.broadcast %221 : vector<1x128xf32> to vector<8x128xf32>
    %223 = arith.mulf %219, %222 : vector<8x128xf32>
    %224 = arith.addf %215, %223 : vector<8x128xf32>
    %c120_i32 = arith.constant 120 : i32
    %225 = tpu.dynamic_rotate %167 by %c120_i32 dim 1 : vector<16x128xf32>, i32 -> vector<16x128xf32>
    %c7_214 = arith.constant 7 : index
    %c0_215 = arith.constant 0 : index
    %c0_216 = arith.constant 0 : index
    %226 = vector.load %arg16[%c7_214, %c0_215, %c0_216] : memref<9x8x16xf32, #tpu.memory_space<vmem>>, vector<1x8x16xf32>
    %227 = vector.shape_cast %226 : vector<1x8x16xf32> to vector<8x16xf32>
    %cst_217 = arith.constant dense<0.000000e+00> : vector<8x128xf32>
    %228 = tpu.matmul %227, %225, %cst_217 {dimension_numbers = #tpu.dot_dimension_numbers<[1], [0], [0], [1], [0, 0, 1, 1], [], []>} : vector<8x16xf32>, vector<16x128xf32>, vector<8x128xf32> -> vector<8x128xf32>
    %c7_218 = arith.constant 7 : index
    %c0_219 = arith.constant 0 : index
    %c0_220 = arith.constant 0 : index
    %229 = vector.load %arg21[%c7_218, %c0_219, %c0_220] : memref<9x1x128xf32, #tpu.memory_space<vmem>>, vector<1x1x128xf32>
    %230 = vector.shape_cast %229 : vector<1x1x128xf32> to vector<1x128xf32>
    %231 = vector.broadcast %230 : vector<1x128xf32> to vector<8x128xf32>
    %232 = arith.mulf %228, %231 : vector<8x128xf32>
    %233 = arith.addf %224, %232 : vector<8x128xf32>
    %c119_i32 = arith.constant 119 : i32
    %234 = tpu.dynamic_rotate %167 by %c119_i32 dim 1 : vector<16x128xf32>, i32 -> vector<16x128xf32>
    %c8_221 = arith.constant 8 : index
    %c0_222 = arith.constant 0 : index
    %c0_223 = arith.constant 0 : index
    %235 = vector.load %arg16[%c8_221, %c0_222, %c0_223] : memref<9x8x16xf32, #tpu.memory_space<vmem>>, vector<1x8x16xf32>
    %236 = vector.shape_cast %235 : vector<1x8x16xf32> to vector<8x16xf32>
    %cst_224 = arith.constant dense<0.000000e+00> : vector<8x128xf32>
    %237 = tpu.matmul %236, %234, %cst_224 {dimension_numbers = #tpu.dot_dimension_numbers<[1], [0], [0], [1], [0, 0, 1, 1], [], []>} : vector<8x16xf32>, vector<16x128xf32>, vector<8x128xf32> -> vector<8x128xf32>
    %c8_225 = arith.constant 8 : index
    %c0_226 = arith.constant 0 : index
    %c0_227 = arith.constant 0 : index
    %238 = vector.load %arg21[%c8_225, %c0_226, %c0_227] : memref<9x1x128xf32, #tpu.memory_space<vmem>>, vector<1x1x128xf32>
    %239 = vector.shape_cast %238 : vector<1x1x128xf32> to vector<1x128xf32>
    %240 = vector.broadcast %239 : vector<1x128xf32> to vector<8x128xf32>
    %241 = arith.mulf %237, %240 : vector<8x128xf32>
    %242 = arith.addf %233, %241 : vector<8x128xf32>
    %c0_228 = arith.constant 0 : index
    %c0_229 = arith.constant 0 : index
    %243 = vector.load %arg17[%c0_228, %c0_229] : memref<8x1xf32, #tpu.memory_space<vmem>>, vector<8x1xf32>
    %244 = vector.broadcast %243 : vector<8x1xf32> to vector<8x128xf32>
    %245 = arith.addf %242, %244 : vector<8x128xf32>
    %c0_230 = arith.constant 0 : index
    %c0_231 = arith.constant 0 : index
    %246 = vector.load %arg20[%c0_230, %c0_231] : memref<8x128xf32, #tpu.memory_space<vmem>>, vector<8x128xf32>
    %247 = arith.addf %245, %246 : vector<8x128xf32>
    %cst_232 = arith.constant 0.000000e+00 : f32
    %248 = vector.broadcast %cst_232 : f32 to vector<8x128xf32>
    %249 = arith.maximumf %247, %248 : vector<8x128xf32>
    %250 = vector.extract_strided_slice %12 {offsets = [96, 0], sizes = [16, 2], strides = [1, 1]} : vector<120x2xf32> to vector<16x2xf32>
    %c0_233 = arith.constant 0 : index
    %c0_234 = arith.constant 0 : index
    %251 = vector.load %arg15[%c0_233, %c0_234] : memref<2x128xf32, #tpu.memory_space<vmem>>, vector<2x128xf32>
    %cst_235 = arith.constant dense<0.000000e+00> : vector<16x128xf32>
    %252 = tpu.matmul %250, %251, %cst_235 {dimension_numbers = #tpu.dot_dimension_numbers<[1], [0], [0], [1], [0, 0, 1, 1], [], []>} : vector<16x2xf32>, vector<2x128xf32>, vector<16x128xf32> -> vector<16x128xf32>
    %253 = vector.extract_strided_slice %252 {offsets = [0, 0], sizes = [8, 128], strides = [1, 1]} : vector<16x128xf32> to vector<8x128xf32>
    %254 = arith.mulf %249, %253 : vector<8x128xf32>
    %255 = vector.extract_strided_slice %252 {offsets = [8, 0], sizes = [8, 128], strides = [1, 1]} : vector<16x128xf32> to vector<8x128xf32>
    %256 = arith.addf %254, %255 : vector<8x128xf32>
    %c9_i32_236 = arith.constant 9 : i32
    %257 = tpu.dynamic_rotate %256 by %c9_i32_236 dim 1 : vector<8x128xf32>, i32 -> vector<8x128xf32>
    %c0_237 = arith.constant 0 : index
    %c0_238 = arith.constant 0 : index
    %c0_239 = arith.constant 0 : index
    %258 = vector.load %arg18[%c0_237, %c0_238, %c0_239] : memref<9x8x8xf32, #tpu.memory_space<vmem>>, vector<1x8x8xf32>
    %259 = vector.shape_cast %258 : vector<1x8x8xf32> to vector<8x8xf32>
    %cst_240 = arith.constant dense<0.000000e+00> : vector<8x128xf32>
    %260 = tpu.matmul %259, %257, %cst_240 {dimension_numbers = #tpu.dot_dimension_numbers<[1], [0], [0], [1], [0, 0, 1, 1], [], []>} : vector<8x8xf32>, vector<8x128xf32>, vector<8x128xf32> -> vector<8x128xf32>
    %c0_241 = arith.constant 0 : index
    %c0_242 = arith.constant 0 : index
    %c0_243 = arith.constant 0 : index
    %261 = vector.load %arg21[%c0_241, %c0_242, %c0_243] : memref<9x1x128xf32, #tpu.memory_space<vmem>>, vector<1x1x128xf32>
    %262 = vector.shape_cast %261 : vector<1x1x128xf32> to vector<1x128xf32>
    %263 = vector.broadcast %262 : vector<1x128xf32> to vector<8x128xf32>
    %264 = arith.mulf %260, %263 : vector<8x128xf32>
    %c8_i32_244 = arith.constant 8 : i32
    %265 = tpu.dynamic_rotate %256 by %c8_i32_244 dim 1 : vector<8x128xf32>, i32 -> vector<8x128xf32>
    %c1_245 = arith.constant 1 : index
    %c0_246 = arith.constant 0 : index
    %c0_247 = arith.constant 0 : index
    %266 = vector.load %arg18[%c1_245, %c0_246, %c0_247] : memref<9x8x8xf32, #tpu.memory_space<vmem>>, vector<1x8x8xf32>
    %267 = vector.shape_cast %266 : vector<1x8x8xf32> to vector<8x8xf32>
    %cst_248 = arith.constant dense<0.000000e+00> : vector<8x128xf32>
    %268 = tpu.matmul %267, %265, %cst_248 {dimension_numbers = #tpu.dot_dimension_numbers<[1], [0], [0], [1], [0, 0, 1, 1], [], []>} : vector<8x8xf32>, vector<8x128xf32>, vector<8x128xf32> -> vector<8x128xf32>
    %c1_249 = arith.constant 1 : index
    %c0_250 = arith.constant 0 : index
    %c0_251 = arith.constant 0 : index
    %269 = vector.load %arg21[%c1_249, %c0_250, %c0_251] : memref<9x1x128xf32, #tpu.memory_space<vmem>>, vector<1x1x128xf32>
    %270 = vector.shape_cast %269 : vector<1x1x128xf32> to vector<1x128xf32>
    %271 = vector.broadcast %270 : vector<1x128xf32> to vector<8x128xf32>
    %272 = arith.mulf %268, %271 : vector<8x128xf32>
    %273 = arith.addf %264, %272 : vector<8x128xf32>
    %c7_i32_252 = arith.constant 7 : i32
    %274 = tpu.dynamic_rotate %256 by %c7_i32_252 dim 1 : vector<8x128xf32>, i32 -> vector<8x128xf32>
    %c2_253 = arith.constant 2 : index
    %c0_254 = arith.constant 0 : index
    %c0_255 = arith.constant 0 : index
    %275 = vector.load %arg18[%c2_253, %c0_254, %c0_255] : memref<9x8x8xf32, #tpu.memory_space<vmem>>, vector<1x8x8xf32>
    %276 = vector.shape_cast %275 : vector<1x8x8xf32> to vector<8x8xf32>
    %cst_256 = arith.constant dense<0.000000e+00> : vector<8x128xf32>
    %277 = tpu.matmul %276, %274, %cst_256 {dimension_numbers = #tpu.dot_dimension_numbers<[1], [0], [0], [1], [0, 0, 1, 1], [], []>} : vector<8x8xf32>, vector<8x128xf32>, vector<8x128xf32> -> vector<8x128xf32>
    %c2_257 = arith.constant 2 : index
    %c0_258 = arith.constant 0 : index
    %c0_259 = arith.constant 0 : index
    %278 = vector.load %arg21[%c2_257, %c0_258, %c0_259] : memref<9x1x128xf32, #tpu.memory_space<vmem>>, vector<1x1x128xf32>
    %279 = vector.shape_cast %278 : vector<1x1x128xf32> to vector<1x128xf32>
    %280 = vector.broadcast %279 : vector<1x128xf32> to vector<8x128xf32>
    %281 = arith.mulf %277, %280 : vector<8x128xf32>
    %282 = arith.addf %273, %281 : vector<8x128xf32>
    %c1_i32_260 = arith.constant 1 : i32
    %283 = tpu.dynamic_rotate %256 by %c1_i32_260 dim 1 : vector<8x128xf32>, i32 -> vector<8x128xf32>
    %c3_261 = arith.constant 3 : index
    %c0_262 = arith.constant 0 : index
    %c0_263 = arith.constant 0 : index
    %284 = vector.load %arg18[%c3_261, %c0_262, %c0_263] : memref<9x8x8xf32, #tpu.memory_space<vmem>>, vector<1x8x8xf32>
    %285 = vector.shape_cast %284 : vector<1x8x8xf32> to vector<8x8xf32>
    %cst_264 = arith.constant dense<0.000000e+00> : vector<8x128xf32>
    %286 = tpu.matmul %285, %283, %cst_264 {dimension_numbers = #tpu.dot_dimension_numbers<[1], [0], [0], [1], [0, 0, 1, 1], [], []>} : vector<8x8xf32>, vector<8x128xf32>, vector<8x128xf32> -> vector<8x128xf32>
    %c3_265 = arith.constant 3 : index
    %c0_266 = arith.constant 0 : index
    %c0_267 = arith.constant 0 : index
    %287 = vector.load %arg21[%c3_265, %c0_266, %c0_267] : memref<9x1x128xf32, #tpu.memory_space<vmem>>, vector<1x1x128xf32>
    %288 = vector.shape_cast %287 : vector<1x1x128xf32> to vector<1x128xf32>
    %289 = vector.broadcast %288 : vector<1x128xf32> to vector<8x128xf32>
    %290 = arith.mulf %286, %289 : vector<8x128xf32>
    %291 = arith.addf %282, %290 : vector<8x128xf32>
    %c4_268 = arith.constant 4 : index
    %c0_269 = arith.constant 0 : index
    %c0_270 = arith.constant 0 : index
    %292 = vector.load %arg18[%c4_268, %c0_269, %c0_270] : memref<9x8x8xf32, #tpu.memory_space<vmem>>, vector<1x8x8xf32>
    %293 = vector.shape_cast %292 : vector<1x8x8xf32> to vector<8x8xf32>
    %cst_271 = arith.constant dense<0.000000e+00> : vector<8x128xf32>
    %294 = tpu.matmul %293, %256, %cst_271 {dimension_numbers = #tpu.dot_dimension_numbers<[1], [0], [0], [1], [0, 0, 1, 1], [], []>} : vector<8x8xf32>, vector<8x128xf32>, vector<8x128xf32> -> vector<8x128xf32>
    %295 = arith.addf %291, %294 : vector<8x128xf32>
    %c127_i32_272 = arith.constant 127 : i32
    %296 = tpu.dynamic_rotate %256 by %c127_i32_272 dim 1 : vector<8x128xf32>, i32 -> vector<8x128xf32>
    %c5_273 = arith.constant 5 : index
    %c0_274 = arith.constant 0 : index
    %c0_275 = arith.constant 0 : index
    %297 = vector.load %arg18[%c5_273, %c0_274, %c0_275] : memref<9x8x8xf32, #tpu.memory_space<vmem>>, vector<1x8x8xf32>
    %298 = vector.shape_cast %297 : vector<1x8x8xf32> to vector<8x8xf32>
    %cst_276 = arith.constant dense<0.000000e+00> : vector<8x128xf32>
    %299 = tpu.matmul %298, %296, %cst_276 {dimension_numbers = #tpu.dot_dimension_numbers<[1], [0], [0], [1], [0, 0, 1, 1], [], []>} : vector<8x8xf32>, vector<8x128xf32>, vector<8x128xf32> -> vector<8x128xf32>
    %c5_277 = arith.constant 5 : index
    %c0_278 = arith.constant 0 : index
    %c0_279 = arith.constant 0 : index
    %300 = vector.load %arg21[%c5_277, %c0_278, %c0_279] : memref<9x1x128xf32, #tpu.memory_space<vmem>>, vector<1x1x128xf32>
    %301 = vector.shape_cast %300 : vector<1x1x128xf32> to vector<1x128xf32>
    %302 = vector.broadcast %301 : vector<1x128xf32> to vector<8x128xf32>
    %303 = arith.mulf %299, %302 : vector<8x128xf32>
    %304 = arith.addf %295, %303 : vector<8x128xf32>
    %c121_i32_280 = arith.constant 121 : i32
    %305 = tpu.dynamic_rotate %256 by %c121_i32_280 dim 1 : vector<8x128xf32>, i32 -> vector<8x128xf32>
    %c6_281 = arith.constant 6 : index
    %c0_282 = arith.constant 0 : index
    %c0_283 = arith.constant 0 : index
    %306 = vector.load %arg18[%c6_281, %c0_282, %c0_283] : memref<9x8x8xf32, #tpu.memory_space<vmem>>, vector<1x8x8xf32>
    %307 = vector.shape_cast %306 : vector<1x8x8xf32> to vector<8x8xf32>
    %cst_284 = arith.constant dense<0.000000e+00> : vector<8x128xf32>
    %308 = tpu.matmul %307, %305, %cst_284 {dimension_numbers = #tpu.dot_dimension_numbers<[1], [0], [0], [1], [0, 0, 1, 1], [], []>} : vector<8x8xf32>, vector<8x128xf32>, vector<8x128xf32> -> vector<8x128xf32>
    %c6_285 = arith.constant 6 : index
    %c0_286 = arith.constant 0 : index
    %c0_287 = arith.constant 0 : index
    %309 = vector.load %arg21[%c6_285, %c0_286, %c0_287] : memref<9x1x128xf32, #tpu.memory_space<vmem>>, vector<1x1x128xf32>
    %310 = vector.shape_cast %309 : vector<1x1x128xf32> to vector<1x128xf32>
    %311 = vector.broadcast %310 : vector<1x128xf32> to vector<8x128xf32>
    %312 = arith.mulf %308, %311 : vector<8x128xf32>
    %313 = arith.addf %304, %312 : vector<8x128xf32>
    %c120_i32_288 = arith.constant 120 : i32
    %314 = tpu.dynamic_rotate %256 by %c120_i32_288 dim 1 : vector<8x128xf32>, i32 -> vector<8x128xf32>
    %c7_289 = arith.constant 7 : index
    %c0_290 = arith.constant 0 : index
    %c0_291 = arith.constant 0 : index
    %315 = vector.load %arg18[%c7_289, %c0_290, %c0_291] : memref<9x8x8xf32, #tpu.memory_space<vmem>>, vector<1x8x8xf32>
    %316 = vector.shape_cast %315 : vector<1x8x8xf32> to vector<8x8xf32>
    %cst_292 = arith.constant dense<0.000000e+00> : vector<8x128xf32>
    %317 = tpu.matmul %316, %314, %cst_292 {dimension_numbers = #tpu.dot_dimension_numbers<[1], [0], [0], [1], [0, 0, 1, 1], [], []>} : vector<8x8xf32>, vector<8x128xf32>, vector<8x128xf32> -> vector<8x128xf32>
    %c7_293 = arith.constant 7 : index
    %c0_294 = arith.constant 0 : index
    %c0_295 = arith.constant 0 : index
    %318 = vector.load %arg21[%c7_293, %c0_294, %c0_295] : memref<9x1x128xf32, #tpu.memory_space<vmem>>, vector<1x1x128xf32>
    %319 = vector.shape_cast %318 : vector<1x1x128xf32> to vector<1x128xf32>
    %320 = vector.broadcast %319 : vector<1x128xf32> to vector<8x128xf32>
    %321 = arith.mulf %317, %320 : vector<8x128xf32>
    %322 = arith.addf %313, %321 : vector<8x128xf32>
    %c119_i32_296 = arith.constant 119 : i32
    %323 = tpu.dynamic_rotate %256 by %c119_i32_296 dim 1 : vector<8x128xf32>, i32 -> vector<8x128xf32>
    %c8_297 = arith.constant 8 : index
    %c0_298 = arith.constant 0 : index
    %c0_299 = arith.constant 0 : index
    %324 = vector.load %arg18[%c8_297, %c0_298, %c0_299] : memref<9x8x8xf32, #tpu.memory_space<vmem>>, vector<1x8x8xf32>
    %325 = vector.shape_cast %324 : vector<1x8x8xf32> to vector<8x8xf32>
    %cst_300 = arith.constant dense<0.000000e+00> : vector<8x128xf32>
    %326 = tpu.matmul %325, %323, %cst_300 {dimension_numbers = #tpu.dot_dimension_numbers<[1], [0], [0], [1], [0, 0, 1, 1], [], []>} : vector<8x8xf32>, vector<8x128xf32>, vector<8x128xf32> -> vector<8x128xf32>
    %c8_301 = arith.constant 8 : index
    %c0_302 = arith.constant 0 : index
    %c0_303 = arith.constant 0 : index
    %327 = vector.load %arg21[%c8_301, %c0_302, %c0_303] : memref<9x1x128xf32, #tpu.memory_space<vmem>>, vector<1x1x128xf32>
    %328 = vector.shape_cast %327 : vector<1x1x128xf32> to vector<1x128xf32>
    %329 = vector.broadcast %328 : vector<1x128xf32> to vector<8x128xf32>
    %330 = arith.mulf %326, %329 : vector<8x128xf32>
    %331 = arith.addf %322, %330 : vector<8x128xf32>
    %c0_304 = arith.constant 0 : index
    %c0_305 = arith.constant 0 : index
    %332 = vector.load %arg19[%c0_304, %c0_305] : memref<8x1xf32, #tpu.memory_space<vmem>>, vector<8x1xf32>
    %333 = vector.broadcast %332 : vector<8x1xf32> to vector<8x128xf32>
    %334 = arith.addf %331, %333 : vector<8x128xf32>
    %cst_306 = arith.constant 0.000000e+00 : f32
    %335 = vector.broadcast %cst_306 : f32 to vector<8x128xf32>
    %336 = arith.maximumf %334, %335 : vector<8x128xf32>
    %c0_307 = arith.constant 0 : index
    %c0_308 = arith.constant 0 : index
    %337 = vector.load %arg22[%c0_307, %c0_308] : memref<128x512xf32, #tpu.memory_space<vmem>>, vector<128x512xf32>
    %cst_309 = arith.constant dense<0.000000e+00> : vector<8x512xf32>
    %338 = tpu.matmul %336, %337, %cst_309 {dimension_numbers = #tpu.dot_dimension_numbers<[1], [0], [0], [1], [0, 0, 1, 1], [], []>} : vector<8x128xf32>, vector<128x512xf32>, vector<8x512xf32> -> vector<8x512xf32>
    %c17_i32 = arith.constant 17 : i32
    %339 = tpu.dynamic_rotate %338 by %c17_i32 dim 1 : vector<8x512xf32>, i32 -> vector<8x512xf32>
    %c0_310 = arith.constant 0 : index
    %c0_311 = arith.constant 0 : index
    %c0_312 = arith.constant 0 : index
    %340 = vector.load %arg24[%c0_310, %c0_311, %c0_312] : memref<9x4x8xf32, #tpu.memory_space<vmem>>, vector<1x4x8xf32>
    %341 = vector.shape_cast %340 : vector<1x4x8xf32> to vector<4x8xf32>
    %cst_313 = arith.constant dense<0.000000e+00> : vector<4x512xf32>
    %342 = tpu.matmul %341, %339, %cst_313 {dimension_numbers = #tpu.dot_dimension_numbers<[1], [0], [0], [1], [0, 0, 1, 1], [], []>} : vector<4x8xf32>, vector<8x512xf32>, vector<4x512xf32> -> vector<4x512xf32>
    %c0_314 = arith.constant 0 : index
    %c0_315 = arith.constant 0 : index
    %c0_316 = arith.constant 0 : index
    %343 = vector.load %arg29[%c0_314, %c0_315, %c0_316] : memref<9x1x512xf32, #tpu.memory_space<vmem>>, vector<1x1x512xf32>
    %344 = vector.shape_cast %343 : vector<1x1x512xf32> to vector<1x512xf32>
    %345 = vector.broadcast %344 : vector<1x512xf32> to vector<4x512xf32>
    %346 = arith.mulf %342, %345 : vector<4x512xf32>
    %c16_i32 = arith.constant 16 : i32
    %347 = tpu.dynamic_rotate %338 by %c16_i32 dim 1 : vector<8x512xf32>, i32 -> vector<8x512xf32>
    %c1_317 = arith.constant 1 : index
    %c0_318 = arith.constant 0 : index
    %c0_319 = arith.constant 0 : index
    %348 = vector.load %arg24[%c1_317, %c0_318, %c0_319] : memref<9x4x8xf32, #tpu.memory_space<vmem>>, vector<1x4x8xf32>
    %349 = vector.shape_cast %348 : vector<1x4x8xf32> to vector<4x8xf32>
    %cst_320 = arith.constant dense<0.000000e+00> : vector<4x512xf32>
    %350 = tpu.matmul %349, %347, %cst_320 {dimension_numbers = #tpu.dot_dimension_numbers<[1], [0], [0], [1], [0, 0, 1, 1], [], []>} : vector<4x8xf32>, vector<8x512xf32>, vector<4x512xf32> -> vector<4x512xf32>
    %c1_321 = arith.constant 1 : index
    %c0_322 = arith.constant 0 : index
    %c0_323 = arith.constant 0 : index
    %351 = vector.load %arg29[%c1_321, %c0_322, %c0_323] : memref<9x1x512xf32, #tpu.memory_space<vmem>>, vector<1x1x512xf32>
    %352 = vector.shape_cast %351 : vector<1x1x512xf32> to vector<1x512xf32>
    %353 = vector.broadcast %352 : vector<1x512xf32> to vector<4x512xf32>
    %354 = arith.mulf %350, %353 : vector<4x512xf32>
    %355 = arith.addf %346, %354 : vector<4x512xf32>
    %c15_i32 = arith.constant 15 : i32
    %356 = tpu.dynamic_rotate %338 by %c15_i32 dim 1 : vector<8x512xf32>, i32 -> vector<8x512xf32>
    %c2_324 = arith.constant 2 : index
    %c0_325 = arith.constant 0 : index
    %c0_326 = arith.constant 0 : index
    %357 = vector.load %arg24[%c2_324, %c0_325, %c0_326] : memref<9x4x8xf32, #tpu.memory_space<vmem>>, vector<1x4x8xf32>
    %358 = vector.shape_cast %357 : vector<1x4x8xf32> to vector<4x8xf32>
    %cst_327 = arith.constant dense<0.000000e+00> : vector<4x512xf32>
    %359 = tpu.matmul %358, %356, %cst_327 {dimension_numbers = #tpu.dot_dimension_numbers<[1], [0], [0], [1], [0, 0, 1, 1], [], []>} : vector<4x8xf32>, vector<8x512xf32>, vector<4x512xf32> -> vector<4x512xf32>
    %c2_328 = arith.constant 2 : index
    %c0_329 = arith.constant 0 : index
    %c0_330 = arith.constant 0 : index
    %360 = vector.load %arg29[%c2_328, %c0_329, %c0_330] : memref<9x1x512xf32, #tpu.memory_space<vmem>>, vector<1x1x512xf32>
    %361 = vector.shape_cast %360 : vector<1x1x512xf32> to vector<1x512xf32>
    %362 = vector.broadcast %361 : vector<1x512xf32> to vector<4x512xf32>
    %363 = arith.mulf %359, %362 : vector<4x512xf32>
    %364 = arith.addf %355, %363 : vector<4x512xf32>
    %c1_i32_331 = arith.constant 1 : i32
    %365 = tpu.dynamic_rotate %338 by %c1_i32_331 dim 1 : vector<8x512xf32>, i32 -> vector<8x512xf32>
    %c3_332 = arith.constant 3 : index
    %c0_333 = arith.constant 0 : index
    %c0_334 = arith.constant 0 : index
    %366 = vector.load %arg24[%c3_332, %c0_333, %c0_334] : memref<9x4x8xf32, #tpu.memory_space<vmem>>, vector<1x4x8xf32>
    %367 = vector.shape_cast %366 : vector<1x4x8xf32> to vector<4x8xf32>
    %cst_335 = arith.constant dense<0.000000e+00> : vector<4x512xf32>
    %368 = tpu.matmul %367, %365, %cst_335 {dimension_numbers = #tpu.dot_dimension_numbers<[1], [0], [0], [1], [0, 0, 1, 1], [], []>} : vector<4x8xf32>, vector<8x512xf32>, vector<4x512xf32> -> vector<4x512xf32>
    %c3_336 = arith.constant 3 : index
    %c0_337 = arith.constant 0 : index
    %c0_338 = arith.constant 0 : index
    %369 = vector.load %arg29[%c3_336, %c0_337, %c0_338] : memref<9x1x512xf32, #tpu.memory_space<vmem>>, vector<1x1x512xf32>
    %370 = vector.shape_cast %369 : vector<1x1x512xf32> to vector<1x512xf32>
    %371 = vector.broadcast %370 : vector<1x512xf32> to vector<4x512xf32>
    %372 = arith.mulf %368, %371 : vector<4x512xf32>
    %373 = arith.addf %364, %372 : vector<4x512xf32>
    %c4_339 = arith.constant 4 : index
    %c0_340 = arith.constant 0 : index
    %c0_341 = arith.constant 0 : index
    %374 = vector.load %arg24[%c4_339, %c0_340, %c0_341] : memref<9x4x8xf32, #tpu.memory_space<vmem>>, vector<1x4x8xf32>
    %375 = vector.shape_cast %374 : vector<1x4x8xf32> to vector<4x8xf32>
    %cst_342 = arith.constant dense<0.000000e+00> : vector<4x512xf32>
    %376 = tpu.matmul %375, %338, %cst_342 {dimension_numbers = #tpu.dot_dimension_numbers<[1], [0], [0], [1], [0, 0, 1, 1], [], []>} : vector<4x8xf32>, vector<8x512xf32>, vector<4x512xf32> -> vector<4x512xf32>
    %377 = arith.addf %373, %376 : vector<4x512xf32>
    %c511_i32 = arith.constant 511 : i32
    %378 = tpu.dynamic_rotate %338 by %c511_i32 dim 1 : vector<8x512xf32>, i32 -> vector<8x512xf32>
    %c5_343 = arith.constant 5 : index
    %c0_344 = arith.constant 0 : index
    %c0_345 = arith.constant 0 : index
    %379 = vector.load %arg24[%c5_343, %c0_344, %c0_345] : memref<9x4x8xf32, #tpu.memory_space<vmem>>, vector<1x4x8xf32>
    %380 = vector.shape_cast %379 : vector<1x4x8xf32> to vector<4x8xf32>
    %cst_346 = arith.constant dense<0.000000e+00> : vector<4x512xf32>
    %381 = tpu.matmul %380, %378, %cst_346 {dimension_numbers = #tpu.dot_dimension_numbers<[1], [0], [0], [1], [0, 0, 1, 1], [], []>} : vector<4x8xf32>, vector<8x512xf32>, vector<4x512xf32> -> vector<4x512xf32>
    %c5_347 = arith.constant 5 : index
    %c0_348 = arith.constant 0 : index
    %c0_349 = arith.constant 0 : index
    %382 = vector.load %arg29[%c5_347, %c0_348, %c0_349] : memref<9x1x512xf32, #tpu.memory_space<vmem>>, vector<1x1x512xf32>
    %383 = vector.shape_cast %382 : vector<1x1x512xf32> to vector<1x512xf32>
    %384 = vector.broadcast %383 : vector<1x512xf32> to vector<4x512xf32>
    %385 = arith.mulf %381, %384 : vector<4x512xf32>
    %386 = arith.addf %377, %385 : vector<4x512xf32>
    %c497_i32 = arith.constant 497 : i32
    %387 = tpu.dynamic_rotate %338 by %c497_i32 dim 1 : vector<8x512xf32>, i32 -> vector<8x512xf32>
    %c6_350 = arith.constant 6 : index
    %c0_351 = arith.constant 0 : index
    %c0_352 = arith.constant 0 : index
    %388 = vector.load %arg24[%c6_350, %c0_351, %c0_352] : memref<9x4x8xf32, #tpu.memory_space<vmem>>, vector<1x4x8xf32>
    %389 = vector.shape_cast %388 : vector<1x4x8xf32> to vector<4x8xf32>
    %cst_353 = arith.constant dense<0.000000e+00> : vector<4x512xf32>
    %390 = tpu.matmul %389, %387, %cst_353 {dimension_numbers = #tpu.dot_dimension_numbers<[1], [0], [0], [1], [0, 0, 1, 1], [], []>} : vector<4x8xf32>, vector<8x512xf32>, vector<4x512xf32> -> vector<4x512xf32>
    %c6_354 = arith.constant 6 : index
    %c0_355 = arith.constant 0 : index
    %c0_356 = arith.constant 0 : index
    %391 = vector.load %arg29[%c6_354, %c0_355, %c0_356] : memref<9x1x512xf32, #tpu.memory_space<vmem>>, vector<1x1x512xf32>
    %392 = vector.shape_cast %391 : vector<1x1x512xf32> to vector<1x512xf32>
    %393 = vector.broadcast %392 : vector<1x512xf32> to vector<4x512xf32>
    %394 = arith.mulf %390, %393 : vector<4x512xf32>
    %395 = arith.addf %386, %394 : vector<4x512xf32>
    %c496_i32 = arith.constant 496 : i32
    %396 = tpu.dynamic_rotate %338 by %c496_i32 dim 1 : vector<8x512xf32>, i32 -> vector<8x512xf32>
    %c7_357 = arith.constant 7 : index
    %c0_358 = arith.constant 0 : index
    %c0_359 = arith.constant 0 : index
    %397 = vector.load %arg24[%c7_357, %c0_358, %c0_359] : memref<9x4x8xf32, #tpu.memory_space<vmem>>, vector<1x4x8xf32>
    %398 = vector.shape_cast %397 : vector<1x4x8xf32> to vector<4x8xf32>
    %cst_360 = arith.constant dense<0.000000e+00> : vector<4x512xf32>
    %399 = tpu.matmul %398, %396, %cst_360 {dimension_numbers = #tpu.dot_dimension_numbers<[1], [0], [0], [1], [0, 0, 1, 1], [], []>} : vector<4x8xf32>, vector<8x512xf32>, vector<4x512xf32> -> vector<4x512xf32>
    %c7_361 = arith.constant 7 : index
    %c0_362 = arith.constant 0 : index
    %c0_363 = arith.constant 0 : index
    %400 = vector.load %arg29[%c7_361, %c0_362, %c0_363] : memref<9x1x512xf32, #tpu.memory_space<vmem>>, vector<1x1x512xf32>
    %401 = vector.shape_cast %400 : vector<1x1x512xf32> to vector<1x512xf32>
    %402 = vector.broadcast %401 : vector<1x512xf32> to vector<4x512xf32>
    %403 = arith.mulf %399, %402 : vector<4x512xf32>
    %404 = arith.addf %395, %403 : vector<4x512xf32>
    %c495_i32 = arith.constant 495 : i32
    %405 = tpu.dynamic_rotate %338 by %c495_i32 dim 1 : vector<8x512xf32>, i32 -> vector<8x512xf32>
    %c8_364 = arith.constant 8 : index
    %c0_365 = arith.constant 0 : index
    %c0_366 = arith.constant 0 : index
    %406 = vector.load %arg24[%c8_364, %c0_365, %c0_366] : memref<9x4x8xf32, #tpu.memory_space<vmem>>, vector<1x4x8xf32>
    %407 = vector.shape_cast %406 : vector<1x4x8xf32> to vector<4x8xf32>
    %cst_367 = arith.constant dense<0.000000e+00> : vector<4x512xf32>
    %408 = tpu.matmul %407, %405, %cst_367 {dimension_numbers = #tpu.dot_dimension_numbers<[1], [0], [0], [1], [0, 0, 1, 1], [], []>} : vector<4x8xf32>, vector<8x512xf32>, vector<4x512xf32> -> vector<4x512xf32>
    %c8_368 = arith.constant 8 : index
    %c0_369 = arith.constant 0 : index
    %c0_370 = arith.constant 0 : index
    %409 = vector.load %arg29[%c8_368, %c0_369, %c0_370] : memref<9x1x512xf32, #tpu.memory_space<vmem>>, vector<1x1x512xf32>
    %410 = vector.shape_cast %409 : vector<1x1x512xf32> to vector<1x512xf32>
    %411 = vector.broadcast %410 : vector<1x512xf32> to vector<4x512xf32>
    %412 = arith.mulf %408, %411 : vector<4x512xf32>
    %413 = arith.addf %404, %412 : vector<4x512xf32>
    %c0_371 = arith.constant 0 : index
    %c0_372 = arith.constant 0 : index
    %414 = vector.load %arg25[%c0_371, %c0_372] : memref<4x1xf32, #tpu.memory_space<vmem>>, vector<4x1xf32>
    %415 = vector.broadcast %414 : vector<4x1xf32> to vector<4x512xf32>
    %416 = arith.addf %413, %415 : vector<4x512xf32>
    %c0_373 = arith.constant 0 : index
    %c0_374 = arith.constant 0 : index
    %417 = vector.load %arg28[%c0_373, %c0_374] : memref<4x512xf32, #tpu.memory_space<vmem>>, vector<4x512xf32>
    %418 = arith.addf %416, %417 : vector<4x512xf32>
    %cst_375 = arith.constant 0.000000e+00 : f32
    %419 = vector.broadcast %cst_375 : f32 to vector<4x512xf32>
    %420 = arith.maximumf %418, %419 : vector<4x512xf32>
    %421 = vector.extract_strided_slice %12 {offsets = [112, 0], sizes = [8, 2], strides = [1, 1]} : vector<120x2xf32> to vector<8x2xf32>
    %c0_376 = arith.constant 0 : index
    %c0_377 = arith.constant 0 : index
    %422 = vector.load %arg23[%c0_376, %c0_377] : memref<2x512xf32, #tpu.memory_space<vmem>>, vector<2x512xf32>
    %cst_378 = arith.constant dense<0.000000e+00> : vector<8x512xf32>
    %423 = tpu.matmul %421, %422, %cst_378 {dimension_numbers = #tpu.dot_dimension_numbers<[1], [0], [0], [1], [0, 0, 1, 1], [], []>} : vector<8x2xf32>, vector<2x512xf32>, vector<8x512xf32> -> vector<8x512xf32>
    %424 = vector.extract_strided_slice %423 {offsets = [0, 0], sizes = [4, 512], strides = [1, 1]} : vector<8x512xf32> to vector<4x512xf32>
    %425 = arith.mulf %420, %424 : vector<4x512xf32>
    %426 = vector.extract_strided_slice %423 {offsets = [4, 0], sizes = [4, 512], strides = [1, 1]} : vector<8x512xf32> to vector<4x512xf32>
    %427 = arith.addf %425, %426 : vector<4x512xf32>
    %c17_i32_379 = arith.constant 17 : i32
    %428 = tpu.dynamic_rotate %427 by %c17_i32_379 dim 1 : vector<4x512xf32>, i32 -> vector<4x512xf32>
    %c0_380 = arith.constant 0 : index
    %c0_381 = arith.constant 0 : index
    %c0_382 = arith.constant 0 : index
    %429 = vector.load %arg26[%c0_380, %c0_381, %c0_382] : memref<9x4x4xf32, #tpu.memory_space<vmem>>, vector<1x4x4xf32>
    %430 = vector.shape_cast %429 : vector<1x4x4xf32> to vector<4x4xf32>
    %cst_383 = arith.constant dense<0.000000e+00> : vector<4x512xf32>
    %431 = tpu.matmul %430, %428, %cst_383 {dimension_numbers = #tpu.dot_dimension_numbers<[1], [0], [0], [1], [0, 0, 1, 1], [], []>} : vector<4x4xf32>, vector<4x512xf32>, vector<4x512xf32> -> vector<4x512xf32>
    %c0_384 = arith.constant 0 : index
    %c0_385 = arith.constant 0 : index
    %c0_386 = arith.constant 0 : index
    %432 = vector.load %arg29[%c0_384, %c0_385, %c0_386] : memref<9x1x512xf32, #tpu.memory_space<vmem>>, vector<1x1x512xf32>
    %433 = vector.shape_cast %432 : vector<1x1x512xf32> to vector<1x512xf32>
    %434 = vector.broadcast %433 : vector<1x512xf32> to vector<4x512xf32>
    %435 = arith.mulf %431, %434 : vector<4x512xf32>
    %c16_i32_387 = arith.constant 16 : i32
    %436 = tpu.dynamic_rotate %427 by %c16_i32_387 dim 1 : vector<4x512xf32>, i32 -> vector<4x512xf32>
    %c1_388 = arith.constant 1 : index
    %c0_389 = arith.constant 0 : index
    %c0_390 = arith.constant 0 : index
    %437 = vector.load %arg26[%c1_388, %c0_389, %c0_390] : memref<9x4x4xf32, #tpu.memory_space<vmem>>, vector<1x4x4xf32>
    %438 = vector.shape_cast %437 : vector<1x4x4xf32> to vector<4x4xf32>
    %cst_391 = arith.constant dense<0.000000e+00> : vector<4x512xf32>
    %439 = tpu.matmul %438, %436, %cst_391 {dimension_numbers = #tpu.dot_dimension_numbers<[1], [0], [0], [1], [0, 0, 1, 1], [], []>} : vector<4x4xf32>, vector<4x512xf32>, vector<4x512xf32> -> vector<4x512xf32>
    %c1_392 = arith.constant 1 : index
    %c0_393 = arith.constant 0 : index
    %c0_394 = arith.constant 0 : index
    %440 = vector.load %arg29[%c1_392, %c0_393, %c0_394] : memref<9x1x512xf32, #tpu.memory_space<vmem>>, vector<1x1x512xf32>
    %441 = vector.shape_cast %440 : vector<1x1x512xf32> to vector<1x512xf32>
    %442 = vector.broadcast %441 : vector<1x512xf32> to vector<4x512xf32>
    %443 = arith.mulf %439, %442 : vector<4x512xf32>
    %444 = arith.addf %435, %443 : vector<4x512xf32>
    %c15_i32_395 = arith.constant 15 : i32
    %445 = tpu.dynamic_rotate %427 by %c15_i32_395 dim 1 : vector<4x512xf32>, i32 -> vector<4x512xf32>
    %c2_396 = arith.constant 2 : index
    %c0_397 = arith.constant 0 : index
    %c0_398 = arith.constant 0 : index
    %446 = vector.load %arg26[%c2_396, %c0_397, %c0_398] : memref<9x4x4xf32, #tpu.memory_space<vmem>>, vector<1x4x4xf32>
    %447 = vector.shape_cast %446 : vector<1x4x4xf32> to vector<4x4xf32>
    %cst_399 = arith.constant dense<0.000000e+00> : vector<4x512xf32>
    %448 = tpu.matmul %447, %445, %cst_399 {dimension_numbers = #tpu.dot_dimension_numbers<[1], [0], [0], [1], [0, 0, 1, 1], [], []>} : vector<4x4xf32>, vector<4x512xf32>, vector<4x512xf32> -> vector<4x512xf32>
    %c2_400 = arith.constant 2 : index
    %c0_401 = arith.constant 0 : index
    %c0_402 = arith.constant 0 : index
    %449 = vector.load %arg29[%c2_400, %c0_401, %c0_402] : memref<9x1x512xf32, #tpu.memory_space<vmem>>, vector<1x1x512xf32>
    %450 = vector.shape_cast %449 : vector<1x1x512xf32> to vector<1x512xf32>
    %451 = vector.broadcast %450 : vector<1x512xf32> to vector<4x512xf32>
    %452 = arith.mulf %448, %451 : vector<4x512xf32>
    %453 = arith.addf %444, %452 : vector<4x512xf32>
    %c1_i32_403 = arith.constant 1 : i32
    %454 = tpu.dynamic_rotate %427 by %c1_i32_403 dim 1 : vector<4x512xf32>, i32 -> vector<4x512xf32>
    %c3_404 = arith.constant 3 : index
    %c0_405 = arith.constant 0 : index
    %c0_406 = arith.constant 0 : index
    %455 = vector.load %arg26[%c3_404, %c0_405, %c0_406] : memref<9x4x4xf32, #tpu.memory_space<vmem>>, vector<1x4x4xf32>
    %456 = vector.shape_cast %455 : vector<1x4x4xf32> to vector<4x4xf32>
    %cst_407 = arith.constant dense<0.000000e+00> : vector<4x512xf32>
    %457 = tpu.matmul %456, %454, %cst_407 {dimension_numbers = #tpu.dot_dimension_numbers<[1], [0], [0], [1], [0, 0, 1, 1], [], []>} : vector<4x4xf32>, vector<4x512xf32>, vector<4x512xf32> -> vector<4x512xf32>
    %c3_408 = arith.constant 3 : index
    %c0_409 = arith.constant 0 : index
    %c0_410 = arith.constant 0 : index
    %458 = vector.load %arg29[%c3_408, %c0_409, %c0_410] : memref<9x1x512xf32, #tpu.memory_space<vmem>>, vector<1x1x512xf32>
    %459 = vector.shape_cast %458 : vector<1x1x512xf32> to vector<1x512xf32>
    %460 = vector.broadcast %459 : vector<1x512xf32> to vector<4x512xf32>
    %461 = arith.mulf %457, %460 : vector<4x512xf32>
    %462 = arith.addf %453, %461 : vector<4x512xf32>
    %c4_411 = arith.constant 4 : index
    %c0_412 = arith.constant 0 : index
    %c0_413 = arith.constant 0 : index
    %463 = vector.load %arg26[%c4_411, %c0_412, %c0_413] : memref<9x4x4xf32, #tpu.memory_space<vmem>>, vector<1x4x4xf32>
    %464 = vector.shape_cast %463 : vector<1x4x4xf32> to vector<4x4xf32>
    %cst_414 = arith.constant dense<0.000000e+00> : vector<4x512xf32>
    %465 = tpu.matmul %464, %427, %cst_414 {dimension_numbers = #tpu.dot_dimension_numbers<[1], [0], [0], [1], [0, 0, 1, 1], [], []>} : vector<4x4xf32>, vector<4x512xf32>, vector<4x512xf32> -> vector<4x512xf32>
    %466 = arith.addf %462, %465 : vector<4x512xf32>
    %c511_i32_415 = arith.constant 511 : i32
    %467 = tpu.dynamic_rotate %427 by %c511_i32_415 dim 1 : vector<4x512xf32>, i32 -> vector<4x512xf32>
    %c5_416 = arith.constant 5 : index
    %c0_417 = arith.constant 0 : index
    %c0_418 = arith.constant 0 : index
    %468 = vector.load %arg26[%c5_416, %c0_417, %c0_418] : memref<9x4x4xf32, #tpu.memory_space<vmem>>, vector<1x4x4xf32>
    %469 = vector.shape_cast %468 : vector<1x4x4xf32> to vector<4x4xf32>
    %cst_419 = arith.constant dense<0.000000e+00> : vector<4x512xf32>
    %470 = tpu.matmul %469, %467, %cst_419 {dimension_numbers = #tpu.dot_dimension_numbers<[1], [0], [0], [1], [0, 0, 1, 1], [], []>} : vector<4x4xf32>, vector<4x512xf32>, vector<4x512xf32> -> vector<4x512xf32>
    %c5_420 = arith.constant 5 : index
    %c0_421 = arith.constant 0 : index
    %c0_422 = arith.constant 0 : index
    %471 = vector.load %arg29[%c5_420, %c0_421, %c0_422] : memref<9x1x512xf32, #tpu.memory_space<vmem>>, vector<1x1x512xf32>
    %472 = vector.shape_cast %471 : vector<1x1x512xf32> to vector<1x512xf32>
    %473 = vector.broadcast %472 : vector<1x512xf32> to vector<4x512xf32>
    %474 = arith.mulf %470, %473 : vector<4x512xf32>
    %475 = arith.addf %466, %474 : vector<4x512xf32>
    %c497_i32_423 = arith.constant 497 : i32
    %476 = tpu.dynamic_rotate %427 by %c497_i32_423 dim 1 : vector<4x512xf32>, i32 -> vector<4x512xf32>
    %c6_424 = arith.constant 6 : index
    %c0_425 = arith.constant 0 : index
    %c0_426 = arith.constant 0 : index
    %477 = vector.load %arg26[%c6_424, %c0_425, %c0_426] : memref<9x4x4xf32, #tpu.memory_space<vmem>>, vector<1x4x4xf32>
    %478 = vector.shape_cast %477 : vector<1x4x4xf32> to vector<4x4xf32>
    %cst_427 = arith.constant dense<0.000000e+00> : vector<4x512xf32>
    %479 = tpu.matmul %478, %476, %cst_427 {dimension_numbers = #tpu.dot_dimension_numbers<[1], [0], [0], [1], [0, 0, 1, 1], [], []>} : vector<4x4xf32>, vector<4x512xf32>, vector<4x512xf32> -> vector<4x512xf32>
    %c6_428 = arith.constant 6 : index
    %c0_429 = arith.constant 0 : index
    %c0_430 = arith.constant 0 : index
    %480 = vector.load %arg29[%c6_428, %c0_429, %c0_430] : memref<9x1x512xf32, #tpu.memory_space<vmem>>, vector<1x1x512xf32>
    %481 = vector.shape_cast %480 : vector<1x1x512xf32> to vector<1x512xf32>
    %482 = vector.broadcast %481 : vector<1x512xf32> to vector<4x512xf32>
    %483 = arith.mulf %479, %482 : vector<4x512xf32>
    %484 = arith.addf %475, %483 : vector<4x512xf32>
    %c496_i32_431 = arith.constant 496 : i32
    %485 = tpu.dynamic_rotate %427 by %c496_i32_431 dim 1 : vector<4x512xf32>, i32 -> vector<4x512xf32>
    %c7_432 = arith.constant 7 : index
    %c0_433 = arith.constant 0 : index
    %c0_434 = arith.constant 0 : index
    %486 = vector.load %arg26[%c7_432, %c0_433, %c0_434] : memref<9x4x4xf32, #tpu.memory_space<vmem>>, vector<1x4x4xf32>
    %487 = vector.shape_cast %486 : vector<1x4x4xf32> to vector<4x4xf32>
    %cst_435 = arith.constant dense<0.000000e+00> : vector<4x512xf32>
    %488 = tpu.matmul %487, %485, %cst_435 {dimension_numbers = #tpu.dot_dimension_numbers<[1], [0], [0], [1], [0, 0, 1, 1], [], []>} : vector<4x4xf32>, vector<4x512xf32>, vector<4x512xf32> -> vector<4x512xf32>
    %c7_436 = arith.constant 7 : index
    %c0_437 = arith.constant 0 : index
    %c0_438 = arith.constant 0 : index
    %489 = vector.load %arg29[%c7_436, %c0_437, %c0_438] : memref<9x1x512xf32, #tpu.memory_space<vmem>>, vector<1x1x512xf32>
    %490 = vector.shape_cast %489 : vector<1x1x512xf32> to vector<1x512xf32>
    %491 = vector.broadcast %490 : vector<1x512xf32> to vector<4x512xf32>
    %492 = arith.mulf %488, %491 : vector<4x512xf32>
    %493 = arith.addf %484, %492 : vector<4x512xf32>
    %c495_i32_439 = arith.constant 495 : i32
    %494 = tpu.dynamic_rotate %427 by %c495_i32_439 dim 1 : vector<4x512xf32>, i32 -> vector<4x512xf32>
    %c8_440 = arith.constant 8 : index
    %c0_441 = arith.constant 0 : index
    %c0_442 = arith.constant 0 : index
    %495 = vector.load %arg26[%c8_440, %c0_441, %c0_442] : memref<9x4x4xf32, #tpu.memory_space<vmem>>, vector<1x4x4xf32>
    %496 = vector.shape_cast %495 : vector<1x4x4xf32> to vector<4x4xf32>
    %cst_443 = arith.constant dense<0.000000e+00> : vector<4x512xf32>
    %497 = tpu.matmul %496, %494, %cst_443 {dimension_numbers = #tpu.dot_dimension_numbers<[1], [0], [0], [1], [0, 0, 1, 1], [], []>} : vector<4x4xf32>, vector<4x512xf32>, vector<4x512xf32> -> vector<4x512xf32>
    %c8_444 = arith.constant 8 : index
    %c0_445 = arith.constant 0 : index
    %c0_446 = arith.constant 0 : index
    %498 = vector.load %arg29[%c8_444, %c0_445, %c0_446] : memref<9x1x512xf32, #tpu.memory_space<vmem>>, vector<1x1x512xf32>
    %499 = vector.shape_cast %498 : vector<1x1x512xf32> to vector<1x512xf32>
    %500 = vector.broadcast %499 : vector<1x512xf32> to vector<4x512xf32>
    %501 = arith.mulf %497, %500 : vector<4x512xf32>
    %502 = arith.addf %493, %501 : vector<4x512xf32>
    %c0_447 = arith.constant 0 : index
    %c0_448 = arith.constant 0 : index
    %503 = vector.load %arg27[%c0_447, %c0_448] : memref<4x1xf32, #tpu.memory_space<vmem>>, vector<4x1xf32>
    %504 = vector.broadcast %503 : vector<4x1xf32> to vector<4x512xf32>
    %505 = arith.addf %502, %504 : vector<4x512xf32>
    %cst_449 = arith.constant 0.000000e+00 : f32
    %506 = vector.broadcast %cst_449 : f32 to vector<4x512xf32>
    %507 = arith.maximumf %505, %506 : vector<4x512xf32>
    %c0_450 = arith.constant 0 : index
    %c0_451 = arith.constant 0 : index
    %508 = vector.load %arg30[%c0_450, %c0_451] : memref<4x4xf32, #tpu.memory_space<vmem>>, vector<4x4xf32>
    %cst_452 = arith.constant dense<0.000000e+00> : vector<4x512xf32>
    %509 = tpu.matmul %508, %507, %cst_452 {dimension_numbers = #tpu.dot_dimension_numbers<[1], [0], [0], [1], [0, 0, 1, 1], [], []>} : vector<4x4xf32>, vector<4x512xf32>, vector<4x512xf32> -> vector<4x512xf32>
    %c0_453 = arith.constant 0 : index
    %c0_454 = arith.constant 0 : index
    %510 = vector.load %arg31[%c0_453, %c0_454] : memref<4x1xf32, #tpu.memory_space<vmem>>, vector<4x1xf32>
    %511 = vector.broadcast %510 : vector<4x1xf32> to vector<4x512xf32>
    %512 = arith.addf %509, %511 : vector<4x512xf32>
    %513 = math.tanh %512 : vector<4x512xf32>
    %c0_455 = arith.constant 0 : index
    %c0_456 = arith.constant 0 : index
    %514 = vector.load %arg32[%c0_455, %c0_456] : memref<4x512xf32, #tpu.memory_space<vmem>>, vector<4x512xf32>
    tpu.vector_store %arg32[%c0_455, %c0_456], %513 {strides = array<i32>} : memref<4x512xf32, #tpu.memory_space<vmem>>, vector<4x512xf32>,
    return
  }
}

</mosaic_0001>

<bundles_post_ra>
// kernel: tpu_custom_call.1
= control target key start
LH: loop header
LB: loop body
LE: loop exit
PB: predicated region body
PF: predicated region fallthrough
CT: control target
= control target key end

     0   :  { %s11938_s6 = smov 1   ;;  %s11939_s10 = smov 2   ;;  %s13554_s0 = inlined_call_operand.smem [shape: u32[33], index: -1, kind: input, shape index: {}] }
   0x1   :  { %s12012_s5 = sld [smem:[%s13554_s0]]   ;;  %s11940_s14 = smov 3  }
   0x2   :  { %s12017_s9 = sld [smem:[%s13554_s0 + %s11938_s6]]   ;;  %s11941_s18 = smov 4  }
   0x3   :  { %s12022_s13 = sld [smem:[%s13554_s0 + %s11939_s10]]   ;;  %s11942_s22 = smov 5  }
   0x4   :  { %s12027_s17 = sld [smem:[%s13554_s0 + %s11940_s14]]   ;;  %s11943_s26 = smov 6  }
   0x5   :  { %s12032_s21 = sld [smem:[%s13554_s0 + %s11941_s18]]   ;;  %s11944_s30 = smov 7  }
   0x6   :  { %s12037_s25 = sld [smem:[%s13554_s0 + %s11942_s22]]   ;;  %s11945_s4 = smov 8  }
   0x7   :  { %s12042_s29 = sld [smem:[%s13554_s0 + %s11943_s26]]   ;;  %s11946_s10 = smov 9  }
   0x8   :  { %s12047_s3 = sld [smem:[%s13554_s0 + %s11944_s30]]   ;;  %s11947_s15 = smov 10  }
   0x9   :  { %13566 = sst [smem:[#allocation32_spill]] %s12022_s13  ;;  %s11948_s20 = smov 11  }
   0xa   :  { %13567 = sst [smem:[#allocation33_spill]] %s12027_s17  ;;  %s11949_s26 = smov 12  }
   0xb   :  { %13568 = sst [smem:[#allocation34_spill]] %s12032_s21  ;;  %s11950_s1 = smov 13  }
   0xc   :  { %s12052_s8 = sld [smem:[%s13554_s0 + %s11945_s4]]   ;;  %s11951_s7 = smov 14  }
   0xd   :  { %s12057_s14 = sld [smem:[%s13554_s0 + %s11946_s10]]   ;;  %s11953_s22 = smov 16  }
   0xe   :  { %s12062_s19 = sld [smem:[%s13554_s0 + %s11947_s15]]   ;;  %s11952_s15 = smov 15  }
   0xf   :  { %s12067_s24 = sld [smem:[%s13554_s0 + %s11948_s20]]   ;;  %s11954_s28 = smov 17  }
  0x10   :  { %s12072_s30 = sld [smem:[%s13554_s0 + %s11949_s26]]  }
  0x11   :  { %s12077_s6 = sld [smem:[%s13554_s0 + %s11950_s1]]  }
  0x12   :  { %13569 = sst [smem:[#allocation35_spill]] %s12052_s8 }
  0x13   :  { %13570 = sst [smem:[#allocation36_spill]] %s12057_s14 }
  0x14   :  { %s12082_s12 = sld [smem:[%s13554_s0 + %s11951_s7]]   ;;  %s11955_s7 = smov 18  }
  0x15   :  { %13571 = sst [smem:[#allocation37_spill]] %s12067_s24 }
  0x16   :  { %s12087_s20 = sld [smem:[%s13554_s0 + %s11952_s15]]   ;;  %s11956_s15 = smov 19  }
  0x17   :  { %s12092_s27 = sld [smem:[%s13554_s0 + %s11953_s22]]   ;;  %s11957_s22 = smov 20  }
  0x18   :  { %s12097_s4 = sld [smem:[%s13554_s0 + %s11954_s28]]   ;;  %s11958_s28 = smov 21  }
  0x19   :  { %s12102_s8 = sld [smem:[%s13554_s0 + %s11955_s7]]   ;;  %s11959_s7 = smov 22  }
  0x1a   :  { %s12107_s17 = sld [smem:[%s13554_s0 + %s11956_s15]]   ;;  %s11960_s15 = smov 23  }
  0x1d   :  { %13572 = sst [smem:[#allocation38_spill]] %s12092_s27 }
  0x1e   :  { %13573 = sst [smem:[#allocation39_spill]] %s12097_s4 }
  0x1f   :  { %13574 = sst [smem:[#allocation40_spill]] %s12102_s8 }
  0x20   :  { %13575 = sst [smem:[#allocation41_spill]] %s12107_s17 }
  0x21   :  { %s12112_s27 = sld [smem:[%s13554_s0 + %s11957_s22]]   ;;  %s11961_s22 = smov 24  }
  0x22   :  { %s12117_s4 = sld [smem:[%s13554_s0 + %s11958_s28]]   ;;  %s11962_s28 = smov 25  }
  0x23   :  { %s12122_s8 = sld [smem:[%s13554_s0 + %s11959_s7]]   ;;  %s11963_s7 = smov 26  }
  0x24   :  { %s12127_s17 = sld [smem:[%s13554_s0 + %s11960_s15]]   ;;  %s11964_s15 = smov 27  }
  0x25   :  { %s12132_s24 = sld [smem:[%s13554_s0 + %s11961_s22]]   ;;  %s11965_s22 = smov 28  }
  0x26   :  { %s12137_s14 = sld [smem:[%s13554_s0 + %s11962_s28]]   ;;  %s11966_s28 = smov 29  }
  0x27   :  { %s12147_s21 = sld [smem:[%s13554_s0 + %s11964_s15]]   ;;  %s11968_s15 = smov 31  }
  0x29   :  { %13576 = sst [smem:[#allocation42_spill]] %s12122_s8 }
  0x2a   :  { %s12142_s8 = sld [smem:[%s13554_s0 + %s11963_s7]]   ;;  %s11967_s7 = smov 30  }
  0x2b   :  { %13577 = sst [smem:[#allocation43_spill]] %s12132_s24 }
  0x2c   :  { %13578 = sst [smem:[#allocation44_spill]] %s12137_s14 }
  0x2d   :  { %13580 = sst [smem:[#allocation46_spill]] %s12147_s21 }
  0x2e   :  { %s12152_s24 = sld [smem:[%s13554_s0 + %s11965_s22]]   ;;  %s11969_s22 = smov 32  }
  0x2f   :  { %s12157_s14 = sld [smem:[%s13554_s0 + %s11966_s28]]  }
  0x30   :  { %13579 = sst [smem:[#allocation45_spill]] %s12142_s8 }
  0x31   :  { %s12162_s8 = sld [smem:[%s13554_s0 + %s11967_s7]]  }
  0x32   :  { %s12167_s21 = sld [smem:[%s13554_s0 + %s11968_s15]]  }
  0x33   :  { %s12172_s13 = sld [smem:[%s13554_s0 + %s11969_s22]]  }
  0x34   :  { %70 = vsyncpa [#allocation3], 0 }
  0x35   :  { %71 = vsyncpa [#allocation6], 0 }
  0x36   :  { %72 = vsyncpa [#allocation9], 0 }
  0x37   :  { %73 = vsyncpa [#allocation12], 0 }
  0x38   :  { %74 = vsyncpa [#allocation15], 0 }
  0x39   :  { %75 = vsyncpa [#allocation18], 0 }
  0x3a   :  { %76 = vsyncpa [#allocation21], 0 }
  0x3b   :  { %77 = vsyncpa [#allocation4], 0  ;;  %s11970_s28 = smov [#allocation5]   ;;  %s11971_s2 = smov [#allocation8]  }
  0x3c   :  { %s104_s1 = sshll.u32 %s11970_s28, 4  ;;  %s124_s7 = sshll.u32 %s11971_s2, 4  ;;  %s105_s1 = int_to_ptr.vmem [resolvable:$true] %s104_s1  ;;  %s125_s7 = int_to_ptr.vmem [resolvable:$true] %s124_s7 }
  0x3d   :  { %s11614_s10 = scalar_lea.hbm %s12037_s25, 32 }
  0x3e   :  { %p11615_p0 = scmp.ne.s32.totalorder %s12037_s25, %s11614_s10  ;;  %p11618_p1 = scmp.lt.u32.totalorder %s11614_s10, %s12037_s25 }
  0x40   :  { %p11620_p2 = pnand %p11618_p1, %p11615_p0 }
  0x42   :  { %11623 = shalt.err (!%p11620_p2)
}
  0x43   :  { %s11624_s0 = scalar_lea.vmem %s105_s1, 32  ;;  %p11629_p4 = scmp.lt.s32.totalorder %s105_s1, %s105_s1 }
  0x44   :  { %p11625_p3 = scmp.ne.s32.totalorder %s105_s1, %s11624_s0  ;;  %p11630_p5 = scmp.lt.s32.totalorder %s11624_s0, %s11624_s0 }
  0x46   :  { %p11631_p6 = por %p11630_p5, %p11629_p4 }
  0x48   :  { %p11632_p7 = pnand %p11631_p6, %p11625_p3 }
  0x4a   :  { %11635 = shalt.err (!%p11632_p7)
}
  0x4b   :  { %107 = dma.hbm_to_vmem [thread:$0]  %s12037_s25, 32, %s105_s1, [#allocation6]  }
  0x4c   :  { %s11636_s11 = scalar_lea.hbm %s12047_s3, 32 }
  0x4d   :  { %p11637_p8 = scmp.ne.s32.totalorder %s12047_s3, %s11636_s11  ;;  %p11640_p9 = scmp.lt.u32.totalorder %s11636_s11, %s12047_s3 }
  0x4f   :  { %p11642_p10 = pnand %p11640_p9, %p11637_p8 }
  0x51   :  { %11645 = shalt.err (!%p11642_p10)
}
  0x52   :  { %s11646_s15 = scalar_lea.vmem %s125_s7, 32  ;;  %p11651_p12 = scmp.lt.s32.totalorder %s125_s7, %s125_s7 }
  0x53   :  { %p11647_p11 = scmp.ne.s32.totalorder %s125_s7, %s11646_s15  ;;  %p11652_p13 = scmp.lt.s32.totalorder %s11646_s15, %s11646_s15 }
  0x55   :  { %p11653_p0 = por %p11652_p13, %p11651_p12 }
  0x57   :  { %p11654_p1 = pnand %p11653_p0, %p11647_p11 }
  0x59   :  { %11657 = shalt.err (!%p11654_p1)
}
  0x5a   :  { %127 = dma.hbm_to_vmem [thread:$0]  %s12047_s3, 32, %s125_s7, [#allocation9]  }
  0x5b   :  { %s11972_s16 = smov [#allocation11]   ;;  %s11973_s25 = smov [#allocation14]  }
  0x5c   :  { %s151_s18 = sshll.u32 %s11972_s16, 4  ;;  %s175_s22 = sshll.u32 %s11973_s25, 4  ;;  %s152_s18 = int_to_ptr.vmem [resolvable:$true] %s151_s18  ;;  %s12182_s22 = int_to_ptr.vmem [resolvable:$true] %s175_s22 }
  0x5d   :  { %s11658_s23 = scalar_lea.hbm %s12072_s30, 256 }
  0x5e   :  { %p11659_p2 = scmp.ne.s32.totalorder %s12072_s30, %s11658_s23  ;;  %p11662_p3 = scmp.lt.u32.totalorder %s11658_s23, %s12072_s30 }
  0x60   :  { %p11664_p4 = pnand %p11662_p3, %p11659_p2 }
  0x62   :  { %11667 = shalt.err (!%p11664_p4)
}
  0x63   :  { %s11668_s26 = scalar_lea.vmem %s152_s18, 256  ;;  %p11673_p6 = scmp.lt.s32.totalorder %s152_s18, %s152_s18 }
  0x64   :  { %p11669_p5 = scmp.ne.s32.totalorder %s152_s18, %s11668_s26  ;;  %p11674_p7 = scmp.lt.s32.totalorder %s11668_s26, %s11668_s26 }
  0x66   :  { %p11675_p8 = por %p11674_p7, %p11673_p6 }
  0x68   :  { %p11676_p9 = pnand %p11675_p8, %p11669_p5 }
  0x6a   :  { %11679 = shalt.err (!%p11676_p9)
}
  0x6b   :  { %s11974_s3 = smov 128   ;;  %s11975_s28 = smov 8  }
  0x6c   :  { %157 = dma.hbm_to_vmem [thread:$0]  %s12072_s30, 256, %s152_s18, [#allocation12], %s11974_s3, %s11974_s3, %s11975_s28  }
  0x6d   :  { %s11680_s1 = scalar_lea.hbm %s12082_s12, 512 }
  0x6e   :  { %p11681_p10 = scmp.ne.s32.totalorder %s12082_s12, %s11680_s1  ;;  %p11684_p11 = scmp.lt.u32.totalorder %s11680_s1, %s12082_s12 }
  0x70   :  { %p11686_p12 = pnand %p11684_p11, %p11681_p10 }
  0x72   :  { %11689 = shalt.err (!%p11686_p12)
}
  0x73   :  { %s11690_s2 = scalar_lea.vmem %s12182_s22, 512  ;;  %p11695_p0 = scmp.lt.s32.totalorder %s12182_s22, %s12182_s22 }
  0x74   :  { %p11691_p13 = scmp.ne.s32.totalorder %s12182_s22, %s11690_s2  ;;  %p11696_p1 = scmp.lt.s32.totalorder %s11690_s2, %s11690_s2 }
  0x76   :  { %p11697_p2 = por %p11696_p1, %p11695_p0 }
  0x78   :  { %p11698_p3 = pnand %p11697_p2, %p11691_p13 }
  0x7a   :  { %11701 = shalt.err (!%p11698_p3)
}
  0x7b   :  { %181 = dma.hbm_to_vmem [thread:$0]  %s12082_s12, 512, %s12182_s22, [#allocation15], %s11974_s3, %s11974_s3, %s11975_s28  }
  0x7c   :  { %s11976_s30 = smov [#allocation17]   ;;  %s11977_s10 = smov [#allocation20]  }
  0x7d   :  { %s206_s7 = sshll.u32 %s11976_s30, 4  ;;  %s230_s0 = sshll.u32 %s11977_s10, 4  ;;  %s207_s7 = int_to_ptr.vmem [resolvable:$true] %s206_s7  ;;  %s231_s0 = int_to_ptr.vmem [resolvable:$true] %s230_s0 }
  0x7e   :  { %s11702_s11 = scalar_lea.hbm %s12112_s27, 128 }
  0x7f   :  { %p11703_p4 = scmp.ne.s32.totalorder %s12112_s27, %s11702_s11  ;;  %p11706_p5 = scmp.lt.u32.totalorder %s11702_s11, %s12112_s27 }
  0x81   :  { %p11708_p6 = pnand %p11706_p5, %p11703_p4 }
  0x83   :  { %11711 = shalt.err (!%p11708_p6)
}
  0x84   :  { %s11712_s15 = scalar_lea.vmem %s207_s7, 128  ;;  %p11717_p8 = scmp.lt.s32.totalorder %s207_s7, %s207_s7 }
  0x85   :  { %p11713_p7 = scmp.ne.s32.totalorder %s207_s7, %s11712_s15  ;;  %p11718_p9 = scmp.lt.s32.totalorder %s11712_s15, %s11712_s15 }
  0x87   :  { %p11719_p10 = por %p11718_p9, %p11717_p8 }
  0x89   :  { %p11720_p11 = pnand %p11719_p10, %p11713_p7 }
  0x8b   :  { %11723 = shalt.err (!%p11720_p11)
}
  0x8c   :  { %209 = dma.hbm_to_vmem [thread:$0]  %s12112_s27, 128, %s207_s7, [#allocation18]  }
  0x8d   :  { %s11724_s12 = scalar_lea.hbm %s12127_s17, 128 }
  0x8e   :  { %p11725_p12 = scmp.ne.s32.totalorder %s12127_s17, %s11724_s12  ;;  %p11728_p13 = scmp.lt.u32.totalorder %s11724_s12, %s12127_s17 }
  0x90   :  { %p11730_p0 = pnand %p11728_p13, %p11725_p12 }
  0x92   :  { %11733 = shalt.err (!%p11730_p0)
}
  0x93   :  { %s11734_s16 = scalar_lea.vmem %s231_s0, 128  ;;  %p11739_p2 = scmp.lt.s32.totalorder %s231_s0, %s231_s0 }
  0x94   :  { %p11735_p1 = scmp.ne.s32.totalorder %s231_s0, %s11734_s16  ;;  %p11740_p3 = scmp.lt.s32.totalorder %s11734_s16, %s11734_s16 }
  0x96   :  { %p11741_p4 = por %p11740_p3, %p11739_p2 }
  0x98   :  { %p11742_p5 = pnand %p11741_p4, %p11735_p1 }
  0x9a   :  { %11745 = shalt.err (!%p11742_p5)
}
  0x9b   :  { %233 = dma.hbm_to_vmem [thread:$0]  %s12127_s17, 128, %s231_s0, [#allocation21]  }
  0x9c   :  { %s11978_s18 = smov [#allocation2]   ;;  %s11979_s27 = smov [#allocation7]  }
  0x9d   :  { %s85_s25 = sshll.u32 %s11978_s18, 4  ;;  %s114_s22 = sshll.u32 %s11979_s27, 4  ;;  %s86_s25 = int_to_ptr.vmem [resolvable:$true] %s85_s25  ;;  %s115_s22 = int_to_ptr.vmem [resolvable:$true] %s114_s22 }
  0x9e   :  { %s11746_s23 = scalar_lea.hbm %s12017_s9, 512 }
  0x9f   :  { %p11747_p6 = scmp.ne.s32.totalorder %s12017_s9, %s11746_s23  ;;  %p11750_p7 = scmp.lt.u32.totalorder %s11746_s23, %s12017_s9 }
  0xa1   :  { %p11752_p8 = pnand %p11750_p7, %p11747_p6 }
  0xa3   :  { %11755 = shalt.err (!%p11752_p8)
}
  0xa4   :  { %s11756_s26 = scalar_lea.vmem %s86_s25, 512  ;;  %p11761_p10 = scmp.lt.s32.totalorder %s86_s25, %s86_s25 }
  0xa5   :  { %p11757_p9 = scmp.ne.s32.totalorder %s86_s25, %s11756_s26  ;;  %p11762_p11 = scmp.lt.s32.totalorder %s11756_s26, %s11756_s26 }
  0xa7   :  { %p11763_p12 = por %p11762_p11, %p11761_p10 }
  0xa9   :  { %p11764_p13 = pnand %p11763_p12, %p11757_p9 }
  0xab   :  { %11767 = shalt.err (!%p11764_p13)
}
  0xac   :  { %91 = dma.hbm_to_vmem [thread:$0]  %s12017_s9, 512, %s86_s25, [#allocation3], %s11974_s3, %s11974_s3, %s11975_s28  }
  0xad   :  { %s11768_s17 = scalar_lea.hbm %s12042_s29, 128 }
  0xae   :  { %p11769_p0 = scmp.ne.s32.totalorder %s12042_s29, %s11768_s17  ;;  %p11772_p1 = scmp.lt.u32.totalorder %s11768_s17, %s12042_s29 }
  0xb0   :  { %p11774_p2 = pnand %p11772_p1, %p11769_p0 }
  0xb2   :  { %11777 = shalt.err (!%p11774_p2)
}
  0xb3   :  { %s11778_s1 = scalar_lea.vmem %s115_s22, 128  ;;  %p11783_p4 = scmp.lt.s32.totalorder %s115_s22, %s115_s22 }
  0xb4   :  { %p11779_p3 = scmp.ne.s32.totalorder %s115_s22, %s11778_s1  ;;  %p11784_p5 = scmp.lt.s32.totalorder %s11778_s1, %s11778_s1 }
  0xb6   :  { %p11785_p6 = por %p11784_p5, %p11783_p4 }
  0xb8   :  { %p11786_p7 = pnand %p11785_p6, %p11779_p3 }
  0xba   :  { %11789 = shalt.err (!%p11786_p7)
}
  0xbb   :  { %117 = dma.hbm_to_vmem [thread:$0]  %s12042_s29, 128, %s115_s22, [#allocation6]  }
  0xbc   :  { %s11980_s2 = smov [#allocation10]   ;;  %s11981_s9 = smov [#allocation13]  }
  0xbd   :  { %s137_s30 = sshll.u32 %s11980_s2, 4  ;;  %s163_s7 = sshll.u32 %s11981_s9, 4  ;;  %s138_s30 = int_to_ptr.vmem [resolvable:$true] %s137_s30  ;;  %s12222_s7 = int_to_ptr.vmem [resolvable:$true] %s163_s7 }
  0xbe   :  { %s11790_s10 = scalar_lea.hbm %s12062_s19, 2304 }
  0xbf   :  { %p11791_p8 = scmp.ne.s32.totalorder %s12062_s19, %s11790_s10  ;;  %p11794_p9 = scmp.lt.u32.totalorder %s11790_s10, %s12062_s19 }
  0xc1   :  { %p11796_p10 = pnand %p11794_p9, %p11791_p8 }
  0xc3   :  { %11799 = shalt.err (!%p11796_p10)
}
  0xc4   :  { %s11800_s0 = scalar_lea.vmem %s138_s30, 2304  ;;  %p11805_p12 = scmp.lt.s32.totalorder %s138_s30, %s138_s30 }
  0xc5   :  { %p11801_p11 = scmp.ne.s32.totalorder %s138_s30, %s11800_s0  ;;  %p11806_p13 = scmp.lt.s32.totalorder %s11800_s0, %s11800_s0 }
  0xc7   :  { %p11807_p0 = por %p11806_p13, %p11805_p12 }
  0xc9   :  { %p11808_p1 = pnand %p11807_p0, %p11801_p11 }
  0xcb   :  { %11811 = shalt.err (!%p11808_p1)
}
  0xcc   :  { %143 = dma.hbm_to_vmem [thread:$0]  %s12062_s19, 2304, %s138_s30, [#allocation9], %s11974_s3, %s11974_s3, %s11975_s28  }
  0xcd   :  { %s11812_s29 = scalar_lea.hbm %s12077_s6, 4608 }
  0xce   :  { %p11813_p2 = scmp.ne.s32.totalorder %s12077_s6, %s11812_s29  ;;  %p11816_p3 = scmp.lt.u32.totalorder %s11812_s29, %s12077_s6 }
  0xd0   :  { %p11818_p4 = pnand %p11816_p3, %p11813_p2 }
  0xd2   :  { %11821 = shalt.err (!%p11818_p4)
}
  0xd3   :  { %s11822_s11 = scalar_lea.vmem %s12222_s7, 4608  ;;  %p11827_p6 = scmp.lt.s32.totalorder %s12222_s7, %s12222_s7 }
  0xd4   :  { %p11823_p5 = scmp.ne.s32.totalorder %s12222_s7, %s11822_s11  ;;  %p11828_p7 = scmp.lt.s32.totalorder %s11822_s11, %s11822_s11 }
  0xd6   :  { %p11829_p8 = por %p11828_p7, %p11827_p6 }
  0xd8   :  { %p11830_p9 = pnand %p11829_p8, %p11823_p5 }
  0xda   :  { %11833 = shalt.err (!%p11830_p9)
}
  0xdb   :  { %169 = dma.hbm_to_vmem [thread:$0]  %s12077_s6, 4608, %s12222_s7, [#allocation12], %s11974_s3, %s11974_s3, %s11975_s28  }
  0xdc   :  { %s11982_s19 = smov [#allocation16]   ;;  %s11983_s12 = smov [#allocation19]  }
  0xdd   :  { %s188_s15 = sshll.u32 %s11982_s19, 4  ;;  %s215_s16 = sshll.u32 %s11983_s12, 4  ;;  %s189_s15 = int_to_ptr.vmem [resolvable:$true] %s188_s15  ;;  %s12243_s16 = int_to_ptr.vmem [resolvable:$true] %s215_s16 }
  0xde   :  { %s11834_s18 = scalar_lea.hbm %s12087_s20, 32 }
  0xdf   :  { %p11835_p10 = scmp.ne.s32.totalorder %s12087_s20, %s11834_s18  ;;  %p11838_p11 = scmp.lt.u32.totalorder %s11834_s18, %s12087_s20 }
  0xe1   :  { %p11840_p12 = pnand %p11838_p11, %p11835_p10 }
  0xe3   :  { %11843 = shalt.err (!%p11840_p12)
}
  0xe4   :  { %s11844_s25 = scalar_lea.vmem %s189_s15, 32  ;;  %p11849_p0 = scmp.lt.s32.totalorder %s189_s15, %s189_s15 }
  0xe5   :  { %p11845_p13 = scmp.ne.s32.totalorder %s189_s15, %s11844_s25  ;;  %p11850_p1 = scmp.lt.s32.totalorder %s11844_s25, %s11844_s25 }
  0xe7   :  { %p11851_p2 = por %p11850_p1, %p11849_p0 }
  0xe9   :  { %p11852_p3 = pnand %p11851_p2, %p11845_p13 }
  0xeb   :  { %11855 = shalt.err (!%p11852_p3)
}
  0xec   :  { %191 = dma.hbm_to_vmem [thread:$0]  %s12087_s20, 32, %s189_s15, [#allocation15]  }
  0xed   :  { %s11856_s6 = scalar_lea.hbm %s12117_s4, 144 }
  0xee   :  { %p11857_p4 = scmp.ne.s32.totalorder %s12117_s4, %s11856_s6  ;;  %p11860_p5 = scmp.lt.u32.totalorder %s11856_s6, %s12117_s4 }
  0xf0   :  { %p11862_p6 = pnand %p11860_p5, %p11857_p4 }
  0xf2   :  { %11865 = shalt.err (!%p11862_p6)
}
  0xf3   :  { %s11866_s3 = scalar_lea.vmem %s12243_s16, 144  ;;  %s11870_s27 = scalar_lea.vmem %s12243_s16, 160 }
  0xf4   :  { %p11867_p7 = scmp.ne.s32.totalorder %s12243_s16, %s11866_s3  ;;  %p11871_p8 = scmp.lt.s32.totalorder %s12243_s16, %s12243_s16 }
  0xf5   :  { %p11872_p9 = scmp.lt.s32.totalorder %s11870_s27, %s11866_s3 }
  0xf7   :  { %p11873_p10 = por %p11872_p9, %p11871_p8 }
  0xf9   :  { %p11874_p11 = pnand %p11873_p10, %p11867_p7 }
  0xfb   :  { %11877 = shalt.err (!%p11874_p11)
}
  0xfc   :  { %s11984_s22 = smov 16   ;;  %s11985_s20 = smov 1  }
  0xfd   :  { %221 = dma.hbm_to_vmem [thread:$0]  %s12117_s4, 144, %s12243_s16, [#allocation18], %s11984_s22, %s11984_s22, %s11985_s20  }
  0xfe   :  { %s11986_s23 = smov [#allocation22]   ;;  %s11878_s17 = scalar_lea.hbm %s12152_s24, 256 }
  0xff   :  { %s248_s26 = sshll.u32 %s11986_s23, 4  ;;  %p11879_p12 = scmp.ne.s32.totalorder %s12152_s24, %s11878_s17  ;;  %s249_s26 = int_to_ptr.vmem [resolvable:$true] %s248_s26 }
 0x100   :  { %p11882_p13 = scmp.lt.u32.totalorder %s11878_s17, %s12152_s24 }
 0x102   :  { %p11884_p0 = pnand %p11882_p13, %p11879_p12 }
 0x104   :  { %11887 = shalt.err (!%p11884_p0)
}
 0x105   :  { %s11888_s1 = scalar_lea.vmem %s249_s26, 256  ;;  %p11893_p2 = scmp.lt.s32.totalorder %s249_s26, %s249_s26 }
 0x106   :  { %p11889_p1 = scmp.ne.s32.totalorder %s249_s26, %s11888_s1  ;;  %p11894_p3 = scmp.lt.s32.totalorder %s11888_s1, %s11888_s1 }
 0x108   :  { %p11895_p4 = por %p11894_p3, %p11893_p2 }
 0x10a   :  { %p11896_p5 = pnand %p11895_p4, %p11889_p1 }
 0x10c   :  { %11899 = shalt.err (!%p11896_p5)
}
 0x10d   :  { %251 = dma.hbm_to_vmem [thread:$0]  %s12152_s24, 256, %s249_s26, [#allocation21]  }
 0x10e   :  { %11922 = dma.done.wait [#allocation3], 512  }
 0x10f   :  { %11923 = vsyncadd [#allocation3], 4294966784 }
 0x110   :  { %11924 = dma.done.wait [#allocation6], 160  }
 0x111   :  { %11925 = vsyncadd [#allocation6], 4294967136 }
 0x112   :  { %11926 = dma.done.wait [#allocation9], 2336  }
 0x113   :  { %11927 = vsyncadd [#allocation9], 4294964960 }
 0x114   :  { %11928 = dma.done.wait [#allocation12], 4864  }
 0x115   :  { %11929 = vsyncadd [#allocation12], 4294962432 }
 0x116   :  { %11930 = dma.done.wait [#allocation15], 544  }
 0x117   :  { %11931 = vsyncadd [#allocation15], 4294966752 }
 0x118   :  { %11932 = dma.done.wait [#allocation18], 272  }
 0x119   :  { %11933 = vsyncadd [#allocation18], 4294967024 }
 0x11a   :  { %11934 = dma.done.wait [#allocation21], 384  }
 0x11b   :  { %11935 = vsyncadd [#allocation21], 4294966912  ;;  %s13581_s4 = sld [smem:[#allocation32_spill]]  ;;  %v11987_v0 = vmov 0   ;;  %vm329_vm0 = vcmask 261120   ;;  %v12267_v1 = vld [vmem:[%s12012_s5] sm:$0xff] }
 0x11c   :  { %11561 = vset.pattern.permute.xlu0 %v11987_v0  ;;  %11562 = vset.pattern.permute.xlu1 %v11987_v0  ;;  %v12270_v2 = vld [vmem:[%s12012_s5 + $0x8] sm:$0xff]  ;;  %v12273_v3 = vld [vmem:[%s12012_s5 + $0x10] sm:$0xff]  ;;  %v12278_v5 = vld [vmem:[%s12012_s5 + $0x18] sm:$0xff]  ;;  %s13582_s24 = sld [smem:[#allocation34_spill]]  ;;  %s13583_s5 = sld [smem:[#allocation36_spill]]  ;;  %v11988_v31 = vmov 0.0|0.0  }
 0x11d   :  { %v11098_v4 = vpack.c.bf16 %v12270_v2, %v12267_v1  ;;  %v301_v6 = vld [vmem:[#allocation2] sm:$0xff]  ;;  %v11102_v7 = vpack.c.bf16 %v12278_v5, %v12273_v3  ;;  %v302_v12 = vld [vmem:[#allocation2 + $0x8] sm:$0xff]  ;;  %v303_v14 = vld [vmem:[#allocation2 + $0x10] sm:$0xff]  ;;  %s13584_s2 = sld [smem:[#allocation37_spill]]  ;;  %11106 = vmatprep.subr.bf16.mxu1 %v11988_v31  ;;  %vm11989_vm1 = vmmov 0   ;;  %v11990_v32 = vmov 0.0  }
 0x11e   :  { %10490 = vmatprep.mubr.msk.f32.mxu0 %vm329_vm0, %v301_v6  ;;  %v304_v16 = vld [vmem:[#allocation2 + $0x18] sm:$0xff]  ;;  %10504 = vmatprep.mubr.msk.f32.mxu1 %vm11989_vm1, %v11990_v32  ;;  %v721_v33 = vld [vmem:[#allocation5] sm:$0x3]  ;;  %vm735_vm2 = vcmask 1041408   ;;  %vm722_vm3 = vcmask 15360   ;;  %s13585_s30 = sld [smem:[#allocation33_spill]] }
 0x11f   :  { %11099 = vmatprep.subr.bf16.mxu0 %v11098_v4  ;;  %vm962_vm4 = vcmask 64512   ;;  %s13586_s9 = sld [smem:[#allocation35_spill]]  ;;  %vm2936_vm5 = vcmask 130048   ;;  %s11991_s7 = smov 9   ;;  %vm8039_vm14 = vcmask 1043456   ;;  %vm8035_vm15 = vcmask 31744  }
 0x120   :  { %11101 = vmatpush3.bf16.msra.mxu0 %v11098_v4  ;;  %s13587_s10 = sld [smem:[#allocation39_spill]]  ;;  %s11992_s0 = smov 7  }
 0x121   :  { %v305_v8 = vld [vmem:[%s13581_s4] sm:$0xff]  ;;  %v307_v9 = vld [vmem:[%s13581_s4 + $0x10] sm:$0xff]  ;;  %v306_v10 = vld [vmem:[%s13581_s4 + $0x8] sm:$0xff]  ;;  %11103 = vmatprep.subr.bf16.mxu0 %v11102_v7  ;;  %s11993_s29 = smov 121   ;;  %s11994_s11 = smov 127  }
 0x122   :  { %311 = vperm.xlu0 %11561, %v305_v8   ;;  %321 = vperm.xlu1 %11562, %v307_v9   ;;  %v308_v11 = vld [vmem:[%s13581_s4 + $0x18] sm:$0xff]  ;;  %v446_v13 = vld [vmem:[%s13582_s24] sm:$0xff]  ;;  %v447_v15 = vld [vmem:[%s13582_s24 + $0x8] sm:$0xff]  ;;  %s11995_s19 = smov 119   ;;  %s11996_s15 = smov 120  }
 0x123   :  { %v448_v17 = vld [vmem:[%s13582_s24 + $0x10] sm:$0xff]  ;;  %v449_v18 = vld [vmem:[%s13582_s24 + $0x18] sm:$0xff]  ;;  %v450_v19 = vld [vmem:[%s13582_s24 + $0x20] sm:$0xff]  ;;  %s13588_s12 = sld [smem:[#allocation38_spill]]  ;;  %s13589_s16 = sld [smem:[#allocation41_spill]] }
 0x124   :  { %11105 = vmatpush3.bf16.msra.mxu0 %v11102_v7  ;;  %v451_v20 = vld [vmem:[%s13582_s24 + $0x28] sm:$0xff]  ;;  %v452_v21 = vld [vmem:[%s13582_s24 + $0x30] sm:$0xff]  ;;  %v453_v22 = vld [vmem:[%s13582_s24 + $0x38] sm:$0xff]  ;;  %s13590_s18 = sld [smem:[#allocation40_spill]]  ;;  %s11997_s25 = smov 17  }
 0x125   :  { %v454_v23 = vld [vmem:[%s13582_s24 + $0x40] sm:$0xff]  ;;  %v455_v24 = vld [vmem:[%s13582_s24 + $0x48] sm:$0xff]  ;;  %v456_v25 = vld [vmem:[%s13582_s24 + $0x50] sm:$0xff]  ;;  %10549 = vmatprep.subr.msk.mxu0 %vm735_vm2, %v721_v33  ;;  %s11998_s6 = smov 15   ;;  %s11999_s3 = smov 113  }
 0x126   :  { %316 = vperm.xlu0 %11561, %v306_v10   ;;  %326 = vperm.xlu1 %11562, %v308_v11   ;;  %v457_v26 = vld [vmem:[%s13582_s24 + $0x58] sm:$0xff]  ;;  %v2650_v27 = vld [vmem:[%s13583_s5] sm:$0xff]  ;;  %v2651_v28 = vld [vmem:[%s13583_s5 + $0x8] sm:$0xff]  ;;  %s13592_s27 = sld [smem:[#allocation44_spill]]  ;;  %s12000_s23 = smov 112  }
 0x127   :  { %10491 = vmatmul.mubr.msk.f32.vlgmr.msra.gmra.mrb[0].mxu0 %vm329_vm0, %v302_v12  ;;  %v4226_v29 = vld [vmem:[%s13584_s2] sm:$0xff]  ;;  %v4227_v30 = vld [vmem:[%s13584_s2 + $0x8] sm:$0xff]  ;;  %v433_v54 = vld [vmem:[%s13585_s30 + $0x10] sm:$0xff]  ;;  %s12001_s26 = smov 111   ;;  %s13593_s17 = sld [smem:[#allocation43_spill]] }
 0x128   :  { %10493 = vmatprep.mubr.msk.f32.mxu0 %vm329_vm0, %v303_v14  ;;  %10550 = vmatpush3.msk.msra.mxu0 %vm735_vm2, %v721_v33  ;;  %v431_v52 = vld [vmem:[%s13585_s30] sm:$0xff]  ;;  %v432_v53 = vld [vmem:[%s13585_s30 + $0x8] sm:$0xff]  ;;  %v434_v55 = vld [vmem:[%s13585_s30 + $0x18] sm:$0xff] }
 0x129   :  { %10557 = vmatprep.subr.msk.mxu0 %vm735_vm2, %v721_v33  ;;  %v435_v56 = vld [vmem:[%s13585_s30 + $0x20] sm:$0xff]  ;;  %v436_v57 = vld [vmem:[%s13585_s30 + $0x28] sm:$0xff]  ;;  %v437_v58 = vld [vmem:[%s13585_s30 + $0x30] sm:$0xff] }
 0x12a   :  { %463 = vperm.xlu0 %11561, %v446_v13   ;;  %468 = vperm.xlu1 %11562, %v447_v15   ;;  %v438_v59 = vld [vmem:[%s13585_s30 + $0x38] sm:$0xff]  ;;  %v439_v60 = vld [vmem:[%s13585_s30 + $0x40] sm:$0xff]  ;;  %v440_v61 = vld [vmem:[%s13585_s30 + $0x48] sm:$0xff] }
 0x12b   :  { %10494 = vmatmul.mubr.msk.f32.gmra.mrb[2].mxu0 %vm329_vm0, %v304_v16  ;;  %v441_v62 = vld [vmem:[%s13585_s30 + $0x50] sm:$0xff]  ;;  %v442_v63 = vld [vmem:[%s13585_s30 + $0x58] sm:$0xff] }
 0x12c   :  { %10551 = vmatprep.mubr.msk.f32.mxu0 %vm722_vm3, %v12267_v1 }
 0x12e   :  { %473 = vperm.xlu0 %11561, %v448_v17   ;;  %478 = vperm.xlu1 %11562, %v449_v18  }
 0x12f   :  { %10552 = vmatmul.mubr.msk.f32.vlgmr.msra.gmra.mrb[4].mxu0 %vm722_vm3, %v12270_v2 }
 0x130   :  { %10554 = vmatprep.mubr.msk.f32.mxu0 %vm722_vm3, %v12273_v3  ;;  %10558 = vmatpush3.msk.msra.mxu0 %vm735_vm2, %v721_v33 }
 0x132   :  { %483 = vperm.xlu0 %11561, %v450_v19   ;;  %488 = vperm.xlu1 %11562, %v451_v20  }
 0x133   :  { %10555 = vmatmul.mubr.msk.f32.gmra.mrb[6].mxu0 %vm722_vm3, %v12278_v5 }
 0x136   :  { %493 = vperm.xlu0 %11561, %v452_v21   ;;  %498 = vperm.xlu1 %11562, %v453_v22  }
 0x13a   :  { %503 = vperm.xlu0 %11561, %v454_v23   ;;  %508 = vperm.xlu1 %11562, %v455_v24  }
 0x13e   :  { %513 = vperm.xlu0 %11561, %v456_v25   ;;  %518 = vperm.xlu1 %11562, %v457_v26  }
 0x142   :  { %2654 = vperm.xlu0 %11561, %v2650_v27   ;;  %2659 = vperm.xlu1 %11562, %v2651_v28  }
 0x146   :  { %4230 = vperm.xlu0 %11561, %v4226_v29   ;;  %4235 = vperm.xlu1 %11562, %v4227_v30  }
 0x1a1   :  { %v312_v34 = vpop.permute.xlu0 %311  ;;  %v322_v35 = vpop.permute.xlu1 %321 }
 0x1a5   :  { %v317_v36 = vpop.permute.xlu0 %316  ;;  %v327_v42 = vpop.permute.xlu1 %326 }
 0x1a9   :  { %v464_v4 = vpop.permute.xlu0 %463  ;;  %v469_v8 = vpop.permute.xlu1 %468 }
 0x1ad   :  { %v474_v12 = vpop.permute.xlu0 %473  ;;  %v479_v16 = vpop.permute.xlu1 %478 }
 0x1b1   :  { %v484_v20 = vpop.permute.xlu0 %483  ;;  %v489_v24 = vpop.permute.xlu1 %488 }
 0x1b5   :  { %v494_v28 = vpop.permute.xlu0 %493 }
 0x1fa   :  { %v10492_v37 = vpop.f32.mrb[0].mxu0 }
 0x1fb   :  { %v414_v38 = vadd.f32 %v10492_v37, %v317_v36  ;;  %v408_v39 = vpop.f32.mrb[1].mxu0 }
 0x1fc   :  { %v409_v40 = vadd.f32 %v408_v39, %v312_v34  ;;  %v499_v34 = vpop.permute.xlu1 %498 }
 0x1fd   :  { %v428_v41 = vmax.f32 %v414_v38, 0.0 }
 0x1fe   :  { %v427_v43 = vmax.f32 %v409_v40, 0.0  ;;  %v10495_v44 = vpop.f32.mrb[2].mxu0 }
 0x1ff   :  { %v424_v45 = vadd.f32 %v10495_v44, %v327_v42  ;;  %v418_v46 = vpop.f32.mrb[3].mxu0 }
 0x200   :  { %v419_v47 = vadd.f32 %v418_v46, %v322_v35  ;;  %v11107_v48 = vpack.c.bf16 %v428_v41, %v427_v43  ;;  %v961_v46 = vld [vmem:[#allocation7] sm:$0xff] }
 0x201   :  { %v430_v49 = vmax.f32 %v424_v45, 0.0  ;;  %10571 = vmatprep.subr.mxu0 %v961_v46 }
 0x202   :  { %v429_v50 = vmax.f32 %v419_v47, 0.0  ;;  %11108 = vmatpush3.bf16.msra.mxu1 %v11107_v48  ;;  %v12370_v0 = vpop.f32.mrb[4].mxu0  ;;  %v1419_v47 = vld [vmem:[#allocation13 + $0x40] sm:$0xff]  ;;  %v1420_v48 = vld [vmem:[#allocation13 + $0x48] sm:$0xff] }
 0x203   :  { %11109 = vmatprep.subr.bf16.mxu1 %v11988_v31  ;;  %v12372_v1 = vpop.f32.mrb[5].mxu0 }
 0x204   :  { %v11110_v51 = vpack.c.bf16 %v430_v49, %v429_v50  ;;  %v443_v49 = vld [vmem:[%s13585_s30 + $0x60] sm:$0xff]  ;;  %v12395_v50 = vpack.c.bf16 %v1420_v48, %v1419_v47  ;;  %v1947_v48 = vld [vmem:[#allocation13 + $0xa0] sm:$0xff] }
 0x206   :  { %11111 = vmatpush3.bf16.msra.mxu1 %v11110_v51  ;;  %v12374_v2 = vpop.f32.mrb[6].mxu0  ;;  %v1060_v51 = vld [vmem:[#allocation13] sm:$0xff] }
 0x207   :  { %v12376_v3 = vpop.f32.mrb[7].mxu0  ;;  %11145 = vmatprep.subr.bf16.mxu1 %v12395_v50 }
 0x209   :  { %10505 = vmatmul.mubr.msk.f32.vlgmr.msra.gmra.mrb[0].mxu1 %vm329_vm0, %v431_v52  ;;  %v1061_v52 = vld [vmem:[#allocation13 + $0x8] sm:$0xff] }
 0x20a   :  { %10507 = vmatprep.mubr.msk.f32.mxu1 %vm11989_vm1, %v11990_v32  ;;  %11147 = vmatpush3.bf16.msra.mxu1 %v12395_v50 }
 0x20d   :  { %10508 = vmatmul.mubr.msk.f32.gmra.mrb[2].mxu1 %vm329_vm0, %v432_v53  ;;  %v444_v53 = vld [vmem:[%s13585_s30 + $0x68] sm:$0xff] }
 0x20e   :  { %10510 = vmatprep.mubr.msk.f32.mxu1 %vm11989_vm1, %v11990_v32 }
 0x211   :  { %10511 = vmatmul.mubr.msk.f32.gmra.mrb[4].mxu1 %vm329_vm0, %v433_v54  ;;  %v12401_v54 = vpack.c.bf16 %v1061_v52, %v1060_v51  ;;  %v1949_v52 = vld [vmem:[#allocation13 + $0xb0] sm:$0xff] }
 0x212   :  { %10513 = vmatprep.mubr.msk.f32.mxu1 %vm11989_vm1, %v11990_v32 }
 0x215   :  { %10514 = vmatmul.mubr.msk.f32.gmra.mrb[6].mxu1 %vm329_vm0, %v434_v55  ;;  %v1421_v55 = vld [vmem:[#allocation13 + $0x50] sm:$0xff] }
 0x216   :  { %10516 = vmatprep.mubr.msk.f32.mxu1 %vm11989_vm1, %v11990_v32 }
 0x219   :  { %10517 = vmatmul.mubr.msk.f32.gmra.mrb[8].mxu1 %vm329_vm0, %v435_v56  ;;  %v1422_v56 = vld [vmem:[#allocation13 + $0x58] sm:$0xff] }
 0x21a   :  { %10519 = vmatprep.mubr.msk.f32.mxu1 %vm11989_vm1, %v11990_v32 }
 0x21d   :  { %10520 = vmatmul.mubr.msk.f32.gmra.mrb[10].mxu1 %vm329_vm0, %v436_v57  ;;  %v12406_v57 = vpack.c.bf16 %v1422_v56, %v1421_v55  ;;  %v2123_v56 = vld [vmem:[#allocation13 + $0xc0] sm:$0xff] }
 0x21e   :  { %10522 = vmatprep.mubr.msk.f32.mxu1 %vm11989_vm1, %v11990_v32 }
 0x21f   :  { %11149 = vmatprep.subr.bf16.mxu1 %v12406_v57 }
 0x220   :  { %11151 = vmatpush3.bf16.msra.mxu1 %v12406_v57 }
 0x221   :  { %10523 = vmatmul.mubr.msk.f32.gmra.mrb[12].mxu1 %vm329_vm0, %v437_v58  ;;  %v445_v58 = vld [vmem:[%s13585_s30 + $0x70] sm:$0xff] }
 0x222   :  { %10525 = vmatprep.mubr.msk.f32.mxu1 %vm11989_vm1, %v11990_v32 }
 0x225   :  { %10526 = vmatmul.mubr.msk.f32.gmra.mrb[14].mxu1 %vm329_vm0, %v438_v59 }
 0x226   :  { %10528 = vmatprep.mubr.msk.f32.mxu1 %vm11989_vm1, %v11990_v32 }
 0x229   :  { %10529 = vmatmul.mubr.msk.f32.gmra.mrb[16].mxu1 %vm329_vm0, %v439_v60 }
 0x22a   :  { %10531 = vmatprep.mubr.msk.f32.mxu1 %vm11989_vm1, %v11990_v32 }
 0x22d   :  { %10532 = vmatmul.mubr.msk.f32.gmra.mrb[18].mxu1 %vm329_vm0, %v440_v61 }
 0x22e   :  { %10534 = vmatprep.mubr.msk.f32.mxu1 %vm11989_vm1, %v11990_v32 }
 0x231   :  { %10535 = vmatmul.mubr.msk.f32.gmra.mrb[20].mxu1 %vm329_vm0, %v441_v62 }
 0x232   :  { %10537 = vmatprep.mubr.msk.f32.mxu1 %vm11989_vm1, %v11990_v32 }
 0x235   :  { %10538 = vmatmul.mubr.msk.f32.gmra.mrb[22].mxu1 %vm329_vm0, %v442_v63 }
 0x236   :  { %10540 = vmatprep.mubr.msk.f32.mxu1 %vm11989_vm1, %v11990_v32 }
 0x239   :  { %10541 = vmatmul.mubr.msk.f32.gmra.mrb[24].mxu1 %vm329_vm0, %v443_v49  ;;  %v1948_v49 = vld [vmem:[#allocation13 + $0xa8] sm:$0xff] }
 0x23a   :  { %10543 = vmatprep.mubr.msk.f32.mxu1 %vm11989_vm1, %v11990_v32  ;;  %v12493_v51 = vpack.c.bf16 %v1948_v49, %v1947_v48 }
 0x23d   :  { %10544 = vmatmul.mubr.msk.f32.gmra.mrb[26].mxu1 %vm329_vm0, %v444_v53  ;;  %v1950_v53 = vld [vmem:[#allocation13 + $0xb8] sm:$0xff] }
 0x23e   :  { %10546 = vmatprep.mubr.msk.f32.mxu1 %vm11989_vm1, %v11990_v32  ;;  %v12503_v55 = vpack.c.bf16 %v1950_v53, %v1949_v52 }
 0x241   :  { %10547 = vmatmul.mubr.msk.f32.gmra.mrb[28].mxu1 %vm329_vm0, %v445_v58  ;;  %v2124_v58 = vld [vmem:[#allocation13 + $0xc8] sm:$0xff] }
 0x2dc   :  { %v647_v5 = vpop.f32.mrb[0].mxu1 }
 0x2dd   :  { %v648_v6 = vadd.f32 %v647_v5, %v464_v4  ;;  %v10506_v7 = vpop.f32.mrb[1].mxu1 }
 0x2df   :  { %10559 = vmatprep.mubr.msk.f32.mxu0 %vm722_vm3, %v648_v6 }
 0x2e0   :  { %v652_v9 = vpop.f32.mrb[2].mxu1 }
 0x2e1   :  { %v653_v10 = vadd.f32 %v652_v9, %v469_v8  ;;  %v10509_v11 = vpop.f32.mrb[3].mxu1  ;;  %v1062_v8 = vld [vmem:[#allocation13 + $0x10] sm:$0xff]  ;;  %v1063_v9 = vld [vmem:[#allocation13 + $0x18] sm:$0xff] }
 0x2e3   :  { %10560 = vmatmul.mubr.msk.f32.vlgmr.msra.gmra.mrb[8].mxu0 %vm722_vm3, %v653_v10 }
 0x2e4   :  { %v657_v13 = vpop.f32.mrb[4].mxu1  ;;  %10572 = vmatpush3.msra.mxu0 %v961_v46  ;;  %v1774_v46 = vld [vmem:[#allocation13 + $0x98] sm:$0xff] }
 0x2e5   :  { %v658_v14 = vadd.f32 %v657_v13, %v474_v12  ;;  %v10512_v15 = vpop.f32.mrb[5].mxu1  ;;  %11113 = vmatprep.subr.bf16.mxu0 %v12401_v54  ;;  %v12419_v13 = vpack.c.bf16 %v1063_v9, %v1062_v8  ;;  %v2475_v9 = vld [vmem:[#allocation13 + $0x100] sm:$0xff] }
 0x2e6   :  { %v1165_v15 = vld [vmem:[#allocation13 + $0x28] sm:$0xff] }
 0x2e7   :  { %10562 = vmatprep.mubr.msk.f32.mxu0 %vm722_vm3, %v658_v14  ;;  %v1164_v14 = vld [vmem:[#allocation13 + $0x20] sm:$0xff] }
 0x2e8   :  { %v662_v17 = vpop.f32.mrb[6].mxu1 }
 0x2e9   :  { %v663_v18 = vadd.f32 %v662_v17, %v479_v16  ;;  %v10515_v19 = vpop.f32.mrb[7].mxu1  ;;  %v1595_v16 = vld [vmem:[#allocation13 + $0x60] sm:$0xff]  ;;  %v12428_v17 = vpack.c.bf16 %v1165_v15, %v1164_v14  ;;  %v509_v14 = vpop.permute.xlu1 %508 }
 0x2eb   :  { %10563 = vmatmul.mubr.msk.f32.gmra.mrb[10].mxu0 %vm722_vm3, %v663_v18  ;;  %v1596_v18 = vld [vmem:[#allocation13 + $0x68] sm:$0xff] }
 0x2ec   :  { %v667_v21 = vpop.f32.mrb[8].mxu1  ;;  %v12430_v19 = vpack.c.bf16 %v1596_v18, %v1595_v16 }
 0x2ed   :  { %v668_v22 = vadd.f32 %v667_v21, %v484_v20  ;;  %v10518_v23 = vpop.f32.mrb[9].mxu1 }
 0x2ee   :  { %11161 = vmatprep.subr.bf16.mxu1 %v12430_v19 }
 0x2ef   :  { %10565 = vmatprep.mubr.msk.f32.mxu0 %vm722_vm3, %v668_v22 }
 0x2f0   :  { %v672_v25 = vpop.f32.mrb[10].mxu1 }
 0x2f1   :  { %v673_v26 = vadd.f32 %v672_v25, %v489_v24  ;;  %v10521_v27 = vpop.f32.mrb[11].mxu1 }
 0x2f2   :  { %v1167_v27 = vld [vmem:[#allocation13 + $0x38] sm:$0xff] }
 0x2f3   :  { %10566 = vmatmul.mubr.msk.f32.gmra.mrb[12].mxu0 %vm722_vm3, %v673_v26  ;;  %v1166_v26 = vld [vmem:[#allocation13 + $0x30] sm:$0xff] }
 0x2f4   :  { %v677_v29 = vpop.f32.mrb[12].mxu1 }
 0x2f5   :  { %v678_v30 = vadd.f32 %v677_v29, %v494_v28  ;;  %v10524_v33 = vpop.f32.mrb[13].mxu1  ;;  %v1597_v28 = vld [vmem:[#allocation13 + $0x70] sm:$0xff]  ;;  %v1598_v29 = vld [vmem:[#allocation13 + $0x78] sm:$0xff] }
 0x2f7   :  { %10568 = vmatprep.mubr.msk.f32.mxu0 %vm722_vm3, %v678_v30 }
 0x2f8   :  { %v682_v35 = vpop.f32.mrb[14].mxu1 }
 0x2f9   :  { %v683_v36 = vadd.f32 %v682_v35, %v499_v34  ;;  %v10527_v37 = vpop.f32.mrb[15].mxu1  ;;  %v12444_v34 = vpack.c.bf16 %v1167_v27, %v1166_v26  ;;  %v12446_v35 = vpack.c.bf16 %v1598_v29, %v1597_v28 }
 0x2fa   :  { %v1772_v37 = vld [vmem:[#allocation13 + $0x88] sm:$0xff] }
 0x2fb   :  { %10569 = vmatmul.mubr.msk.f32.gmra.mrb[14].mxu0 %vm722_vm3, %v683_v36  ;;  %v1771_v36 = vld [vmem:[#allocation13 + $0x80] sm:$0xff] }
 0x2fc   :  { %v12386_v38 = vpop.f32.mrb[16].mxu1 }
 0x2fd   :  { %v10530_v39 = vpop.f32.mrb[17].mxu1 }
 0x2fe   :  { %v12460_v39 = vpack.c.bf16 %v1772_v37, %v1771_v36 }
 0x300   :  { %v12388_v40 = vpop.f32.mrb[18].mxu1 }
 0x301   :  { %v10533_v41 = vpop.f32.mrb[19].mxu1  ;;  %v693_v18 = vadd.f32 %v12388_v40, %v509_v14  ;;  %v9914_v14 = vld [vmem:[%s13586_s9 + $0x20] sm:$0xff] }
 0x304   :  { %v12390_v42 = vpop.f32.mrb[20].mxu1 }
 0x305   :  { %v10536_v43 = vpop.f32.mrb[21].mxu1 }
 0x308   :  { %v12392_v44 = vpop.f32.mrb[22].mxu1 }
 0x309   :  { %v10539_v45 = vpop.f32.mrb[23].mxu1 }
 0x30a   :  { %v1773_v45 = vld [vmem:[#allocation13 + $0x90] sm:$0xff] }
 0x30b   :  { %v12481_v47 = vpack.c.bf16 %v1774_v46, %v1773_v45 }
 0x30c   :  { %v12434_v20 = vpop.f32.mrb[24].mxu1 }
 0x30d   :  { %v10542_v21 = vpop.f32.mrb[25].mxu1 }
 0x310   :  { %v12436_v22 = vpop.f32.mrb[26].mxu1 }
 0x311   :  { %v10545_v23 = vpop.f32.mrb[27].mxu1 }
 0x312   :  { %v519_v23 = vpop.permute.xlu1 %518 }
 0x314   :  { %v12438_v24 = vpop.f32.mrb[28].mxu1 }
 0x315   :  { %v10548_v25 = vpop.f32.mrb[29].mxu1 }
 0x316   :  { %v703_v25 = vadd.f32 %v12392_v44, %v519_v23 }
 0x3b6   :  { %v10561_v59 = vpop.f32.mrb[8].mxu0 }
 0x3b7   :  { %v954_v60 = vmul.f32 %v10561_v59, %v12370_v0  ;;  %v914_v61 = vpop.f32.mrb[9].mxu0  ;;  %v12511_v59 = vpack.c.bf16 %v2124_v58, %v2123_v56 }
 0x3b8   :  { %v953_v62 = vmul.f32 %v914_v61, %v12372_v1  ;;  %v2126_v61 = vld [vmem:[#allocation13 + $0xd8] sm:$0xff] }
 0x3be   :  { %v10564_v63 = vpop.f32.mrb[10].mxu0 }
 0x3bf   :  { %v956_v4 = vmul.f32 %v10564_v63, %v12374_v2  ;;  %v924_v5 = vpop.f32.mrb[11].mxu0  ;;  %v2299_v63 = vld [vmem:[#allocation13 + $0xe0] sm:$0xff] }
 0x3c0   :  { %v955_v6 = vmul.f32 %v924_v5, %v12376_v3 }
 0x3c6   :  { %v10567_v7 = vpop.f32.mrb[12].mxu0 }
 0x3c7   :  { %v958_v10 = vadd.f32 %v10567_v7, %v954_v60  ;;  %v934_v11 = vpop.f32.mrb[13].mxu0  ;;  %v2125_v60 = vld [vmem:[#allocation13 + $0xd0] sm:$0xff]  ;;  %v2302_v7 = vld [vmem:[#allocation13 + $0xf8] sm:$0xff] }
 0x3c8   :  { %v957_v12 = vadd.f32 %v953_v62, %v934_v11  ;;  %v12519_v62 = vpack.c.bf16 %v2126_v61, %v2125_v60 }
 0x3ca   :  { %10573 = vmatprep.mubr.msk.f32.mxu0 %vm962_vm4, %v957_v12  ;;  %v2477_v12 = vld [vmem:[#allocation13 + $0x110] sm:$0xff] }
 0x3cb   :  { %10574 = vmatmul.mubr.msk.f32.vlgmr.msra.gmra.mrb[16].mxu0 %vm962_vm4, %v958_v10  ;;  %v2476_v10 = vld [vmem:[#allocation13 + $0x108] sm:$0xff] }
 0x3cc   :  { %11115 = vmatpush3.bf16.msra.mxu0 %v12401_v54  ;;  %v12543_v11 = vpack.c.bf16 %v2476_v10, %v2475_v9 }
 0x3cd   :  { %11117 = vmatprep.subr.bf16.mxu0 %v12419_v13 }
 0x3ce   :  { %v10570_v0 = vpop.f32.mrb[14].mxu0 }
 0x3cf   :  { %v960_v1 = vadd.f32 %v10570_v0, %v956_v4  ;;  %v944_v2 = vpop.f32.mrb[15].mxu0  ;;  %v2300_v4 = vld [vmem:[#allocation13 + $0xe8] sm:$0xff]  ;;  %v2478_v0 = vld [vmem:[#allocation13 + $0x118] sm:$0xff] }
 0x3d0   :  { %v959_v3 = vadd.f32 %v955_v6, %v944_v2  ;;  %11119 = vmatpush3.bf16.msra.mxu0 %v12419_v13  ;;  %v12527_v5 = vpack.c.bf16 %v2300_v4, %v2299_v63  ;;  %v2301_v6 = vld [vmem:[#allocation13 + $0xf0] sm:$0xff]  ;;  %v2670_v2 = vld [vmem:[#allocation8] sm:$0x3] }
 0x3d1   :  { %11121 = vmatprep.subr.bf16.mxu0 %v12428_v17  ;;  %v12535_v8 = vpack.c.bf16 %v2302_v7, %v2301_v6  ;;  %v9905_v63 = vld [vmem:[%s13586_s9 + $0x18] sm:$0xff]  ;;  %v1161_v6 = vld [vmem:[%s13586_s9] sm:$0xff] }
 0x3d2   :  { %10576 = vmatprep.mubr.msk.f32.mxu0 %vm962_vm4, %v959_v3  ;;  %v504_v3 = vpop.permute.xlu0 %503 }
 0x3d3   :  { %10577 = vmatmul.mubr.msk.f32.gmra.mrb[18].mxu0 %vm962_vm4, %v960_v1  ;;  %v12551_v1 = vpack.c.bf16 %v2478_v0, %v2477_v12  ;;  %v688_v15 = vadd.f32 %v12386_v38, %v504_v3  ;;  %v9904_v38 = vld [vmem:[%s13586_s9 + $0x10] sm:$0xff] }
 0x3d6   :  { %v514_v16 = vpop.permute.xlu0 %513 }
 0x3d7   :  { %v698_v21 = vadd.f32 %v12390_v42, %v514_v16 }
 0x49e   :  { %v12440_v30 = vpop.f32.mrb[16].mxu0 }
 0x49f   :  { %v12442_v33 = vpop.f32.mrb[17].mxu0 }
 0x4a0   :  { %10587 = vmatprep.mubr.msk.f32.mxu0 %vm329_vm0, %v12442_v33  ;;  %10637 = vmatprep.mubr.msk.f32.mxu1 %vm329_vm0, %v12442_v33 }
 0x4a1   :  { %10588 = vmatmul.mubr.msk.f32.vlgmr.msra.gmra.mrb[20].mxu0 %vm329_vm0, %v12440_v30  ;;  %10638 = vmatmul.mubr.msk.f32.vlgmr.msra.gmra.mrb[30].mxu1 %vm329_vm0, %v12440_v30 }
 0x4a2   :  { %11123 = vmatpush3.bf16.msra.mxu0 %v12428_v17  ;;  %11163 = vmatpush3.bf16.msra.mxu1 %v12430_v19 }
 0x4a3   :  { %11125 = vmatprep.subr.bf16.mxu0 %v12444_v34  ;;  %11165 = vmatprep.subr.bf16.mxu1 %v12446_v35 }
 0x4a6   :  { %v12462_v41 = vpop.f32.mrb[18].mxu0  ;;  %11127 = vmatpush3.bf16.msra.mxu0 %v12444_v34  ;;  %11167 = vmatpush3.bf16.msra.mxu1 %v12446_v35 }
 0x4a7   :  { %v12466_v43 = vpop.f32.mrb[19].mxu0  ;;  %11177 = vmatprep.subr.bf16.mxu1 %v12460_v39 }
 0x4a8   :  { %10590 = vmatprep.mubr.msk.f32.mxu0 %vm329_vm0, %v12466_v43  ;;  %10640 = vmatprep.mubr.msk.f32.mxu1 %vm329_vm0, %v12466_v43 }
 0x4a9   :  { %10591 = vmatmul.mubr.msk.f32.gmra.mrb[22].mxu0 %vm329_vm0, %v12462_v41  ;;  %10641 = vmatmul.mubr.msk.f32.gmra.mrb[32].mxu1 %vm329_vm0, %v12462_v41 }
 0x4aa   :  { %10601 = vmatprep.mubr.msk.f32.mxu0 %vm329_vm0, %v12442_v33  ;;  %10662 = vmatprep.mubr.msk.f32.mxu1 %vm329_vm0, %v12442_v33 }
 0x4ad   :  { %10602 = vmatmul.mubr.msk.f32.vlgmr.msra.gmra.mrb[24].mxu0 %vm329_vm0, %v12440_v30  ;;  %10663 = vmatmul.mubr.msk.f32.vlgmr.msra.gmra.mrb[34].mxu1 %vm329_vm0, %v12440_v30 }
 0x4ae   :  { %10604 = vmatprep.mubr.msk.f32.mxu0 %vm329_vm0, %v12466_v43  ;;  %10665 = vmatprep.mubr.msk.f32.mxu1 %vm329_vm0, %v12466_v43 }
 0x4af   :  { %11179 = vmatpush3.bf16.msra.mxu1 %v12460_v39 }
 0x4b0   :  { %11181 = vmatprep.subr.bf16.mxu1 %v12481_v47 }
 0x4b1   :  { %10605 = vmatmul.mubr.msk.f32.gmra.mrb[26].mxu0 %vm329_vm0, %v12462_v41  ;;  %10666 = vmatmul.mubr.msk.f32.gmra.mrb[36].mxu1 %vm329_vm0, %v12462_v41 }
 0x4b2   :  { %10687 = vmatprep.mubr.msk.f32.mxu1 %vm329_vm0, %v12442_v33  ;;  %10615 = vmatprep.mubr.msk.f32.mxu0 %vm329_vm0, %v9904_v38 }
 0x4b3   :  { %11183 = vmatpush3.bf16.msra.mxu1 %v12481_v47 }
 0x4b4   :  { %11193 = vmatprep.subr.bf16.mxu1 %v12493_v51 }
 0x4b6   :  { %10688 = vmatmul.mubr.msk.f32.vlgmr.msra.gmra.mrb[38].mxu1 %vm329_vm0, %v12440_v30 }
 0x4b7   :  { %10690 = vmatprep.mubr.msk.f32.mxu1 %vm329_vm0, %v12466_v43  ;;  %11195 = vmatpush3.bf16.msra.mxu1 %v12493_v51 }
 0x4b8   :  { %11197 = vmatprep.subr.bf16.mxu1 %v12503_v55 }
 0x4ba   :  { %10691 = vmatmul.mubr.msk.f32.gmra.mrb[40].mxu1 %vm329_vm0, %v12462_v41 }
 0x4bb   :  { %11199 = vmatpush3.bf16.msra.mxu1 %v12503_v55  ;;  %10712 = vmatprep.mubr.msk.f32.mxu1 %vm329_vm0, %v12442_v33 }
 0x4bc   :  { %11209 = vmatprep.subr.bf16.mxu1 %v12511_v59 }
 0x4be   :  { %10713 = vmatmul.mubr.msk.f32.vlgmr.msra.gmra.mrb[42].mxu1 %vm329_vm0, %v12440_v30 }
 0x4bf   :  { %10715 = vmatprep.mubr.msk.f32.mxu1 %vm329_vm0, %v12466_v43  ;;  %11211 = vmatpush3.bf16.msra.mxu1 %v12511_v59 }
 0x4c0   :  { %11213 = vmatprep.subr.bf16.mxu1 %v12519_v62 }
 0x4c2   :  { %10716 = vmatmul.mubr.msk.f32.gmra.mrb[44].mxu1 %vm329_vm0, %v12462_v41 }
 0x4c3   :  { %11215 = vmatpush3.bf16.msra.mxu1 %v12519_v62  ;;  %10737 = vmatprep.mubr.msk.f32.mxu1 %vm329_vm0, %v12442_v33 }
 0x4c4   :  { %11225 = vmatprep.subr.bf16.mxu1 %v12527_v5 }
 0x4c6   :  { %10738 = vmatmul.mubr.msk.f32.vlgmr.msra.gmra.mrb[46].mxu1 %vm329_vm0, %v12440_v30 }
 0x4c7   :  { %10740 = vmatprep.mubr.msk.f32.mxu1 %vm329_vm0, %v12466_v43  ;;  %11227 = vmatpush3.bf16.msra.mxu1 %v12527_v5 }
 0x4c8   :  { %11229 = vmatprep.subr.bf16.mxu1 %v12535_v8 }
 0x4ca   :  { %10741 = vmatmul.mubr.msk.f32.gmra.mrb[48].mxu1 %vm329_vm0, %v12462_v41 }
 0x4cb   :  { %11231 = vmatpush3.bf16.msra.mxu1 %v12535_v8  ;;  %10762 = vmatprep.mubr.msk.f32.mxu1 %vm329_vm0, %v12442_v33 }
 0x4cc   :  { %11241 = vmatprep.subr.bf16.mxu1 %v12543_v11 }
 0x4ce   :  { %10763 = vmatmul.mubr.msk.f32.vlgmr.msra.gmra.mrb[50].mxu1 %vm329_vm0, %v12440_v30 }
 0x4cf   :  { %10765 = vmatprep.mubr.msk.f32.mxu1 %vm329_vm0, %v12466_v43  ;;  %11243 = vmatpush3.bf16.msra.mxu1 %v12543_v11 }
 0x4d0   :  { %11245 = vmatprep.subr.bf16.mxu1 %v12551_v1 }
 0x4d2   :  { %10766 = vmatmul.mubr.msk.f32.gmra.mrb[52].mxu1 %vm329_vm0, %v12462_v41 }
 0x4d3   :  { %11247 = vmatpush3.bf16.msra.mxu1 %v12551_v1  ;;  %10787 = vmatprep.mubr.msk.f32.mxu1 %vm329_vm0, %v12442_v33 }
 0x4d4   :  { %10804 = vmatprep.subr.msk.mxu1 %vm735_vm2, %v2670_v2 }
 0x4d6   :  { %10788 = vmatmul.mubr.msk.f32.vlgmr.msra.gmra.mrb[54].mxu1 %vm329_vm0, %v12440_v30 }
 0x4d7   :  { %10790 = vmatprep.mubr.msk.f32.mxu1 %vm329_vm0, %v12466_v43  ;;  %10805 = vmatpush3.msk.msra.mxu1 %vm735_vm2, %v2670_v2  ;;  %v1162_v2 = vld [vmem:[%s13586_s9 + $0x8] sm:$0xff] }
 0x4d8   :  { %11257 = vmatprep.subr.bf16.mxu1 %v12401_v54 }
 0x4da   :  { %10791 = vmatmul.mubr.msk.f32.gmra.mrb[56].mxu1 %vm329_vm0, %v12462_v41 }
 0x4db   :  { %10806 = vmatprep.mubr.msk.f32.mxu1 %vm722_vm3, %v688_v15 }
 0x4de   :  { %10807 = vmatmul.mubr.msk.f32.vlgmr.msra.gmra.mrb[58].mxu1 %vm722_vm3, %v693_v18 }
 0x4df   :  { %10809 = vmatprep.mubr.msk.f32.mxu1 %vm722_vm3, %v698_v21  ;;  %11259 = vmatpush3.bf16.msra.mxu1 %v12401_v54 }
 0x4e0   :  { %11261 = vmatprep.subr.bf16.mxu1 %v12419_v13 }
 0x4e2   :  { %10810 = vmatmul.mubr.msk.f32.gmra.mrb[60].mxu1 %vm722_vm3, %v703_v25  ;;  %v9915_v25 = vld [vmem:[%s13586_s9 + $0x28] sm:$0xff] }
 0x4e3   :  { %11263 = vmatpush3.bf16.msra.mxu1 %v12419_v13 }
 0x574   :  { %v10589_v40 = vpop.f32.mrb[20].mxu0  ;;  %v10639_v42 = vpop.f32.mrb[30].mxu1 }
 0x575   :  { %v1142_v26 = vpop.f32.mrb[21].mxu0  ;;  %v1489_v27 = vpop.f32.mrb[31].mxu1 }
 0x576   :  { %v11136_v28 = vpack.c.bf16 %v10589_v40, %v1142_v26  ;;  %v11152_v29 = vpack.c.bf16 %v10639_v42, %v1489_v27  ;;  %v9922_v40 = vld [vmem:[%s13586_s9 + $0x30] sm:$0xff] }
 0x57c   :  { %v10592_v30 = vpop.f32.mrb[22].mxu0  ;;  %v10642_v33 = vpop.f32.mrb[32].mxu1 }
 0x57d   :  { %v1152_v54 = vpop.f32.mrb[23].mxu0  ;;  %v1499_v36 = vpop.f32.mrb[33].mxu1 }
 0x57e   :  { %v11140_v44 = vpack.c.bf16 %v10592_v30, %v1152_v54  ;;  %v11156_v37 = vpack.c.bf16 %v10642_v33, %v1499_v36  ;;  %v9923_v30 = vld [vmem:[%s13586_s9 + $0x38] sm:$0xff]  ;;  %v9930_v54 = vld [vmem:[%s13586_s9 + $0x40] sm:$0xff] }
 0x580   :  { %v10603_v41 = vpop.f32.mrb[24].mxu0  ;;  %v10664_v43 = vpop.f32.mrb[34].mxu1 }
 0x581   :  { %v1234_v45 = vpop.f32.mrb[25].mxu0  ;;  %v1665_v13 = vpop.f32.mrb[35].mxu1 }
 0x582   :  { %v11128_v46 = vpack.c.bf16 %v10603_v41, %v1234_v45  ;;  %v11168_v48 = vpack.c.bf16 %v10664_v43, %v1665_v13  ;;  %v9931_v45 = vld [vmem:[%s13586_s9 + $0x48] sm:$0xff] }
 0x584   :  { %v10606_v49 = vpop.f32.mrb[26].mxu0  ;;  %11129 = vmatprep.subr.bf16.mxu0 %v11128_v46  ;;  %v10667_v52 = vpop.f32.mrb[36].mxu1 }
 0x585   :  { %v1244_v53 = vpop.f32.mrb[27].mxu0  ;;  %11131 = vmatpush3.bf16.msra.mxu0 %v11128_v46  ;;  %v1675_v56 = vpop.f32.mrb[37].mxu1  ;;  %v9938_v46 = vld [vmem:[%s13586_s9 + $0x50] sm:$0xff] }
 0x586   :  { %v11132_v58 = vpack.c.bf16 %v10606_v49, %v1244_v53  ;;  %v11172_v60 = vpack.c.bf16 %v10667_v52, %v1675_v56 }
 0x588   :  { %11133 = vmatprep.subr.bf16.mxu0 %v11132_v58 }
 0x589   :  { %v10689_v61 = vpop.f32.mrb[38].mxu1  ;;  %11135 = vmatpush3.bf16.msra.mxu0 %v11132_v58  ;;  %v9939_v58 = vld [vmem:[%s13586_s9 + $0x58] sm:$0xff] }
 0x58a   :  { %v1841_v4 = vpop.f32.mrb[39].mxu1  ;;  %11137 = vmatprep.subr.bf16.mxu0 %v11136_v28 }
 0x58b   :  { %v11184_v7 = vpack.c.bf16 %v10689_v61, %v1841_v4  ;;  %v9946_v61 = vld [vmem:[%s13586_s9 + $0x60] sm:$0xff] }
 0x58c   :  { %10616 = vmatmul.mubr.msk.f32.vlgmr.msra.gmra.mrb[28].mxu0 %vm329_vm0, %v9905_v63 }
 0x58d   :  { %v10692_v9 = vpop.f32.mrb[40].mxu1  ;;  %11139 = vmatpush3.bf16.msra.mxu0 %v11136_v28  ;;  %10626 = vmatprep.mubr.msk.f32.mxu0 %vm329_vm0, %v1161_v6  ;;  %v9947_v6 = vld [vmem:[%s13586_s9 + $0x68] sm:$0xff] }
 0x58e   :  { %v1851_v10 = vpop.f32.mrb[41].mxu1  ;;  %11141 = vmatprep.subr.bf16.mxu0 %v11140_v44 }
 0x58f   :  { %v11188_v12 = vpack.c.bf16 %v10692_v9, %v1851_v10  ;;  %v9955_v9 = vld [vmem:[%s13586_s9 + $0x78] sm:$0xff]  ;;  %v9962_v10 = vld [vmem:[%s13586_s9 + $0x80] sm:$0xff] }
 0x591   :  { %v10714_v0 = vpop.f32.mrb[42].mxu1  ;;  %11143 = vmatpush3.bf16.msra.mxu0 %v11140_v44 }
 0x592   :  { %v2017_v3 = vpop.f32.mrb[43].mxu1  ;;  %11153 = vmatprep.subr.bf16.mxu0 %v11152_v29 }
 0x593   :  { %v11200_v15 = vpack.c.bf16 %v10714_v0, %v2017_v3  ;;  %v2660_v0 = vpop.permute.xlu1 %2659  ;;  %v2665_v3 = vld [vmem:[#allocation11 + $0x8] sm:$0xff] }
 0x594   :  { %10627 = vmatmul.mubr.msk.f32.vlgmr.msra.gmra.mrb[28].mxu0 %vm329_vm0, %v1162_v2 }
 0x595   :  { %v10717_v16 = vpop.f32.mrb[44].mxu1  ;;  %11155 = vmatpush3.bf16.msra.mxu0 %v11152_v29  ;;  %10651 = vmatprep.mubr.msk.f32.mxu0 %vm329_vm0, %v9914_v14  ;;  %v2655_v14 = vpop.permute.xlu0 %2654 }
 0x596   :  { %v2027_v18 = vpop.f32.mrb[45].mxu1  ;;  %11157 = vmatprep.subr.bf16.mxu0 %v11156_v37 }
 0x597   :  { %v11204_v21 = vpack.c.bf16 %v10717_v16, %v2027_v18  ;;  %v2664_v18 = vld [vmem:[#allocation11] sm:$0xff] }
 0x599   :  { %v10739_v23 = vpop.f32.mrb[46].mxu1  ;;  %11159 = vmatpush3.bf16.msra.mxu0 %v11156_v37 }
 0x59a   :  { %v2193_v38 = vpop.f32.mrb[47].mxu1  ;;  %11169 = vmatprep.subr.bf16.mxu0 %v11168_v48 }
 0x59b   :  { %v11216_v42 = vpack.c.bf16 %v10739_v23, %v2193_v38 }
 0x59c   :  { %10652 = vmatmul.mubr.msk.f32.vlgmr.msra.gmra.mrb[28].mxu0 %vm329_vm0, %v9915_v25 }
 0x59d   :  { %v10742_v26 = vpop.f32.mrb[48].mxu1  ;;  %11171 = vmatpush3.bf16.msra.mxu0 %v11168_v48  ;;  %10676 = vmatprep.mubr.msk.f32.mxu0 %vm329_vm0, %v9922_v40 }
 0x59e   :  { %v2203_v27 = vpop.f32.mrb[49].mxu1  ;;  %11173 = vmatprep.subr.bf16.mxu0 %v11172_v60 }
 0x59f   :  { %v11220_v28 = vpack.c.bf16 %v10742_v26, %v2203_v27 }
 0x5a1   :  { %v10764_v29 = vpop.f32.mrb[50].mxu1  ;;  %11175 = vmatpush3.bf16.msra.mxu0 %v11172_v60 }
 0x5a2   :  { %v2369_v33 = vpop.f32.mrb[51].mxu1  ;;  %11185 = vmatprep.subr.bf16.mxu0 %v11184_v7 }
 0x5a3   :  { %v11232_v36 = vpack.c.bf16 %v10764_v29, %v2369_v33  ;;  %v2857_v29 = vld [vmem:[#allocation10 + $0x8] sm:$0xff] }
 0x5a4   :  { %10677 = vmatmul.mubr.msk.f32.vlgmr.msra.gmra.mrb[28].mxu0 %vm329_vm0, %v9923_v30  ;;  %v3175_v30 = vld [vmem:[#allocation10 + $0x20] sm:$0xff] }
 0x5a5   :  { %v10767_v44 = vpop.f32.mrb[52].mxu1  ;;  %11187 = vmatpush3.bf16.msra.mxu0 %v11184_v7  ;;  %10701 = vmatprep.mubr.msk.f32.mxu0 %vm329_vm0, %v9930_v54  ;;  %v9954_v7 = vld [vmem:[%s13586_s9 + $0x70] sm:$0xff] }
 0x5a6   :  { %v2379_v37 = vpop.f32.mrb[53].mxu1  ;;  %11189 = vmatprep.subr.bf16.mxu0 %v11188_v12 }
 0x5a7   :  { %v11236_v41 = vpack.c.bf16 %v10767_v44, %v2379_v37  ;;  %v3176_v44 = vld [vmem:[#allocation10 + $0x28] sm:$0xff]  ;;  %v3336_v37 = vld [vmem:[#allocation10 + $0x30] sm:$0xff] }
 0x5a9   :  { %v10789_v43 = vpop.f32.mrb[54].mxu1  ;;  %11191 = vmatpush3.bf16.msra.mxu0 %v11188_v12  ;;  %v9963_v12 = vld [vmem:[%s13586_s9 + $0x88] sm:$0xff] }
 0x5aa   :  { %v2545_v13 = vpop.f32.mrb[55].mxu1  ;;  %11201 = vmatprep.subr.bf16.mxu0 %v11200_v15 }
 0x5ab   :  { %v11248_v48 = vpack.c.bf16 %v10789_v43, %v2545_v13  ;;  %v3337_v13 = vld [vmem:[#allocation10 + $0x38] sm:$0xff] }
 0x5ac   :  { %10702 = vmatmul.mubr.msk.f32.vlgmr.msra.gmra.mrb[28].mxu0 %vm329_vm0, %v9931_v45 }
 0x5ad   :  { %v10792_v49 = vpop.f32.mrb[56].mxu1  ;;  %11203 = vmatpush3.bf16.msra.mxu0 %v11200_v15  ;;  %10726 = vmatprep.mubr.msk.f32.mxu0 %vm329_vm0, %v9938_v46 }
 0x5ae   :  { %v2555_v52 = vpop.f32.mrb[57].mxu1  ;;  %11205 = vmatprep.subr.bf16.mxu0 %v11204_v21 }
 0x5af   :  { %v11252_v53 = vpack.c.bf16 %v10792_v49, %v2555_v52 }
 0x5b1   :  { %v10808_v56 = vpop.f32.mrb[58].mxu1  ;;  %11207 = vmatpush3.bf16.msra.mxu0 %v11204_v21 }
 0x5b2   :  { %v2752_v60 = vpop.f32.mrb[59].mxu1  ;;  %11217 = vmatprep.subr.bf16.mxu0 %v11216_v42 }
 0x5b4   :  { %10727 = vmatmul.mubr.msk.f32.vlgmr.msra.gmra.mrb[28].mxu0 %vm329_vm0, %v9939_v58  ;;  %v3497_v58 = vld [vmem:[#allocation10 + $0x40] sm:$0xff] }
 0x5b5   :  { %v10811_v63 = vpop.f32.mrb[60].mxu1  ;;  %11219 = vmatpush3.bf16.msra.mxu0 %v11216_v42  ;;  %10751 = vmatprep.mubr.msk.f32.mxu0 %vm329_vm0, %v9946_v61 }
 0x5b6   :  { %v2762_v4 = vpop.f32.mrb[61].mxu1  ;;  %11221 = vmatprep.subr.bf16.mxu0 %v11220_v28 }
 0x5b9   :  { %11223 = vmatpush3.bf16.msra.mxu0 %v11220_v28 }
 0x5ba   :  { %11233 = vmatprep.subr.bf16.mxu0 %v11232_v36 }
 0x5bc   :  { %10752 = vmatmul.mubr.msk.f32.vlgmr.msra.gmra.mrb[28].mxu0 %vm329_vm0, %v9947_v6  ;;  %v3819_v6 = vld [vmem:[#allocation10 + $0x60] sm:$0xff] }
 0x5bd   :  { %11235 = vmatpush3.bf16.msra.mxu0 %v11232_v36  ;;  %10776 = vmatprep.mubr.msk.f32.mxu0 %vm329_vm0, %v9954_v7  ;;  %v3820_v7 = vld [vmem:[#allocation10 + $0x68] sm:$0xff] }
 0x5be   :  { %11237 = vmatprep.subr.bf16.mxu0 %v11236_v41 }
 0x5c1   :  { %11239 = vmatpush3.bf16.msra.mxu0 %v11236_v41 }
 0x5c2   :  { %11249 = vmatprep.subr.bf16.mxu0 %v11248_v48 }
 0x5c4   :  { %10777 = vmatmul.mubr.msk.f32.vlgmr.msra.gmra.mrb[28].mxu0 %vm329_vm0, %v9955_v9  ;;  %v3980_v9 = vld [vmem:[#allocation10 + $0x70] sm:$0xff] }
 0x5c5   :  { %11251 = vmatpush3.bf16.msra.mxu0 %v11248_v48  ;;  %10801 = vmatprep.mubr.msk.f32.mxu0 %vm329_vm0, %v9962_v10  ;;  %v3981_v10 = vld [vmem:[#allocation10 + $0x78] sm:$0xff] }
 0x5c6   :  { %11253 = vmatprep.subr.bf16.mxu0 %v11252_v53 }
 0x5c9   :  { %11255 = vmatpush3.bf16.msra.mxu0 %v11252_v53 }
 0x5ca   :  { %11265 = vmatprep.subr.bf16.mxu0 %v12428_v17 }
 0x5cc   :  { %10802 = vmatmul.mubr.msk.f32.vlgmr.msra.gmra.mrb[28].mxu0 %vm329_vm0, %v9963_v12  ;;  %v4141_v12 = vld [vmem:[#allocation10 + $0x80] sm:$0xff] }
 0x5cd   :  { %11267 = vmatpush3.bf16.msra.mxu0 %v12428_v17 }
 0x5ce   :  { %11269 = vmatprep.subr.bf16.mxu0 %v12444_v34 }
 0x5d1   :  { %11271 = vmatpush3.bf16.msra.mxu0 %v12444_v34 }
 0x5d2   :  { %11281 = vmatprep.subr.bf16.mxu0 %v12395_v50 }
 0x69f   :  { %v10803_v2 = vpop.f32.mrb[28].mxu0 }
 0x6a0   :  { %v2663_v15 = vadd.f32 %v10803_v2, %v2660_v0  ;;  %v2639_v16 = vpop.f32.mrb[29].mxu0  ;;  %v4242_v0 = vld [vmem:[#allocation14] sm:$0xff]  ;;  %v4243_v2 = vld [vmem:[#allocation14 + $0x8] sm:$0xff] }
 0x6a1   :  { %v2662_v21 = vadd.f32 %v2655_v14, %v2639_v16  ;;  %v4142_v16 = vld [vmem:[#allocation10 + $0x88] sm:$0xff] }
 0x6a2   :  { %v2667_v23 = vadd.f32 %v2665_v3, %v2663_v15  ;;  %v11364_v3 = vpack.c.bf16 %v4243_v2, %v4242_v0 }
 0x6a3   :  { %v2666_v25 = vadd.f32 %v2664_v18, %v2662_v21  ;;  %v4245_v18 = vld [vmem:[#allocation14 + $0x18] sm:$0xff] }
 0x6a4   :  { %v2669_v38 = vmax.f32 %v2667_v23, 0.0  ;;  %v4236_v23 = vpop.permute.xlu1 %4235 }
 0x6a5   :  { %v2668_v40 = vmax.f32 %v2666_v25, 0.0 }
 0x6a6   :  { %v2772_v42 = vmul.f32 %v10808_v56, %v2669_v38  ;;  %v4231_v38 = vpop.permute.xlu0 %4230 }
 0x6a7   :  { %v2771_v17 = vmul.f32 %v2752_v60, %v2668_v40 }
 0x6a8   :  { %v12625_v26 = vadd.f32 %v10811_v63, %v2772_v42  ;;  %v3498_v63 = vld [vmem:[#allocation10 + $0x48] sm:$0xff] }
 0x6a9   :  { %v12627_v27 = vadd.f32 %v2771_v17, %v2762_v4  ;;  %v3658_v4 = vld [vmem:[#allocation10 + $0x50] sm:$0xff] }
 0x6ab   :  { %10820 = vmatprep.mubr.msk.f32.mxu1 %vm329_vm0, %v12627_v27  ;;  %10831 = vmatprep.mubr.msk.f32.mxu0 %vm329_vm0, %v12627_v27 }
 0x6ac   :  { %10821 = vmatmul.mubr.msk.f32.vlgmr.msra.gmra.mrb[62].mxu1 %vm329_vm0, %v12625_v26  ;;  %10832 = vmatmul.mubr.msk.f32.vlgmr.msra.gmra.mrb[30].mxu0 %vm329_vm0, %v12625_v26 }
 0x6ad   :  { %11283 = vmatpush3.bf16.msra.mxu0 %v12395_v50  ;;  %10856 = vmatprep.mubr.msk.f32.mxu0 %vm329_vm0, %v12627_v27  ;;  %v2934_v50 = vld [vmem:[#allocation10 + $0x10] sm:$0xff] }
 0x6ae   :  { %11285 = vmatprep.subr.bf16.mxu0 %v12406_v57  ;;  %10838 = vmatprep.mubr.msk.f32.mxu1 %vm2936_vm5, %v2934_v50 }
 0x6b1   :  { %11287 = vmatpush3.bf16.msra.mxu0 %v12406_v57 }
 0x6b2   :  { %11293 = vmatprep.subr.bf16.mxu0 %v12430_v19 }
 0x6b4   :  { %10857 = vmatmul.mubr.msk.f32.vlgmr.msra.gmra.mrb[32].mxu0 %vm329_vm0, %v12625_v26 }
 0x6b5   :  { %11295 = vmatpush3.bf16.msra.mxu0 %v12430_v19  ;;  %10874 = vmatprep.mubr.msk.f32.mxu0 %vm329_vm0, %v12627_v27 }
 0x6b6   :  { %11297 = vmatprep.subr.bf16.mxu0 %v12446_v35 }
 0x6b9   :  { %11299 = vmatpush3.bf16.msra.mxu0 %v12446_v35 }
 0x6ba   :  { %11317 = vmatprep.subr.bf16.mxu0 %v12493_v51 }
 0x6bc   :  { %10875 = vmatmul.mubr.msk.f32.vlgmr.msra.gmra.mrb[34].mxu0 %vm329_vm0, %v12625_v26 }
 0x6bd   :  { %11319 = vmatpush3.bf16.msra.mxu0 %v12493_v51  ;;  %10910 = vmatprep.mubr.msk.f32.mxu0 %vm329_vm0, %v12627_v27 }
 0x6be   :  { %11321 = vmatprep.subr.bf16.mxu0 %v12503_v55 }
 0x6c1   :  { %11323 = vmatpush3.bf16.msra.mxu0 %v12503_v55 }
 0x6c2   :  { %11329 = vmatprep.subr.bf16.mxu0 %v12511_v59 }
 0x6c4   :  { %10911 = vmatmul.mubr.msk.f32.vlgmr.msra.gmra.mrb[36].mxu0 %vm329_vm0, %v12625_v26 }
 0x6c5   :  { %11331 = vmatpush3.bf16.msra.mxu0 %v12511_v59  ;;  %10928 = vmatprep.mubr.msk.f32.mxu0 %vm329_vm0, %v12627_v27  ;;  %v2935_v59 = vld [vmem:[#allocation10 + $0x18] sm:$0xff] }
 0x6c6   :  { %11333 = vmatprep.subr.bf16.mxu0 %v12519_v62 }
 0x6c9   :  { %11335 = vmatpush3.bf16.msra.mxu0 %v12519_v62  ;;  %v2856_v62 = vld [vmem:[#allocation10] sm:$0xff] }
 0x6ca   :  { %11341 = vmatprep.subr.bf16.mxu0 %v12527_v5 }
 0x6cc   :  { %10929 = vmatmul.mubr.msk.f32.vlgmr.msra.gmra.mrb[38].mxu0 %vm329_vm0, %v12625_v26 }
 0x6cd   :  { %11343 = vmatpush3.bf16.msra.mxu0 %v12527_v5  ;;  %10946 = vmatprep.mubr.msk.f32.mxu0 %vm329_vm0, %v12627_v27 }
 0x6ce   :  { %11345 = vmatprep.subr.bf16.mxu0 %v12535_v8 }
 0x6d1   :  { %11347 = vmatpush3.bf16.msra.mxu0 %v12535_v8 }
 0x6d2   :  { %11365 = vmatprep.subr.bf16.mxu0 %v11364_v3 }
 0x6d4   :  { %10947 = vmatmul.mubr.msk.f32.vlgmr.msra.gmra.mrb[40].mxu0 %vm329_vm0, %v12625_v26 }
 0x6d5   :  { %11367 = vmatpush3.bf16.msra.mxu0 %v11364_v3 }
 0x77f   :  { %v10822_v57 = vpop.f32.mrb[62].mxu1  ;;  %v10833_v19 = vpop.f32.mrb[30].mxu0 }
 0x780   :  { %v2847_v34 = vpop.f32.mrb[63].mxu1  ;;  %v2924_v35 = vpop.f32.mrb[31].mxu0 }
 0x781   :  { %v11276_v51 = vpack.c.bf16 %v10822_v57, %v2847_v34  ;;  %v11272_v55 = vpack.c.bf16 %v10833_v19, %v2924_v35  ;;  %v459_v35 = vld [vmem:[%s13582_s24 + $0x68] sm:$0xff] }
 0x783   :  { %11273 = vmatprep.subr.bf16.mxu1 %v11272_v55 }
 0x784   :  { %11275 = vmatpush3.bf16.msra.mxu1 %v11272_v55  ;;  %v5112_v55 = vld [vmem:[%s13587_s10] sm:$0xff] }
 0x785   :  { %11277 = vmatprep.subr.bf16.mxu1 %v11276_v51 }
 0x787   :  { %v10858_v5 = vpop.f32.mrb[32].mxu0  ;;  %10839 = vmatmul.mubr.msk.f32.vlgmr.msra.gmra.mrb[64].mxu1 %vm2936_vm5, %v2935_v59 }
 0x788   :  { %v3165_v8 = vpop.f32.mrb[33].mxu0  ;;  %11279 = vmatpush3.bf16.msra.mxu1 %v11276_v51  ;;  %10845 = vmatprep.mubr.msk.f32.mxu1 %vm2936_vm5, %v2856_v62  ;;  %v458_v51 = vld [vmem:[%s13582_s24 + $0x60] sm:$0xff] }
 0x789   :  { %v11288_v28 = vpack.c.bf16 %v10858_v5, %v3165_v8 }
 0x78b   :  { %11289 = vmatprep.subr.bf16.mxu1 %v11288_v28 }
 0x78f   :  { %v10876_v33 = vpop.f32.mrb[34].mxu0  ;;  %10846 = vmatmul.mubr.msk.f32.vlgmr.msra.gmra.mrb[64].mxu1 %vm2936_vm5, %v2857_v29 }
 0x790   :  { %11291 = vmatpush3.bf16.msra.mxu1 %v11288_v28  ;;  %v3326_v54 = vpop.f32.mrb[35].mxu0  ;;  %10863 = vmatprep.mubr.msk.f32.mxu1 %vm2936_vm5, %v3175_v30 }
 0x791   :  { %v11300_v36 = vpack.c.bf16 %v10876_v33, %v3326_v54 }
 0x793   :  { %11301 = vmatprep.subr.bf16.mxu1 %v11300_v36 }
 0x797   :  { %v10912_v41 = vpop.f32.mrb[36].mxu0  ;;  %10864 = vmatmul.mubr.msk.f32.vlgmr.msra.gmra.mrb[64].mxu1 %vm2936_vm5, %v3176_v44 }
 0x798   :  { %11303 = vmatpush3.bf16.msra.mxu1 %v11300_v36  ;;  %v3648_v43 = vpop.f32.mrb[37].mxu0  ;;  %10881 = vmatprep.mubr.msk.f32.mxu1 %vm2936_vm5, %v3336_v37 }
 0x799   :  { %v11324_v45 = vpack.c.bf16 %v10912_v41, %v3648_v43  ;;  %11305 = vmatprep.subr.bf16.mxu1 %v12460_v39 }
 0x79f   :  { %v10930_v46 = vpop.f32.mrb[38].mxu0  ;;  %10882 = vmatmul.mubr.msk.f32.vlgmr.msra.gmra.mrb[64].mxu1 %vm2936_vm5, %v3337_v13  ;;  %v4331_v13 = vld [vmem:[%s13588_s12] sm:$0xff] }
 0x7a0   :  { %11307 = vmatpush3.bf16.msra.mxu1 %v12460_v39  ;;  %v3809_v48 = vpop.f32.mrb[39].mxu0  ;;  %10892 = vmatprep.mubr.msk.f32.mxu1 %vm329_vm0, %v12627_v27 }
 0x7a1   :  { %v11336_v49 = vpack.c.bf16 %v10930_v46, %v3809_v48  ;;  %11309 = vmatprep.subr.bf16.mxu1 %v12481_v47 }
 0x7a4   :  { %11311 = vmatpush3.bf16.msra.mxu1 %v12481_v47  ;;  %v3659_v47 = vld [vmem:[#allocation10 + $0x58] sm:$0xff] }
 0x7a7   :  { %10893 = vmatmul.mubr.msk.f32.vlgmr.msra.gmra.mrb[66].mxu1 %vm329_vm0, %v12625_v26  ;;  %v10948_v52 = vpop.f32.mrb[40].mxu0 }
 0x7a8   :  { %v3970_v53 = vpop.f32.mrb[41].mxu0  ;;  %10899 = vmatprep.mubr.msk.f32.mxu1 %vm2936_vm5, %v3497_v58  ;;  %v10014_v58 = vld [vmem:[%s13588_s12 + $0x10] sm:$0xff] }
 0x7a9   :  { %v11348_v56 = vpack.c.bf16 %v10948_v52, %v3970_v53 }
 0x87a   :  { %v10894_v60 = vpop.f32.mrb[66].mxu1 }
 0x87b   :  { %v3487_v39 = vpop.f32.mrb[67].mxu1 }
 0x87c   :  { %v11312_v61 = vpack.c.bf16 %v10894_v60, %v3487_v39  ;;  %v10017_v60 = vld [vmem:[%s13588_s12 + $0x18] sm:$0xff] }
 0x87e   :  { %11313 = vmatprep.subr.bf16.mxu1 %v11312_v61 }
 0x87f   :  { %11315 = vmatpush3.bf16.msra.mxu1 %v11312_v61 }
 0x880   :  { %11325 = vmatprep.subr.bf16.mxu1 %v11324_v45 }
 0x882   :  { %10900 = vmatmul.mubr.msk.f32.vlgmr.msra.gmra.mrb[64].mxu1 %vm2936_vm5, %v3498_v63 }
 0x883   :  { %11327 = vmatpush3.bf16.msra.mxu1 %v11324_v45  ;;  %10917 = vmatprep.mubr.msk.f32.mxu1 %vm2936_vm5, %v3658_v4  ;;  %v10011_v45 = vld [vmem:[%s13588_s12 + $0x8] sm:$0xff] }
 0x884   :  { %11337 = vmatprep.subr.bf16.mxu1 %v11336_v49 }
 0x88a   :  { %10918 = vmatmul.mubr.msk.f32.vlgmr.msra.gmra.mrb[64].mxu1 %vm2936_vm5, %v3659_v47 }
 0x88b   :  { %11339 = vmatpush3.bf16.msra.mxu1 %v11336_v49  ;;  %10935 = vmatprep.mubr.msk.f32.mxu1 %vm2936_vm5, %v3819_v6 }
 0x88c   :  { %11349 = vmatprep.subr.bf16.mxu1 %v11348_v56 }
 0x892   :  { %10936 = vmatmul.mubr.msk.f32.vlgmr.msra.gmra.mrb[64].mxu1 %vm2936_vm5, %v3820_v7 }
 0x893   :  { %11351 = vmatpush3.bf16.msra.mxu1 %v11348_v56  ;;  %10953 = vmatprep.mubr.msk.f32.mxu1 %vm2936_vm5, %v3980_v9  ;;  %v10020_v9 = vld [vmem:[%s13588_s12 + $0x20] sm:$0xff] }
 0x894   :  { %11353 = vmatprep.subr.bf16.mxu1 %v12543_v11 }
 0x89a   :  { %10954 = vmatmul.mubr.msk.f32.vlgmr.msra.gmra.mrb[64].mxu1 %vm2936_vm5, %v3981_v10  ;;  %v10022_v10 = vld [vmem:[%s13588_s12 + $0x28] sm:$0xff] }
 0x89b   :  { %11355 = vmatpush3.bf16.msra.mxu1 %v12543_v11  ;;  %10964 = vmatprep.mubr.msk.f32.mxu1 %vm329_vm0, %v12627_v27 }
 0x89c   :  { %11357 = vmatprep.subr.bf16.mxu1 %v12551_v1 }
 0x89f   :  { %11359 = vmatpush3.bf16.msra.mxu1 %v12551_v1  ;;  %v4244_v1 = vld [vmem:[#allocation14 + $0x10] sm:$0xff] }
 0x8a0   :  { %v11368_v21 = vpack.c.bf16 %v4245_v18, %v4244_v1  ;;  %v10031_v1 = vld [vmem:[%s13588_s12 + $0x40] sm:$0xff] }
 0x8a2   :  { %10965 = vmatmul.mubr.msk.f32.vlgmr.msra.gmra.mrb[68].mxu1 %vm329_vm0, %v12625_v26  ;;  %11369 = vmatprep.subr.bf16.mxu0 %v11368_v21 }
 0x8a3   :  { %10971 = vmatprep.mubr.msk.f32.mxu1 %vm2936_vm5, %v4141_v12  ;;  %11371 = vmatpush3.bf16.msra.mxu0 %v11368_v21 }
 0x8a4   :  { %11372 = vmatprep.subr.bf16.mxu0 %v11988_v31 }
 0x975   :  { %v10966_v14 = vpop.f32.mrb[68].mxu1 }
 0x976   :  { %v4131_v11 = vpop.f32.mrb[69].mxu1 }
 0x977   :  { %v11360_v15 = vpack.c.bf16 %v10966_v14, %v4131_v11  ;;  %v5122_v14 = vld [vmem:[#allocation16] sm:$0x3]  ;;  %v10025_v11 = vld [vmem:[%s13588_s12 + $0x30] sm:$0xff] }
 0x979   :  { %11361 = vmatprep.subr.bf16.mxu1 %v11360_v15 }
 0x97a   :  { %11363 = vmatpush3.bf16.msra.mxu1 %v11360_v15  ;;  %v10028_v15 = vld [vmem:[%s13588_s12 + $0x38] sm:$0xff] }
 0x97b   :  { %11375 = vmatprep.subr.bf16.mxu1 %v11988_v31 }
 0x97d   :  { %10972 = vmatmul.mubr.msk.f32.vlgmr.msra.gmra.mrb[64].mxu1 %vm2936_vm5, %v4142_v16 }
 0x97e   :  { %10996 = vmatprep.mubr.msk.f32.mxu1 %vm11989_vm1, %v11990_v32 }
 0xa50   :  { %v10973_v25 = vpop.f32.mrb[64].mxu1 }
 0xa51   :  { %v4239_v40 = vadd.f32 %v10973_v25, %v4236_v23  ;;  %v4215_v42 = vpop.f32.mrb[65].mxu1  ;;  %v12788_v25 = vld [vmem:[#allocation19] ss:$0 sm:$0xff] }
 0xa52   :  { %v4238_v17 = vadd.f32 %v4231_v38, %v4215_v42  ;;  %v12790_v38 = vld [vmem:[#allocation19 + $0x1] ss:$0 sm:$0xff] }
 0xa53   :  { %v4241_v27 = vmax.f32 %v4239_v40, 0.0 }
 0xa54   :  { %v4240_v26 = vmax.f32 %v4238_v17, 0.0 }
 0xa56   :  { %10982 = vmatprep.mubr.msk.f32.mxu0 %vm329_vm0, %v4240_v26 }
 0xa57   :  { %10983 = vmatmul.mubr.msk.f32.vlgmr.msra.gmra.mrb[42].mxu0 %vm329_vm0, %v4241_v27 }
 0xa58   :  { %10989 = vmatprep.mubr.msk.f32.mxu0 %vm11989_vm1, %v11990_v32 }
 0xb2a   :  { %v12718_v50 = vpop.f32.mrb[42].mxu0 }
 0xb2b   :  { %v12720_v57 = vpop.f32.mrb[43].mxu0 }
 0xb2c   :  { %v11568_v19 = vpack.i.bf16 %v12718_v50, %v12720_v57  ;;  %v11385_v34 = vpack.c.bf16 %v12718_v50, %v12720_v57  ;;  %v12796_v50 = vld [vmem:[#allocation19 + $0x3] ss:$0 sm:$0xff] }
 0xb2e   :  { %11569 = vrot.lane.b32.xlu1 %v11568_v19, %s11975_s28  ;;  %11564 = vrot.lane.b32.xlu0 %v11568_v19, %s11991_s7 }
 0xb32   :  { %11579 = vrot.lane.b32.xlu1 %v11568_v19, %s11985_s20  ;;  %11574 = vrot.lane.b32.xlu0 %v11568_v19, %s11992_s0 }
 0xb36   :  { %11589 = vrot.lane.b32.xlu1 %v11568_v19, %s11993_s29  ;;  %11584 = vrot.lane.b32.xlu0 %v11568_v19, %s11994_s11 }
 0xb3a   :  { %11599 = vrot.lane.b32.xlu1 %v11568_v19, %s11995_s19  ;;  %11594 = vrot.lane.b32.xlu0 %v11568_v19, %s11996_s15 }
 0xb3e   :  { %528 = vperm.xlu1 %11562, %v459_v35   ;;  %523 = vperm.xlu0 %11561, %v458_v51  }
 0xb42   :  { %5115 = vperm.xlu0 %11561, %v5112_v55  }
 0xba0   :  { %v11570_v59 = vpop.permute.xlu1 %11569  ;;  %v11565_v62 = vpop.permute.xlu0 %11564 }
 0xba1   :  { %v11572_v5 = vunpack.i.h.bf16 %v11570_v59  ;;  %v11571_v8 = vunpack.i.l.bf16 %v11570_v59  ;;  %v11567_v28 = vunpack.i.h.bf16 %v11565_v62  ;;  %v11566_v29 = vunpack.i.l.bf16 %v11565_v62  ;;  %v12800_v62 = vld [vmem:[#allocation19 + $0x5] ss:$0 sm:$0xff] }
 0xba3   :  { %v11376_v30 = vpack.c.bf16 %v11572_v5, %v11571_v8  ;;  %v11373_v33 = vpack.c.bf16 %v11567_v28, %v11566_v29 }
 0xba4   :  { %v11580_v54 = vpop.permute.xlu1 %11579  ;;  %v11575_v36 = vpop.permute.xlu0 %11574 }
 0xba5   :  { %v11582_v44 = vunpack.i.h.bf16 %v11580_v54  ;;  %v11581_v37 = vunpack.i.l.bf16 %v11580_v54  ;;  %v11577_v41 = vunpack.i.h.bf16 %v11575_v36  ;;  %v11576_v43 = vunpack.i.l.bf16 %v11575_v36  ;;  %11374 = vmatpush3.bf16.msra.mxu0 %v11373_v33  ;;  %11377 = vmatpush3.bf16.msra.mxu1 %v11376_v30  ;;  %v12803_v36 = vld [vmem:[#allocation19 + $0x6] ss:$0 sm:$0xff] }
 0xba6   :  { %11381 = vmatprep.subr.bf16.mxu1 %v11988_v31  ;;  %11378 = vmatprep.subr.bf16.mxu0 %v11988_v31 }
 0xba7   :  { %v11382_v46 = vpack.c.bf16 %v11582_v44, %v11581_v37  ;;  %v11379_v48 = vpack.c.bf16 %v11577_v41, %v11576_v43  ;;  %v12805_v44 = vld [vmem:[#allocation19 + $0x7] ss:$0 sm:$0xff] }
 0xba8   :  { %v11590_v49 = vpop.permute.xlu1 %11589  ;;  %10997 = vmatmul.mubr.msk.f32.vlgmr.msra.gmra.mrb[70].mxu1 %vm2936_vm5, %v10011_v45  ;;  %v11585_v52 = vpop.permute.xlu0 %11584  ;;  %10990 = vmatmul.mubr.msk.f32.vlgmr.msra.gmra.mrb[44].mxu0 %vm2936_vm5, %v4331_v13 }
 0xba9   :  { %v11587_v53 = vunpack.i.h.bf16 %v11585_v52  ;;  %v11586_v56 = vunpack.i.l.bf16 %v11585_v52  ;;  %11380 = vmatpush3.bf16.msra.mxu0 %v11379_v48  ;;  %11383 = vmatpush3.bf16.msra.mxu1 %v11382_v46  ;;  %v11592_v39 = vunpack.i.h.bf16 %v11590_v49  ;;  %v11591_v61 = vunpack.i.l.bf16 %v11590_v49  ;;  %v12809_v52 = vld [vmem:[#allocation19 + $0x8] ss:$0 sm:$0xff] }
 0xbaa   :  { %11003 = vmatprep.mubr.msk.f32.mxu0 %vm11989_vm1, %v11990_v32  ;;  %11010 = vmatprep.mubr.msk.f32.mxu1 %vm11989_vm1, %v11990_v32 }
 0xbab   :  { %v11388_v63 = vpack.c.bf16 %v11587_v53, %v11586_v56  ;;  %11387 = vmatprep.subr.bf16.mxu1 %v11988_v31  ;;  %11384 = vmatprep.subr.bf16.mxu0 %v11988_v31  ;;  %v11391_v12 = vpack.c.bf16 %v11592_v39, %v11591_v61 }
 0xbac   :  { %v11600_v4 = vpop.permute.xlu1 %11599  ;;  %v11595_v47 = vpop.permute.xlu0 %11594  ;;  %11004 = vmatmul.mubr.msk.f32.vlgmr.msra.gmra.mrb[46].mxu0 %vm2936_vm5, %v10014_v58  ;;  %11011 = vmatmul.mubr.msk.f32.vlgmr.msra.gmra.mrb[72].mxu1 %vm2936_vm5, %v10017_v60 }
 0xbad   :  { %v11597_v6 = vunpack.i.h.bf16 %v11595_v47  ;;  %v11596_v7 = vunpack.i.l.bf16 %v11595_v47  ;;  %11386 = vmatpush3.bf16.msra.mxu0 %v11385_v34  ;;  %11389 = vmatpush3.bf16.msra.mxu1 %v11388_v63  ;;  %v11602_v0 = vunpack.i.h.bf16 %v11600_v4  ;;  %v11601_v2 = vunpack.i.l.bf16 %v11600_v4  ;;  %v5119_v4 = vld [vmem:[#allocation17] sm:$0xff] }
 0xbae   :  { %11017 = vmatprep.mubr.msk.f32.mxu0 %vm11989_vm1, %v11990_v32  ;;  %11024 = vmatprep.mubr.msk.f32.mxu1 %vm11989_vm1, %v11990_v32 }
 0xbaf   :  { %v11394_v3 = vpack.c.bf16 %v11597_v6, %v11596_v7  ;;  %11390 = vmatprep.subr.bf16.mxu0 %v11988_v31  ;;  %11393 = vmatprep.subr.bf16.mxu1 %v11988_v31  ;;  %v11397_v16 = vpack.c.bf16 %v11602_v0, %v11601_v2  ;;  %v5915_v2 = vld [vmem:[%s13589_s16] sm:$0xff] }
 0xbb0   :  { %11018 = vmatmul.mubr.msk.f32.vlgmr.msra.gmra.mrb[48].mxu0 %vm2936_vm5, %v10020_v9  ;;  %11025 = vmatmul.mubr.msk.f32.vlgmr.msra.gmra.mrb[74].mxu1 %vm2936_vm5, %v10022_v10 }
 0xbb1   :  { %11392 = vmatpush3.bf16.msra.mxu0 %v11391_v12  ;;  %11395 = vmatpush3.bf16.msra.mxu1 %v11394_v3  ;;  %v5211_v3 = vld [vmem:[%s13590_s18] sm:$0xff] }
 0xbb2   :  { %11031 = vmatprep.mubr.msk.f32.mxu0 %vm11989_vm1, %v11990_v32  ;;  %11038 = vmatprep.mubr.msk.f32.mxu1 %vm11989_vm1, %v11990_v32 }
 0xbb3   :  { %11396 = vmatprep.subr.bf16.mxu0 %v11988_v31  ;;  %11048 = vmatprep.subr.msk.mxu1 %vm735_vm2, %v5122_v14 }
 0xbb4   :  { %11032 = vmatmul.mubr.msk.f32.vlgmr.msra.gmra.mrb[50].mxu0 %vm2936_vm5, %v10025_v11  ;;  %11039 = vmatmul.mubr.msk.f32.vlgmr.msra.gmra.mrb[76].mxu1 %vm2936_vm5, %v10028_v15 }
 0xbb5   :  { %11398 = vmatpush3.bf16.msra.mxu0 %v11397_v16  ;;  %11045 = vmatprep.mubr.msk.f32.mxu0 %vm11989_vm1, %v11990_v32  ;;  %v10040_v16 = vld [vmem:[%s13590_s18 + $0x10] sm:$0xff] }
 0xbb6   :  { %11049 = vmatpush3.msk.msra.mxu1 %vm735_vm2, %v5122_v14  ;;  %11053 = vmatprep.subr.mxu0 %v11990_v32  ;;  %v10038_v14 = vld [vmem:[%s13590_s18 + $0x8] sm:$0xff] }
 0xbb7   :  { %11058 = vmatprep.subr.mxu1 %v11990_v32 }
 0xbb8   :  { %11046 = vmatmul.mubr.msk.f32.vlgmr.msra.gmra.mrb[52].mxu0 %vm2936_vm5, %v10031_v1 }
 0xbb9   :  { %11055 = vmatprep.mubr.msk.f32.mxu0 %vm11989_vm1, %v11990_v32 }
 0xbbd   :  { %v529_v31 = vpop.permute.xlu1 %528  ;;  %v524_v18 = vpop.permute.xlu0 %523 }
 0xbbe   :  { %v713_v21 = vadd.f32 %v12436_v22, %v529_v31  ;;  %v708_v23 = vadd.f32 %v12434_v20, %v524_v18  ;;  %v12794_v20 = vld [vmem:[#allocation19 + $0x2] ss:$0 sm:$0xff] }
 0xbbf   :  { %v10042_v18 = vld [vmem:[%s13590_s18 + $0x18] sm:$0xff] }
 0xbc0   :  { %11050 = vmatprep.mubr.msk.f32.mxu1 %vm722_vm3, %v708_v23 }
 0xbc1   :  { %11051 = vmatmul.mubr.msk.f32.vlgmr.msra.gmra.mrb[78].mxu1 %vm722_vm3, %v713_v21  ;;  %v5116_v63 = vpop.permute.xlu0 %5115  ;;  %v10044_v21 = vld [vmem:[%s13590_s18 + $0x20] sm:$0xff] }
 0xbc2   :  { %11060 = vmatprep.mubr.msk.f32.mxu1 %vm11989_vm1, %v11990_v32 }
 0xc7b   :  { %v4401_v40 = vpop.f32.mrb[44].mxu0  ;;  %v4488_v42 = vpop.f32.mrb[70].mxu1 }
 0xc7c   :  { %v4412_v17 = vmul.f32 %v12788_v25, %v4401_v40  ;;  %v4500_v26 = vmul.f32 %v12790_v38, %v4488_v42  ;;  %v10991_v22 = vpop.f32.mrb[45].mxu0  ;;  %v10998_v27 = vpop.f32.mrb[71].mxu1  ;;  %v10046_v42 = vld [vmem:[%s13590_s18 + $0x28] sm:$0xff] }
 0xc7e   :  { %v4501_v57 = vadd.f32 %v4500_v26, %v4412_v17 }
 0xc7f   :  { %v4577_v19 = vpop.f32.mrb[46].mxu0  ;;  %v4666_v34 = vpop.f32.mrb[72].mxu1 }
 0xc80   :  { %v4589_v35 = vmul.f32 %v12794_v20, %v4577_v19  ;;  %v11005_v51 = vpop.f32.mrb[47].mxu0  ;;  %v4678_v55 = vmul.f32 %v12796_v50, %v4666_v34  ;;  %v11012_v59 = vpop.f32.mrb[73].mxu1  ;;  %v10048_v34 = vld [vmem:[%s13590_s18 + $0x30] sm:$0xff] }
 0xc82   :  { %v4590_v5 = vadd.f32 %v4589_v35, %v4501_v57 }
 0xc83   :  { %v4751_v8 = vpop.f32.mrb[48].mxu0  ;;  %v4831_v28 = vpop.f32.mrb[74].mxu1 }
 0xc84   :  { %v4679_v29 = vadd.f32 %v4678_v55, %v4590_v5  ;;  %v11019_v30 = vpop.f32.mrb[49].mxu0  ;;  %v4843_v33 = vmul.f32 %v12800_v62, %v4831_v28  ;;  %v11026_v54 = vpop.f32.mrb[75].mxu1  ;;  %v10050_v5 = vld [vmem:[%s13590_s18 + $0x38] sm:$0xff] }
 0xc86   :  { %v4755_v37 = vadd.f32 %v4751_v8, %v4679_v29 }
 0xc87   :  { %v4920_v41 = vpop.f32.mrb[50].mxu0  ;;  %v5009_v43 = vpop.f32.mrb[76].mxu1 }
 0xc88   :  { %v4844_v45 = vadd.f32 %v4843_v33, %v4755_v37  ;;  %v4932_v13 = vmul.f32 %v12803_v36, %v4920_v41  ;;  %v11033_v46 = vpop.f32.mrb[51].mxu0  ;;  %v5021_v48 = vmul.f32 %v12805_v44, %v5009_v43  ;;  %v11040_v49 = vpop.f32.mrb[77].mxu1 }
 0xc8a   :  { %v4933_v53 = vadd.f32 %v4932_v13, %v4844_v45  ;;  %v10052_v13 = vld [vmem:[%s13590_s18 + $0x40] sm:$0xff] }
 0xc8b   :  { %v5098_v56 = vpop.f32.mrb[52].mxu0 }
 0xc8c   :  { %v5022_v58 = vadd.f32 %v5021_v48, %v4933_v53  ;;  %v5110_v60 = vmul.f32 %v12809_v52, %v5098_v56  ;;  %v11047_v39 = vpop.f32.mrb[53].mxu0 }
 0xc8e   :  { %v5111_v61 = vadd.f32 %v5110_v60, %v5022_v58 }
 0xc90   :  { %v5118_v47 = vadd.f32 %v5116_v63, %v5111_v61 }
 0xc92   :  { %v5120_v6 = vadd.f32 %v5119_v4, %v5118_v47 }
 0xc94   :  { %v11052_v7 = vpop.f32.mrb[78].mxu1  ;;  %v5121_v9 = vmax.f32 %v5120_v6, 0.0 }
 0xc95   :  { %v5198_v10 = vpop.f32.mrb[79].mxu1 }
 0xc96   :  { %v5207_v12 = vmul.f32 %v5198_v10, %v5121_v9 }
 0xc98   :  { %v5208_v0 = vadd.f32 %v11052_v7, %v5207_v12 }
 0xc9a   :  { %5286 = vrot.lane.b32.xlu0 %v5208_v0, %s11975_s28  ;;  %5209 = vrot.lane.b32.xlu1 %v5208_v0, %s11991_s7  ;;  %s13591_s28 = sld [smem:[#allocation42_spill]] }
 0xc9e   :  { %5444 = vrot.lane.b32.xlu0 %v5208_v0, %s11985_s20  ;;  %5365 = vrot.lane.b32.xlu1 %v5208_v0, %s11992_s0 }
 0xca0   :  { %v5924_v17 = vld [vmem:[%s13591_s28 + $0x8] sm:$0xff]  ;;  %v5926_v22 = vld [vmem:[%s13591_s28 + $0x18] sm:$0xff]  ;;  %v5923_v57 = vld [vmem:[%s13591_s28] sm:$0xff] }
 0xca1   :  { %v5928_v26 = vld [vmem:[%s13591_s28 + $0x28] sm:$0xff]  ;;  %v5930_v27 = vld [vmem:[%s13591_s28 + $0x38] sm:$0xff]  ;;  %v5927_v19 = vld [vmem:[%s13591_s28 + $0x20] sm:$0xff] }
 0xca2   :  { %5678 = vrot.lane.b32.xlu0 %v5208_v0, %s11993_s29  ;;  %5599 = vrot.lane.b32.xlu1 %v5208_v0, %s11994_s11  ;;  %v5932_v35 = vld [vmem:[%s13591_s28 + $0x48] sm:$0xff]  ;;  %v11399_v8 = vpack.c.bf16 %v5928_v26, %v5924_v17  ;;  %v5925_v28 = vld [vmem:[%s13591_s28 + $0x10] sm:$0xff]  ;;  %v11431_v30 = vpack.c.bf16 %v5930_v27, %v5926_v22  ;;  %v11401_v33 = vpack.c.bf16 %v5927_v19, %v5923_v57 }
 0xca3   :  { %v5936_v51 = vld [vmem:[%s13591_s28 + $0x68] sm:$0xff]  ;;  %v5929_v29 = vld [vmem:[%s13591_s28 + $0x30] sm:$0xff]  ;;  %v5934_v54 = vld [vmem:[%s13591_s28 + $0x58] sm:$0xff] }
 0xca4   :  { %v5938_v37 = vld [vmem:[%s13591_s28 + $0x78] sm:$0xff]  ;;  %v11403_v41 = vpack.c.bf16 %v5936_v51, %v5932_v35  ;;  %v5931_v43 = vld [vmem:[%s13591_s28 + $0x40] sm:$0xff]  ;;  %v11433_v46 = vpack.c.bf16 %v5929_v29, %v5925_v28  ;;  %v5933_v49 = vld [vmem:[%s13591_s28 + $0x50] sm:$0xff] }
 0xca5   :  { %v5935_v45 = vld [vmem:[%s13591_s28 + $0x60] sm:$0xff]  ;;  %v11435_v48 = vpack.c.bf16 %v5938_v37, %v5934_v54  ;;  %v5937_v53 = vld [vmem:[%s13591_s28 + $0x70] sm:$0xff]  ;;  %v5940_v60 = vld [vmem:[%s13591_s28 + $0x88] sm:$0xff] }
 0xca6   :  { %5836 = vrot.lane.b32.xlu0 %v5208_v0, %s11995_s19  ;;  %5757 = vrot.lane.b32.xlu1 %v5208_v0, %s11996_s15  ;;  %v11405_v56 = vpack.c.bf16 %v5935_v45, %v5931_v43  ;;  %v11437_v58 = vpack.c.bf16 %v5937_v53, %v5933_v49  ;;  %v5944_v39 = vld [vmem:[%s13591_s28 + $0xa8] sm:$0xff]  ;;  %v5942_v61 = vld [vmem:[%s13591_s28 + $0x98] sm:$0xff] }
 0xca7   :  { %v11407_v63 = vpack.c.bf16 %v5944_v39, %v5940_v60  ;;  %v5946_v4 = vld [vmem:[%s13591_s28 + $0xb8] sm:$0xff]  ;;  %v5939_v47 = vld [vmem:[%s13591_s28 + $0x80] sm:$0xff]  ;;  %v5941_v10 = vld [vmem:[%s13591_s28 + $0x90] sm:$0xff] }
 0xca8   :  { %v5943_v6 = vld [vmem:[%s13591_s28 + $0xa0] sm:$0xff]  ;;  %v11439_v7 = vpack.c.bf16 %v5946_v4, %v5942_v61  ;;  %v5945_v12 = vld [vmem:[%s13591_s28 + $0xb0] sm:$0xff]  ;;  %v5960_v17 = vld [vmem:[%s13591_s28 + $0x128] sm:$0xff] }
 0xca9   :  { %v11409_v9 = vpack.c.bf16 %v5943_v6, %v5939_v47  ;;  %v5958_v26 = vld [vmem:[%s13591_s28 + $0x118] sm:$0xff]  ;;  %v5955_v57 = vld [vmem:[%s13591_s28 + $0x100] sm:$0xff]  ;;  %v5957_v51 = vld [vmem:[%s13591_s28 + $0x110] sm:$0xff] }
 0xcaa   :  { %5918 = vperm.xlu1 %11562, %v5915_v2   ;;  %v5948_v2 = vld [vmem:[%s13591_s28 + $0xc8] sm:$0xff]  ;;  %v5962_v27 = vld [vmem:[%s13591_s28 + $0x138] sm:$0xff]  ;;  %v5959_v19 = vld [vmem:[%s13591_s28 + $0x120] sm:$0xff] }
 0xcab   :  { %v11417_v35 = vpack.c.bf16 %v5959_v19, %v5955_v57  ;;  %v5966_v28 = vld [vmem:[%s13591_s28 + $0x158] sm:$0xff]  ;;  %v5967_v54 = vld [vmem:[%s13591_s28 + $0x160] sm:$0xff]  ;;  %v5965_v43 = vld [vmem:[%s13591_s28 + $0x150] sm:$0xff] }
 0xcac   :  { %v5969_v45 = vld [vmem:[%s13591_s28 + $0x170] sm:$0xff]  ;;  %v5974_v49 = vld [vmem:[%s13591_s28 + $0x198] sm:$0xff]  ;;  %v5975_v60 = vld [vmem:[%s13591_s28 + $0x1a0] sm:$0xff] }
 0xcad   :  { %v5977_v4 = vld [vmem:[%s13591_s28 + $0x1b0] sm:$0xff]  ;;  %v5980_v6 = vld [vmem:[%s13591_s28 + $0x1c8] sm:$0xff] }
 0xd0c   :  { %v5287_v11 = vpop.permute.xlu0 %5286  ;;  %v5210_v15 = vpop.permute.xlu1 %5209 }
 0xd0d   :  { %11054 = vmatpush3.msra.mxu0 %v5210_v15  ;;  %11059 = vmatpush3.msra.mxu1 %v5287_v11  ;;  %v5954_v15 = vld [vmem:[%s13591_s28 + $0xf8] sm:$0xff] }
 0xd0e   :  { %11056 = vmatmul.mubr.msk.f32.vlgmr.msra.gmra.mrb[54].mxu0 %vm962_vm4, %v5211_v3  ;;  %11061 = vmatmul.mubr.msk.f32.vlgmr.msra.gmra.mrb[80].mxu1 %vm962_vm4, %v10038_v14  ;;  %v5952_v3 = vld [vmem:[%s13591_s28 + $0xe8] sm:$0xff]  ;;  %v5950_v14 = vld [vmem:[%s13591_s28 + $0xd8] sm:$0xff] }
 0xd0f   :  { %11068 = vmatprep.subr.mxu1 %v11990_v32  ;;  %11063 = vmatprep.subr.mxu0 %v11990_v32  ;;  %v11411_v11 = vpack.c.bf16 %v5952_v3, %v5948_v2  ;;  %v5983_v2 = vld [vmem:[%s13591_s28 + $0x1e0] sm:$0xff] }
 0xd10   :  { %v5445_v1 = vpop.permute.xlu0 %5444  ;;  %v5366_v31 = vpop.permute.xlu1 %5365  ;;  %11065 = vmatprep.mubr.msk.f32.mxu0 %vm11989_vm1, %v11990_v32  ;;  %11070 = vmatprep.mubr.msk.f32.mxu1 %vm11989_vm1, %v11990_v32 }
 0xd11   :  { %11064 = vmatpush3.msra.mxu0 %v5366_v31  ;;  %11069 = vmatpush3.msra.mxu1 %v5445_v1  ;;  %v5951_v1 = vld [vmem:[%s13591_s28 + $0xe0] sm:$0xff]  ;;  %v11443_v31 = vpack.c.bf16 %v5954_v15, %v5950_v14  ;;  %v5985_v15 = vld [vmem:[%s13591_s28 + $0x1f0] sm:$0xff] }
 0xd12   :  { %11066 = vmatmul.mubr.msk.f32.vlgmr.msra.gmra.mrb[56].mxu0 %vm962_vm4, %v10040_v16  ;;  %11073 = vmatprep.subr.mxu0 %v11990_v32  ;;  %v5947_v16 = vld [vmem:[%s13591_s28 + $0xc0] sm:$0xff] }
 0xd13   :  { %11071 = vmatmul.mubr.msk.f32.vlgmr.msra.gmra.mrb[82].mxu1 %vm962_vm4, %v10042_v18  ;;  %11074 = vmatpush3.msra.mxu0 %v5208_v0  ;;  %v11441_v0 = vpack.c.bf16 %v5945_v12, %v5941_v10  ;;  %v11413_v18 = vpack.c.bf16 %v5951_v1, %v5947_v16  ;;  %v5986_v12 = vld [vmem:[%s13591_s28 + $0x1f8] sm:$0xff] }
 0xd14   :  { %11078 = vmatprep.subr.mxu1 %v11990_v32  ;;  %v5679_v23 = vpop.permute.xlu0 %5678  ;;  %v5600_v40 = vpop.permute.xlu1 %5599  ;;  %11075 = vmatprep.mubr.msk.f32.mxu0 %vm11989_vm1, %v11990_v32 }
 0xd15   :  { %11079 = vmatpush3.msra.mxu1 %v5600_v40  ;;  %11083 = vmatprep.subr.mxu0 %v11990_v32 }
 0xd16   :  { %11076 = vmatmul.mubr.msk.f32.vlgmr.msra.gmra.mrb[58].mxu0 %vm962_vm4, %v10044_v21  ;;  %11080 = vmatprep.mubr.msk.f32.mxu1 %vm11989_vm1, %v11990_v32  ;;  %v5949_v21 = vld [vmem:[%s13591_s28 + $0xd0] sm:$0xff] }
 0xd17   :  { %11084 = vmatpush3.msra.mxu0 %v5679_v23  ;;  %11081 = vmatmul.mubr.msk.f32.vlgmr.msra.gmra.mrb[84].mxu1 %vm962_vm4, %v10046_v42  ;;  %v5953_v23 = vld [vmem:[%s13591_s28 + $0xf0] sm:$0xff]  ;;  %v5956_v42 = vld [vmem:[%s13591_s28 + $0x108] sm:$0xff] }
 0xd18   :  { %v5837_v55 = vpop.permute.xlu0 %5836  ;;  %11088 = vmatprep.subr.mxu1 %v11990_v32  ;;  %v5758_v59 = vpop.permute.xlu1 %5757  ;;  %11085 = vmatprep.mubr.msk.f32.mxu0 %vm11989_vm1, %v11990_v32  ;;  %v11445_v40 = vpack.c.bf16 %v5953_v23, %v5949_v21  ;;  %v11415_v22 = vpack.c.bf16 %v5960_v17, %v5956_v42 }
 0xd19   :  { %11089 = vmatpush3.msra.mxu1 %v5758_v59  ;;  %11093 = vmatprep.subr.mxu0 %v11990_v32 }
 0xd1a   :  { %11086 = vmatmul.mubr.msk.f32.vlgmr.msra.gmra.mrb[60].mxu0 %vm962_vm4, %v10048_v34  ;;  %11090 = vmatprep.mubr.msk.f32.mxu1 %vm11989_vm1, %v11990_v32  ;;  %v11447_v34 = vpack.c.bf16 %v5962_v27, %v5958_v26 }
 0xd1b   :  { %11094 = vmatpush3.msra.mxu0 %v5837_v55  ;;  %11091 = vmatmul.mubr.msk.f32.vlgmr.msra.gmra.mrb[86].mxu1 %vm962_vm4, %v10050_v5  ;;  %v5961_v55 = vld [vmem:[%s13591_s28 + $0x130] sm:$0xff]  ;;  %v5964_v5 = vld [vmem:[%s13591_s28 + $0x148] sm:$0xff] }
 0xd1c   :  { %11095 = vmatprep.mubr.msk.f32.mxu0 %vm11989_vm1, %v11990_v32  ;;  %11400 = vmatprep.subr.bf16.mxu1 %v11399_v8  ;;  %v11449_v59 = vpack.c.bf16 %v5961_v55, %v5957_v51  ;;  %v5968_v8 = vld [vmem:[%s13591_s28 + $0x168] sm:$0xff] }
 0xd1d   :  { %11432 = vmatprep.subr.bf16.mxu0 %v11431_v30  ;;  %11402 = vmatpush1.bf16.msra.mxu1 %v11401_v33  ;;  %v11419_v29 = vpack.c.bf16 %v5968_v8, %v5964_v5  ;;  %v5970_v30 = vld [vmem:[%s13591_s28 + $0x178] sm:$0xff]  ;;  %v5963_v33 = vld [vmem:[%s13591_s28 + $0x140] sm:$0xff] }
 0xd1e   :  { %11096 = vmatmul.mubr.msk.f32.vlgmr.msra.gmra.mrb[62].mxu0 %vm962_vm4, %v10052_v13  ;;  %11404 = vmatprep.subr.bf16.mxu1 %v11403_v41  ;;  %v11451_v37 = vpack.c.bf16 %v5970_v30, %v5966_v28  ;;  %v11421_v41 = vpack.c.bf16 %v5967_v54, %v5963_v33  ;;  %v11453_v13 = vpack.c.bf16 %v5969_v45, %v5965_v43 }
 0xd1f   :  { %11434 = vmatpush1.bf16.msra.mxu0 %v11433_v46  ;;  %6051 = vmatprep.mubr.f32.mxu1 %v11990_v32  ;;  %v5972_v46 = vld [vmem:[%s13591_s28 + $0x188] sm:$0xff] }
 0xd20   :  { %11436 = vmatprep.subr.bf16.mxu0 %v11435_v48  ;;  %6122 = vmatprep.mubr.f32.mxu0 %v11990_v32  ;;  %v5976_v48 = vld [vmem:[%s13591_s28 + $0x1a8] sm:$0xff] }
 0xd21   :  { %11406 = vmatpush1.bf16.msra.mxu1 %v11405_v56  ;;  %v11423_v53 = vpack.c.bf16 %v5976_v48, %v5972_v46  ;;  %v5978_v56 = vld [vmem:[%s13591_s28 + $0x1b8] sm:$0xff] }
 0xd22   :  { %11408 = vmatprep.subr.bf16.mxu1 %v11407_v63  ;;  %v11455_v39 = vpack.c.bf16 %v5978_v56, %v5974_v49  ;;  %v5973_v63 = vld [vmem:[%s13591_s28 + $0x190] sm:$0xff]  ;;  %v7804_v56 = vld [vmem:[%s13592_s27] sm:$0xf] }
 0xd23   :  { %11438 = vmatpush1.bf16.msra.mxu0 %v11437_v58  ;;  %v5971_v58 = vld [vmem:[%s13591_s28 + $0x180] sm:$0xff]  ;;  %v11457_v47 = vpack.c.bf16 %v5977_v4, %v5973_v63 }
 0xd24   :  { %11440 = vmatprep.subr.bf16.mxu0 %v11439_v7  ;;  %v11425_v61 = vpack.c.bf16 %v5975_v60, %v5971_v58  ;;  %v5984_v7 = vld [vmem:[%s13591_s28 + $0x1e8] sm:$0xff]  ;;  %v6137_v58 = vlaneseq }
 0xd25   :  { %11410 = vmatpush1.bf16.msra.mxu1 %v11409_v9  ;;  %v5982_v9 = vld [vmem:[%s13591_s28 + $0x1d8] sm:$0xff]  ;;  %v11427_v10 = vpack.c.bf16 %v5984_v7, %v5980_v6  ;;  %v6144_v6 = vld [vmem:[%s13593_s17] sm:$0xf] }
 0xd26   :  { %11412 = vmatprep.subr.bf16.mxu1 %v11411_v11  ;;  %v11459_v3 = vpack.c.bf16 %v5986_v12, %v5982_v9  ;;  %v5981_v11 = vld [vmem:[%s13591_s28 + $0x1d0] sm:$0xff]  ;;  %v13011_v60 = vand.u32 127, %v6137_v58 }
 0xd27   :  { %11442 = vmatpush1.bf16.msra.mxu0 %v11441_v0  ;;  %v5979_v0 = vld [vmem:[%s13591_s28 + $0x1c0] sm:$0xff]  ;;  %v11461_v16 = vpack.c.bf16 %v5985_v15, %v5981_v11 }
 0xd28   :  { %11444 = vmatprep.subr.bf16.mxu0 %v11443_v31  ;;  %v11429_v14 = vpack.c.bf16 %v5983_v2, %v5979_v0  ;;  %vm6139_vm6 = vcmp.lt.s32.totalorder %v13011_v60, 17  ;;  %vm6324_vm7 = vcmp.lt.s32.totalorder %v13011_v60, 16  ;;  %v10056_v11 = vld [vmem:[%s13593_s17 + $0x4] sm:$0xf]  ;;  %vm6515_vm8 = vcmp.lt.s32.totalorder %v13011_v60, 15 }
 0xd29   :  { %11414 = vmatpush1.bf16.msra.mxu1 %v11413_v18  ;;  %v5919_v46 = vpop.permute.xlu1 %5918  ;;  %vm6706_vm9 = vcmp.lt.s32.totalorder %v13011_v60, 1  ;;  %vm7048_vm10 = vcmp.lt.s32.totalorder %v13011_v60, 127  ;;  %vm7239_vm11 = vcmp.lt.s32.totalorder %v13011_v60, 113  ;;  %vm7430_vm12 = vcmp.lt.s32.totalorder %v13011_v60, 112 }
 0xd2a   :  { %11416 = vmatprep.subr.bf16.mxu1 %v11415_v22  ;;  %vm7621_vm13 = vcmp.lt.s32.totalorder %v13011_v60, 111 }
 0xd2b   :  { %11446 = vmatpush1.bf16.msra.mxu0 %v11445_v40 }
 0xd2c   :  { %11448 = vmatprep.subr.bf16.mxu0 %v11447_v34 }
 0xd2d   :  { %11418 = vmatpush1.bf16.msra.mxu1 %v11417_v35 }
 0xd2e   :  { %11420 = vmatprep.subr.bf16.mxu1 %v11419_v29 }
 0xd2f   :  { %11450 = vmatpush1.bf16.msra.mxu0 %v11449_v59 }
 0xd30   :  { %11452 = vmatprep.subr.bf16.mxu0 %v11451_v37 }
 0xd31   :  { %11422 = vmatpush1.bf16.msra.mxu1 %v11421_v41 }
 0xd32   :  { %11424 = vmatprep.subr.bf16.mxu1 %v11423_v53  ;;  %v460_v53 = vld [vmem:[%s13582_s24 + $0x70] sm:$0xff] }
 0xd33   :  { %11454 = vmatpush1.bf16.msra.mxu0 %v11453_v13 }
 0xd34   :  { %11456 = vmatprep.subr.bf16.mxu0 %v11455_v39 }
 0xd35   :  { %11426 = vmatpush1.bf16.msra.mxu1 %v11425_v61 }
 0xd36   :  { %11428 = vmatprep.subr.bf16.mxu1 %v11427_v10 }
 0xd37   :  { %11458 = vmatpush1.bf16.msra.mxu0 %v11457_v47 }
 0xd38   :  { %11460 = vmatprep.subr.bf16.mxu0 %v11459_v3 }
 0xd39   :  { %11430 = vmatpush1.bf16.msra.mxu1 %v11429_v14 }
 0xd3b   :  { %11462 = vmatpush1.bf16.msra.mxu0 %v11461_v16 }
 0xde1   :  { %v5281_v1 = vpop.f32.mrb[54].mxu0  ;;  %v5359_v31 = vpop.f32.mrb[80].mxu1 }
 0xde2   :  { %v5285_v18 = vmul.f32 %v12788_v25, %v5281_v1  ;;  %v5363_v21 = vmul.f32 %v12790_v38, %v5359_v31  ;;  %v11057_v23 = vpop.f32.mrb[55].mxu0  ;;  %v11062_v40 = vpop.f32.mrb[81].mxu1 }
 0xde4   :  { %v5364_v42 = vadd.f32 %v5363_v21, %v5285_v18 }
 0xde5   :  { %v5438_v17 = vpop.f32.mrb[56].mxu0 }
 0xde6   :  { %v5442_v26 = vmul.f32 %v12794_v20, %v5438_v17  ;;  %v11067_v22 = vpop.f32.mrb[57].mxu0  ;;  %v5517_v27 = vpop.f32.mrb[82].mxu1 }
 0xde7   :  { %v5521_v57 = vmul.f32 %v12796_v50, %v5517_v27  ;;  %v11072_v19 = vpop.f32.mrb[83].mxu1 }
 0xde8   :  { %v5443_v34 = vadd.f32 %v5442_v26, %v5364_v42  ;;  %v10060_v42 = vld [vmem:[%s13593_s17 + $0x8] sm:$0xf] }
 0xde9   :  { %v5594_v35 = vpop.f32.mrb[58].mxu0 }
 0xdea   :  { %v5522_v51 = vadd.f32 %v5521_v57, %v5443_v34  ;;  %v11077_v55 = vpop.f32.mrb[59].mxu0  ;;  %v5672_v59 = vpop.f32.mrb[84].mxu1 }
 0xdeb   :  { %v5676_v25 = vmul.f32 %v12800_v62, %v5672_v59  ;;  %v11082_v5 = vpop.f32.mrb[85].mxu1  ;;  %v10064_v59 = vld [vmem:[%s13593_s17 + $0xc] sm:$0xf] }
 0xdec   :  { %v5598_v38 = vadd.f32 %v5594_v35, %v5522_v51 }
 0xded   :  { %v5751_v8 = vpop.f32.mrb[60].mxu0 }
 0xdee   :  { %v5677_v28 = vadd.f32 %v5676_v25, %v5598_v38  ;;  %v5755_v29 = vmul.f32 %v12803_v36, %v5751_v8  ;;  %v11087_v30 = vpop.f32.mrb[61].mxu0  ;;  %v5830_v20 = vpop.f32.mrb[86].mxu1  ;;  %v10068_v8 = vld [vmem:[%s13593_s17 + $0x10] sm:$0xf] }
 0xdef   :  { %v5834_v33 = vmul.f32 %v12805_v44, %v5830_v20  ;;  %v11092_v54 = vpop.f32.mrb[87].mxu1 }
 0xdf0   :  { %v5756_v50 = vadd.f32 %v5755_v29, %v5677_v28 }
 0xdf1   :  { %v5909_v37 = vpop.f32.mrb[62].mxu0 }
 0xdf2   :  { %v5835_v41 = vadd.f32 %v5834_v33, %v5756_v50  ;;  %v5913_v43 = vmul.f32 %v12809_v52, %v5909_v37  ;;  %v11097_v45 = vpop.f32.mrb[63].mxu0  ;;  %v10071_v50 = vld [vmem:[%s13593_s17 + $0x14] sm:$0xf] }
 0xdf4   :  { %v5914_v13 = vadd.f32 %v5913_v43, %v5835_v41 }
 0xdf6   :  { %v5921_v62 = vadd.f32 %v5919_v46, %v5914_v13  ;;  %v10075_v46 = vld [vmem:[%s13593_s17 + $0x18] sm:$0xf] }
 0xdf8   :  { %v5922_v48 = vmax.f32 %v5921_v62, 0.0  ;;  %v12002_v62 = vmov 1983009808  }
 0xdfa   :  { %6052 = vmatmul.mubr.f32.vlgmr.msra.gmra.mrb[88].mxu1 %v5922_v48  ;;  %6123 = vmatmul.mubr.f32.vlgmr.msra.gmra.mrb[64].mxu0 %v5922_v48  ;;  %v7834_v48 = vunpack.c.l.s4 %v12002_v62 }
 0xdfb   :  { %6212 = vmatprep.mubr.f32.mxu1 %v11990_v32  ;;  %6283 = vmatprep.mubr.f32.mxu0 %v11990_v32 }
 0xecd   :  { %v12936_v36 = vpop.f32.mrb[88].mxu1  ;;  %v12938_v44 = vpop.f32.mrb[64].mxu0 }
 0xece   :  { %6129 = vrot.lane.b32.xlu0 %v12936_v36, %s11997_s25  ;;  %v12942_v52 = vpop.f32.mrb[89].mxu1  ;;  %v12944_v49 = vpop.f32.mrb[65].mxu0 }
 0xecf   :  { %6131 = vrot.lane.b32.xlu1 %v12942_v52, %s11997_s25 }
 0xed2   :  { %6133 = vrot.lane.b32.xlu0 %v12938_v44, %s11997_s25 }
 0xed3   :  { %6135 = vrot.lane.b32.xlu1 %v12944_v49, %s11997_s25 }
 0xed6   :  { %6316 = vrot.lane.b32.xlu0 %v12936_v36, %s11984_s22 }
 0xed7   :  { %6318 = vrot.lane.b32.xlu1 %v12942_v52, %s11984_s22 }
 0xeda   :  { %6320 = vrot.lane.b32.xlu0 %v12938_v44, %s11984_s22 }
 0xedb   :  { %6322 = vrot.lane.b32.xlu1 %v12944_v49, %s11984_s22 }
 0xede   :  { %6507 = vrot.lane.b32.xlu0 %v12936_v36, %s11998_s6 }
 0xedf   :  { %6509 = vrot.lane.b32.xlu1 %v12942_v52, %s11998_s6 }
 0xee2   :  { %6511 = vrot.lane.b32.xlu0 %v12938_v44, %s11998_s6 }
 0xee3   :  { %6513 = vrot.lane.b32.xlu1 %v12944_v49, %s11998_s6 }
 0xee6   :  { %6698 = vrot.lane.b32.xlu0 %v12936_v36, %s11985_s20 }
 0xee7   :  { %6700 = vrot.lane.b32.xlu1 %v12942_v52, %s11985_s20 }
 0xeea   :  { %6702 = vrot.lane.b32.xlu0 %v12938_v44, %s11985_s20 }
 0xeeb   :  { %6704 = vrot.lane.b32.xlu1 %v12944_v49, %s11985_s20 }
 0xeee   :  { %7040 = vrot.lane.b32.xlu0 %v12936_v36, %s11994_s11 }
 0xeef   :  { %7042 = vrot.lane.b32.xlu1 %v12942_v52, %s11994_s11 }
 0xef2   :  { %7044 = vrot.lane.b32.xlu0 %v12938_v44, %s11994_s11 }
 0xef3   :  { %7046 = vrot.lane.b32.xlu1 %v12944_v49, %s11994_s11 }
 0xef6   :  { %7231 = vrot.lane.b32.xlu0 %v12936_v36, %s11999_s3 }
 0xef7   :  { %7233 = vrot.lane.b32.xlu1 %v12942_v52, %s11999_s3 }
 0xefa   :  { %7235 = vrot.lane.b32.xlu0 %v12938_v44, %s11999_s3 }
 0xefb   :  { %7237 = vrot.lane.b32.xlu1 %v12944_v49, %s11999_s3 }
 0xefe   :  { %7422 = vrot.lane.b32.xlu0 %v12936_v36, %s12000_s23 }
 0xeff   :  { %7424 = vrot.lane.b32.xlu1 %v12942_v52, %s12000_s23 }
 0xf02   :  { %7426 = vrot.lane.b32.xlu0 %v12938_v44, %s12000_s23 }
 0xf03   :  { %7428 = vrot.lane.b32.xlu1 %v12944_v49, %s12000_s23 }
 0xf06   :  { %7613 = vrot.lane.b32.xlu0 %v12936_v36, %s12001_s26 }
 0xf07   :  { %7615 = vrot.lane.b32.xlu1 %v12942_v52, %s12001_s26 }
 0xf0a   :  { %7617 = vrot.lane.b32.xlu0 %v12938_v44, %s12001_s26 }
 0xf0b   :  { %7619 = vrot.lane.b32.xlu1 %v12944_v49, %s12001_s26 }
 0xf0e   :  { %533 = vperm.xlu0 %11561, %v460_v53  }
 0xf0f   :  { %7807 = vperm.xlu1 %11562, %v7804_v56   ;;  %v6293_v56 = vshrl.u32 %v6137_v58, 7 }
 0xf40   :  { %v6130_v39 = vpop.permute.xlu0 %6129 }
 0xf41   :  { %v6132_v61 = vpop.permute.xlu1 %6131 }
 0xf42   :  { %v6142_v63 = vsel %vm6139_vm6, %v6130_v39, %v6132_v61 }
 0xf43   :  { %6148 = vmatprep.subr.mxu1 %v6142_v63 }
 0xf44   :  { %v6134_v4 = vpop.permute.xlu0 %6133 }
 0xf45   :  { %v6136_v47 = vpop.permute.xlu1 %6135  ;;  %v6141_v10 = vsel %vm6139_vm6, %v6132_v61, %v6134_v4  ;;  %v7830_v61 = vld [vmem:[#allocation20] sm:$0xff] }
 0xf46   :  { %v6143_v7 = vsel %vm6139_vm6, %v6136_v47, %v6130_v39  ;;  %v6140_v9 = vsel %vm6139_vm6, %v6134_v4, %v6136_v47  ;;  %v7835_v39 = vunpack.c.0.s8 %v7834_v48 }
 0xf47   :  { %6149 = vmatpush1.msra.mxu1 %v6143_v7  ;;  %6219 = vmatprep.subr.mxu0 %v6140_v9 }
 0xf48   :  { %v6317_v12 = vpop.permute.xlu0 %6316  ;;  %6220 = vmatpush1.msra.mxu0 %v6141_v10  ;;  %10054 = vmatmul.mubr.msk.f32.vlgmr.msra.gmra.mrb[90].mxu1 %vm962_vm4, %v6144_v6  ;;  %v7838_v7 = vsub.s32 %v7835_v39, %v6293_v56 }
 0xf49   :  { %v6319_v0 = vpop.permute.xlu1 %6318  ;;  %10055 = vmatmul.mubr.msk.f32.vlgmr.msra.gmra.mrb[66].mxu0 %vm962_vm4, %v6144_v6  ;;  %6398 = vmatprep.mubr.f32.mxu1 %v11990_v32  ;;  %v10079_v6 = vld [vmem:[%s13593_s17 + $0x1c] sm:$0xf] }
 0xf4a   :  { %v6327_v2 = vsel %vm6324_vm7, %v6317_v12, %v6319_v0  ;;  %6469 = vmatprep.mubr.f32.mxu0 %v11990_v32 }
 0xf4b   :  { %6334 = vmatprep.subr.mxu1 %v6327_v2 }
 0xf4c   :  { %v6321_v3 = vpop.permute.xlu0 %6320 }
 0xf4d   :  { %v6323_v14 = vpop.permute.xlu1 %6322  ;;  %v6326_v1 = vsel %vm6324_vm7, %v6319_v0, %v6321_v3 }
 0xf4e   :  { %v6328_v15 = vsel %vm6324_vm7, %v6323_v14, %v6317_v12  ;;  %v6325_v16 = vsel %vm6324_vm7, %v6321_v3, %v6323_v14  ;;  %v7832_v12 = vcombine.high %v7830_v61, %v7830_v61  ;;  %v7839_v3 = vrot.slane %v7830_v61, %v7838_v7 }
 0xf4f   :  { %6335 = vmatpush1.msra.mxu1 %v6328_v15  ;;  %6405 = vmatprep.subr.mxu0 %v6325_v16 }
 0xf50   :  { %v6508_v31 = vpop.permute.xlu0 %6507  ;;  %6406 = vmatpush1.msra.mxu0 %v6326_v1  ;;  %10057 = vmatmul.mubr.msk.f32.vlgmr.msra.gmra.mrb[92].mxu1 %vm962_vm4, %v10056_v11  ;;  %v7846_v14 = vrot.slane %v7832_v12, %v7838_v7  ;;  %v10083_v1 = vld [vmem:[%s13593_s17 + $0x20] sm:$0xf] }
 0xf51   :  { %v6510_v18 = vpop.permute.xlu1 %6509  ;;  %10058 = vmatmul.mubr.msk.f32.vlgmr.msra.gmra.mrb[68].mxu0 %vm962_vm4, %v10056_v11  ;;  %6589 = vmatprep.mubr.f32.mxu1 %v11990_v32 }
 0xf52   :  { %v6518_v21 = vsel %vm6515_vm8, %v6508_v31, %v6510_v18  ;;  %6660 = vmatprep.mubr.f32.mxu0 %v11990_v32 }
 0xf53   :  { %6525 = vmatprep.subr.mxu1 %v6518_v21 }
 0xf54   :  { %v6512_v23 = vpop.permute.xlu0 %6511 }
 0xf55   :  { %v6514_v40 = vpop.permute.xlu1 %6513  ;;  %v6517_v22 = vsel %vm6515_vm8, %v6510_v18, %v6512_v23 }
 0xf56   :  { %v6519_v17 = vsel %vm6515_vm8, %v6514_v40, %v6508_v31  ;;  %v6516_v26 = vsel %vm6515_vm8, %v6512_v23, %v6514_v40  ;;  %v7847_v31 = vcombine.high %v7839_v3, %v7839_v3  ;;  %v7848_v40 = vcombine.high %v7846_v14, %v7846_v14 }
 0xf57   :  { %6526 = vmatpush1.msra.mxu1 %v6519_v17  ;;  %6596 = vmatprep.subr.mxu0 %v6516_v26  ;;  %v13144_v26 = vsub.s32 0, %v6293_v56 }
 0xf58   :  { %v6699_v27 = vpop.permute.xlu0 %6698  ;;  %6597 = vmatpush1.msra.mxu0 %v6517_v22  ;;  %10061 = vmatmul.mubr.msk.f32.vlgmr.msra.gmra.mrb[94].mxu1 %vm962_vm4, %v10060_v42 }
 0xf59   :  { %v6701_v57 = vpop.permute.xlu1 %6700  ;;  %10062 = vmatmul.mubr.msk.f32.vlgmr.msra.gmra.mrb[70].mxu0 %vm962_vm4, %v10060_v42  ;;  %6780 = vmatprep.mubr.f32.mxu1 %v11990_v32 }
 0xf5a   :  { %v6709_v19 = vsel %vm6706_vm9, %v6699_v27, %v6701_v57  ;;  %6851 = vmatprep.mubr.f32.mxu0 %v11990_v32 }
 0xf5b   :  { %6716 = vmatprep.subr.mxu1 %v6709_v19  ;;  %v13149_v19 = vsub.s32 2, %v6293_v56 }
 0xf5c   :  { %v6703_v34 = vpop.permute.xlu0 %6702 }
 0xf5d   :  { %v6705_v35 = vpop.permute.xlu1 %6704  ;;  %v6708_v25 = vsel %vm6706_vm9, %v6701_v57, %v6703_v34  ;;  %v13147_v57 = vsub.s32 1, %v6293_v56 }
 0xf5e   :  { %v6710_v51 = vsel %vm6706_vm9, %v6705_v35, %v6699_v27  ;;  %v6707_v55 = vsel %vm6706_vm9, %v6703_v34, %v6705_v35  ;;  %v6290_v27 = vld [vmem:[%s12157_s14] sm:$0xf] }
 0xf5f   :  { %6717 = vmatpush1.msra.mxu1 %v6710_v51  ;;  %6787 = vmatprep.subr.mxu0 %v6707_v55  ;;  %v13151_v51 = vsub.s32 3, %v6293_v56 }
 0xf60   :  { %v7041_v5 = vpop.permute.xlu0 %7040  ;;  %6788 = vmatpush1.msra.mxu0 %v6708_v25  ;;  %6894 = vmatprep.subr.mxu1 %v12942_v52  ;;  %v13158_v25 = vrot.slane %v6290_v27, %v13147_v57 }
 0xf61   :  { %10065 = vmatmul.mubr.msk.f32.vlgmr.msra.gmra.mrb[96].mxu1 %vm962_vm4, %v10064_v59  ;;  %6965 = vmatprep.subr.mxu0 %v12944_v49  ;;  %v7043_v38 = vpop.permute.xlu1 %7042 }
 0xf62   :  { %6895 = vmatpush1.msra.mxu1 %v12936_v36  ;;  %10066 = vmatmul.mubr.msk.f32.vlgmr.msra.gmra.mrb[72].mxu0 %vm962_vm4, %v10064_v59  ;;  %v7051_v20 = vsel %vm7048_vm10, %v7041_v5, %v7043_v38  ;;  %v13155_v59 = vrot.slane %v6290_v27, %v13144_v26 }
 0xf63   :  { %6966 = vmatpush1.msra.mxu0 %v12938_v44  ;;  %6958 = vmatprep.mubr.f32.mxu1 %v11990_v32 }
 0xf64   :  { %v7045_v28 = vpop.permute.xlu0 %7044  ;;  %7029 = vmatprep.mubr.f32.mxu0 %v11990_v32 }
 0xf65   :  { %v7047_v29 = vpop.permute.xlu1 %7046  ;;  %v7050_v30 = vsel %vm7048_vm10, %v7043_v38, %v7045_v28  ;;  %10069 = vmatmul.mubr.msk.f32.vlgmr.msra.gmra.mrb[98].mxu1 %vm962_vm4, %v10068_v8 }
 0xf66   :  { %v7049_v33 = vsel %vm7048_vm10, %v7045_v28, %v7047_v29  ;;  %7058 = vmatprep.subr.mxu1 %v7050_v30  ;;  %v7052_v54 = vsel %vm7048_vm10, %v7047_v29, %v7041_v5  ;;  %10070 = vmatmul.mubr.msk.f32.vlgmr.msra.gmra.mrb[74].mxu0 %vm962_vm4, %v10068_v8  ;;  %v13161_v5 = vrot.slane %v6290_v27, %v13149_v19 }
 0xf67   :  { %7059 = vmatpush1.msra.mxu1 %v7051_v20  ;;  %7129 = vmatprep.subr.mxu0 %v7052_v54  ;;  %v13167_v8 = vrot.slane %v6290_v27, %v13151_v51 }
 0xf68   :  { %v7232_v37 = vpop.permute.xlu0 %7231  ;;  %7130 = vmatpush1.msra.mxu0 %v7049_v33  ;;  %7122 = vmatprep.mubr.f32.mxu1 %v11990_v32 }
 0xf69   :  { %v7234_v41 = vpop.permute.xlu1 %7233  ;;  %10072 = vmatmul.mubr.msk.f32.vlgmr.msra.gmra.mrb[100].mxu1 %vm962_vm4, %v10071_v50  ;;  %7193 = vmatprep.mubr.f32.mxu0 %v11990_v32 }
 0xf6a   :  { %10073 = vmatmul.mubr.msk.f32.vlgmr.msra.gmra.mrb[76].mxu0 %vm962_vm4, %v10071_v50  ;;  %7313 = vmatprep.mubr.f32.mxu1 %v11990_v32  ;;  %v7242_v36 = vsel %vm7239_vm11, %v7232_v37, %v7234_v41 }
 0xf6b   :  { %7384 = vmatprep.mubr.f32.mxu0 %v11990_v32 }
 0xf6c   :  { %v7236_v43 = vpop.permute.xlu0 %7235 }
 0xf6d   :  { %v7238_v45 = vpop.permute.xlu1 %7237  ;;  %v7241_v13 = vsel %vm7239_vm11, %v7234_v41, %v7236_v43 }
 0xf6e   :  { %v7240_v44 = vsel %vm7239_vm11, %v7236_v43, %v7238_v45  ;;  %7249 = vmatprep.subr.mxu1 %v7241_v13  ;;  %v7243_v52 = vsel %vm7239_vm11, %v7238_v45, %v7232_v37 }
 0xf6f   :  { %7250 = vmatpush1.msra.mxu1 %v7242_v36  ;;  %7320 = vmatprep.subr.mxu0 %v7243_v52 }
 0xf70   :  { %v7423_v49 = vpop.permute.xlu0 %7422  ;;  %10076 = vmatmul.mubr.msk.f32.vlgmr.msra.gmra.mrb[102].mxu1 %vm962_vm4, %v10075_v46  ;;  %7321 = vmatpush1.msra.mxu0 %v7240_v44 }
 0xf71   :  { %v7425_v53 = vpop.permute.xlu1 %7424  ;;  %10077 = vmatmul.mubr.msk.f32.vlgmr.msra.gmra.mrb[78].mxu0 %vm962_vm4, %v10075_v46  ;;  %7504 = vmatprep.mubr.f32.mxu1 %v11990_v32  ;;  %v10063_v46 = vld [vmem:[%s12157_s14 + $0x8] sm:$0xf] }
 0xf72   :  { %7575 = vmatprep.mubr.f32.mxu0 %v11990_v32  ;;  %v7433_v9 = vsel %vm7430_vm12, %v7423_v49, %v7425_v53  ;;  %v13191_v39 = vrot.slane %v10063_v46, %v13147_v57  ;;  %v13194_v61 = vrot.slane %v10063_v46, %v13149_v19 }
 0xf74   :  { %v7427_v63 = vpop.permute.xlu0 %7426 }
 0xf75   :  { %v7429_v4 = vpop.permute.xlu1 %7428  ;;  %v7432_v47 = vsel %vm7430_vm12, %v7425_v53, %v7427_v63  ;;  %v13188_v53 = vrot.slane %v10063_v46, %v13144_v26 }
 0xf76   :  { %v7431_v10 = vsel %vm7430_vm12, %v7427_v63, %v7429_v4  ;;  %7440 = vmatprep.subr.mxu1 %v7432_v47  ;;  %v7434_v58 = vsel %vm7430_vm12, %v7429_v4, %v7423_v49  ;;  %v13197_v63 = vrot.slane %v10063_v46, %v13151_v51 }
 0xf77   :  { %7441 = vmatpush1.msra.mxu1 %v7433_v9  ;;  %7511 = vmatprep.subr.mxu0 %v7434_v58 }
 0xf78   :  { %v7614_v0 = vpop.permute.xlu0 %7613  ;;  %10080 = vmatmul.mubr.msk.f32.vlgmr.msra.gmra.mrb[104].mxu1 %vm962_vm4, %v10079_v6  ;;  %7512 = vmatpush1.msra.mxu0 %v7431_v10 }
 0xf79   :  { %10081 = vmatmul.mubr.msk.f32.vlgmr.msra.gmra.mrb[80].mxu0 %vm962_vm4, %v10079_v6  ;;  %v7616_v2 = vpop.permute.xlu1 %7615  ;;  %7695 = vmatprep.mubr.f32.mxu1 %v11990_v32 }
 0xf7a   :  { %7766 = vmatprep.mubr.f32.mxu0 %v11990_v32  ;;  %v7624_v18 = vsel %vm7621_vm13, %v7614_v0, %v7616_v2 }
 0xf7c   :  { %v7618_v11 = vpop.permute.xlu0 %7617 }
 0xf7d   :  { %v7620_v15 = vpop.permute.xlu1 %7619  ;;  %v7623_v16 = vsel %vm7621_vm13, %v7616_v2, %v7618_v11 }
 0xf7e   :  { %v7622_v21 = vsel %vm7621_vm13, %v7618_v11, %v7620_v15  ;;  %7631 = vmatprep.subr.mxu1 %v7623_v16  ;;  %v7625_v23 = vsel %vm7621_vm13, %v7620_v15, %v7614_v0  ;;  %v10067_v0 = vld [vmem:[%s12157_s14 + $0xc] sm:$0xf] }
 0xf7f   :  { %7632 = vmatpush1.msra.mxu1 %v7624_v18  ;;  %7702 = vmatprep.subr.mxu0 %v7625_v23  ;;  %v13205_v15 = vrot.slane %v10067_v0, %v13144_v26  ;;  %v13208_v16 = vrot.slane %v10067_v0, %v13147_v57 }
 0xf80   :  { %10084 = vmatmul.mubr.msk.f32.vlgmr.msra.gmra.mrb[106].mxu1 %vm962_vm4, %v10083_v1  ;;  %7703 = vmatpush1.msra.mxu0 %v7622_v21 }
 0xf81   :  { %10085 = vmatmul.mubr.msk.f32.vlgmr.msra.gmra.mrb[82].mxu0 %vm962_vm4, %v10083_v1  ;;  %10087 = vmatprep.subr.msk.mxu1 %vm735_vm2, %v7847_v31  ;;  %v13211_v1 = vrot.slane %v10067_v0, %v13149_v19  ;;  %v13214_v31 = vrot.slane %v10067_v0, %v13151_v51 }
 0xf82   :  { %10090 = vmatprep.subr.msk.mxu0 %vm735_vm2, %v7848_v40  ;;  %10088 = vmatpush1.msk.msra.mxu1 %vm735_vm2, %v7839_v3 }
 0xf83   :  { %7924 = vmatprep.mubr.f32.mxu1 %v11990_v32  ;;  %10091 = vmatpush1.msk.msra.mxu0 %vm735_vm2, %v7846_v14 }
 0xf84   :  { %7995 = vmatprep.mubr.f32.mxu0 %v11990_v32 }
 0xf8d   :  { %v534_v42 = vpop.permute.xlu0 %533 }
 0xf8e   :  { %v718_v17 = vadd.f32 %v12438_v24, %v534_v42  ;;  %v10059_v24 = vld [vmem:[%s12157_s14 + $0x4] sm:$0xf] }
 0xf8f   :  { %v13164_v38 = vrot.slane %v10059_v24, %v13144_v26  ;;  %v13170_v28 = vrot.slane %v10059_v24, %v13147_v57  ;;  %v13173_v29 = vrot.slane %v10059_v24, %v13149_v19  ;;  %v13177_v20 = vrot.slane %v10059_v24, %v13151_v51 }
 0xf90   :  { %10089 = vmatmul.mubr.msk.f32.vlgmr.msra.gmra.mrb[108].mxu1 %vm722_vm3, %v718_v17  ;;  %10092 = vmatmul.mubr.msk.f32.vlgmr.msra.gmra.mrb[84].mxu0 %vm722_vm3, %v718_v17 }
 0xf91   :  { %8116 = vmatprep.mubr.f32.mxu1 %v11990_v32  ;;  %8187 = vmatprep.mubr.f32.mxu0 %v11990_v32 }
0x101b   :  { %v6214_v22 = vpop.f32.mrb[90].mxu1 }
0x101c   :  { %v6216_v34 = vpop.f32.mrb[91].mxu1  ;;  %v6285_v35 = vpop.f32.mrb[66].mxu0  ;;  %v6312_v30 = vmul.f32 %v13155_v59, %v6214_v22  ;;  %v10074_v22 = vld [vmem:[%s12157_s14 + $0x14] sm:$0xf] }
0x101d   :  { %v6287_v55 = vpop.f32.mrb[67].mxu0  ;;  %v6313_v33 = vmul.f32 %v13158_v25, %v6216_v34  ;;  %v6314_v50 = vmul.f32 %v13161_v5, %v6285_v35 }
0x101e   :  { %v6315_v43 = vmul.f32 %v13167_v8, %v6287_v55 }
0x1023   :  { %v6400_v54 = vpop.f32.mrb[92].mxu1 }
0x1024   :  { %v6499_v37 = vmul.f32 %v13164_v38, %v6400_v54  ;;  %v6402_v41 = vpop.f32.mrb[93].mxu1  ;;  %v6471_v45 = vpop.f32.mrb[68].mxu0 }
0x1025   :  { %v6500_v13 = vmul.f32 %v13170_v28, %v6402_v41  ;;  %v6501_v62 = vmul.f32 %v13173_v29, %v6471_v45  ;;  %v6473_v48 = vpop.f32.mrb[69].mxu0  ;;  %v13225_v45 = vrot.slane %v10074_v22, %v13147_v57 }
0x1026   :  { %v6503_v36 = vadd.f32 %v6499_v37, %v6312_v30  ;;  %v6502_v44 = vmul.f32 %v13177_v20, %v6473_v48 }
0x1027   :  { %v6504_v52 = vadd.f32 %v6500_v13, %v6313_v33  ;;  %v6505_v49 = vadd.f32 %v6501_v62, %v6314_v50  ;;  %v13222_v50 = vrot.slane %v10074_v22, %v13144_v26  ;;  %v13228_v62 = vrot.slane %v10074_v22, %v13149_v19 }
0x1028   :  { %v6506_v56 = vadd.f32 %v6502_v44, %v6315_v43 }
0x102b   :  { %v6591_v4 = vpop.f32.mrb[94].mxu1 }
0x102c   :  { %v6690_v47 = vmul.f32 %v13188_v53, %v6591_v4  ;;  %v6593_v6 = vpop.f32.mrb[95].mxu1  ;;  %v6662_v7 = vpop.f32.mrb[70].mxu0 }
0x102d   :  { %v6691_v9 = vmul.f32 %v13191_v39, %v6593_v6  ;;  %v6692_v10 = vmul.f32 %v13194_v61, %v6662_v7  ;;  %v6664_v58 = vpop.f32.mrb[71].mxu0 }
0x102e   :  { %v6694_v12 = vadd.f32 %v6690_v47, %v6503_v36  ;;  %v6693_v2 = vmul.f32 %v13197_v63, %v6664_v58  ;;  %v13231_v36 = vrot.slane %v10074_v22, %v13151_v51 }
0x102f   :  { %v6695_v3 = vadd.f32 %v6691_v9, %v6504_v52  ;;  %v6696_v14 = vadd.f32 %v6692_v10, %v6505_v49 }
0x1030   :  { %v6697_v11 = vadd.f32 %v6693_v2, %v6506_v56  ;;  %v10078_v56 = vld [vmem:[%s12157_s14 + $0x18] sm:$0xf] }
0x1031   :  { %v13242_v2 = vrot.slane %v10078_v56, %v13147_v57 }
0x1034   :  { %v6782_v18 = vpop.f32.mrb[96].mxu1 }
0x1035   :  { %v6881_v21 = vmul.f32 %v13205_v15, %v6782_v18  ;;  %v6784_v23 = vpop.f32.mrb[97].mxu1  ;;  %v6853_v40 = vpop.f32.mrb[72].mxu0 }
0x1036   :  { %v6882_v42 = vmul.f32 %v13208_v16, %v6784_v23  ;;  %v6883_v17 = vmul.f32 %v13211_v1, %v6853_v40  ;;  %v6855_v27 = vpop.f32.mrb[73].mxu0 }
0x1037   :  { %v6885_v34 = vadd.f32 %v6881_v21, %v6694_v12  ;;  %v6884_v35 = vmul.f32 %v13214_v31, %v6855_v27  ;;  %v13239_v12 = vrot.slane %v10078_v56, %v13144_v26  ;;  %v10082_v27 = vld [vmem:[%s12157_s14 + $0x1c] sm:$0xf] }
0x1038   :  { %v6960_v24 = vpop.f32.mrb[98].mxu1  ;;  %v6886_v55 = vadd.f32 %v6882_v42, %v6695_v3  ;;  %v6887_v30 = vadd.f32 %v6883_v17, %v6696_v14  ;;  %v13245_v14 = vrot.slane %v10078_v56, %v13149_v19 }
0x1039   :  { %v7036_v33 = vadd.f32 %v6960_v24, %v6885_v34  ;;  %v6962_v54 = vpop.f32.mrb[99].mxu1  ;;  %v7031_v37 = vpop.f32.mrb[74].mxu0  ;;  %v6888_v41 = vadd.f32 %v6884_v35, %v6697_v11  ;;  %v13248_v11 = vrot.slane %v10078_v56, %v13151_v51  ;;  %v10086_v56 = vld [vmem:[%s12157_s14 + $0x20] sm:$0xf]  ;;  %s13594_s14 = sld [smem:[#allocation46_spill]] }
0x103a   :  { %v7037_v43 = vadd.f32 %v6962_v54, %v6886_v55  ;;  %v7038_v13 = vadd.f32 %v7031_v37, %v6887_v30  ;;  %v7033_v46 = vpop.f32.mrb[75].mxu0  ;;  %v13259_v54 = vrot.slane %v10082_v27, %v13147_v57  ;;  %v13262_v37 = vrot.slane %v10082_v27, %v13149_v19 }
0x103b   :  { %v7039_v48 = vadd.f32 %v7033_v46, %v6888_v41  ;;  %v13265_v41 = vrot.slane %v10082_v27, %v13151_v51 }
0x103c   :  { %v7124_v44 = vpop.f32.mrb[100].mxu1 }
0x103d   :  { %v7223_v52 = vmul.f32 %v13222_v50, %v7124_v44  ;;  %v7126_v49 = vpop.f32.mrb[101].mxu1  ;;  %v7195_v4 = vpop.f32.mrb[76].mxu0 }
0x103e   :  { %v7224_v47 = vmul.f32 %v13225_v45, %v7126_v49  ;;  %v7225_v6 = vmul.f32 %v13228_v62, %v7195_v4  ;;  %v7197_v7 = vpop.f32.mrb[77].mxu0 }
0x103f   :  { %v7227_v9 = vadd.f32 %v7223_v52, %v7036_v33  ;;  %v7226_v10 = vmul.f32 %v13231_v36, %v7197_v7  ;;  %v13256_v33 = vrot.slane %v10082_v27, %v13144_v26 }
0x1040   :  { %v7228_v58 = vadd.f32 %v7224_v47, %v7037_v43  ;;  %v7229_v0 = vadd.f32 %v7225_v6, %v7038_v13 }
0x1041   :  { %v7230_v3 = vadd.f32 %v7226_v10, %v7039_v48  ;;  %v13273_v10 = vrot.slane %v10086_v56, %v13144_v26 }
0x1043   :  { %v7315_v18 = vpop.f32.mrb[102].mxu1 }
0x1044   :  { %v7414_v21 = vmul.f32 %v13239_v12, %v7315_v18  ;;  %v7317_v23 = vpop.f32.mrb[103].mxu1  ;;  %v7386_v40 = vpop.f32.mrb[78].mxu0 }
0x1045   :  { %v7415_v42 = vmul.f32 %v13242_v2, %v7317_v23  ;;  %v7416_v17 = vmul.f32 %v13245_v14, %v7386_v40  ;;  %v7388_v22 = vpop.f32.mrb[79].mxu0 }
0x1046   :  { %v7418_v34 = vadd.f32 %v7414_v21, %v7227_v9  ;;  %v7417_v35 = vmul.f32 %v13248_v11, %v7388_v22 }
0x1047   :  { %v7419_v24 = vadd.f32 %v7415_v42, %v7228_v58  ;;  %v7420_v55 = vadd.f32 %v7416_v17, %v7229_v0  ;;  %v13276_v58 = vrot.slane %v10086_v56, %v13147_v57  ;;  %v13279_v0 = vrot.slane %v10086_v56, %v13149_v19 }
0x1048   :  { %v7421_v30 = vadd.f32 %v7417_v35, %v7230_v3  ;;  %v13282_v3 = vrot.slane %v10086_v56, %v13151_v51  ;;  %v7814_v35 = vld [vmem:[#allocation22] sm:$0xff]  ;;  %v7808_v51 = vpop.permute.xlu1 %7807 }
0x104b   :  { %v7506_v43 = vpop.f32.mrb[104].mxu1 }
0x104c   :  { %v7605_v13 = vmul.f32 %v13256_v33, %v7506_v43  ;;  %v7508_v46 = vpop.f32.mrb[105].mxu1  ;;  %v7577_v48 = vpop.f32.mrb[80].mxu0 }
0x104d   :  { %v7606_v44 = vmul.f32 %v13259_v54, %v7508_v46  ;;  %v7607_v52 = vmul.f32 %v13262_v37, %v7577_v48  ;;  %v7579_v49 = vpop.f32.mrb[81].mxu0  ;;  %v7818_v46 = vcombine.high %v7814_v35, %v7814_v35 }
0x104e   :  { %v7609_v4 = vadd.f32 %v7605_v13, %v7418_v34  ;;  %v7608_v47 = vmul.f32 %v13265_v41, %v7579_v49 }
0x104f   :  { %v7610_v6 = vadd.f32 %v7606_v44, %v7419_v24  ;;  %v7611_v7 = vadd.f32 %v7607_v52, %v7420_v55  ;;  %v7815_v24 = vld [vmem:[#allocation22 + $0x8] sm:$0xff] }
0x1050   :  { %v7612_v9 = vadd.f32 %v7608_v47, %v7421_v30  ;;  %v7819_v48 = vcombine.high %v7815_v24, %v7815_v24 }
0x1053   :  { %v7697_v18 = vpop.f32.mrb[106].mxu1 }
0x1054   :  { %v7796_v21 = vmul.f32 %v13273_v10, %v7697_v18  ;;  %v7699_v23 = vpop.f32.mrb[107].mxu1  ;;  %v7768_v40 = vpop.f32.mrb[82].mxu0 }
0x1055   :  { %v7797_v42 = vmul.f32 %v13276_v58, %v7699_v23  ;;  %v7798_v17 = vmul.f32 %v13279_v0, %v7768_v40  ;;  %v7770_v26 = vpop.f32.mrb[83].mxu0 }
0x1056   :  { %v7800_v22 = vadd.f32 %v7796_v21, %v7609_v4  ;;  %v7799_v57 = vmul.f32 %v13282_v3, %v7770_v26 }
0x1057   :  { %v7801_v27 = vadd.f32 %v7797_v42, %v7610_v6  ;;  %v7802_v34 = vadd.f32 %v7798_v17, %v7611_v7 }
0x1058   :  { %v7803_v19 = vadd.f32 %v7799_v57, %v7612_v9  ;;  %v7810_v55 = vadd.f32 %v7808_v51, %v7800_v22 }
0x1059   :  { %v7812_v30 = vadd.f32 %v7808_v51, %v7802_v34  ;;  %v7811_v43 = vadd.f32 %v7808_v51, %v7801_v27 }
0x105a   :  { %v7813_v13 = vadd.f32 %v7808_v51, %v7803_v19  ;;  %v7822_v44 = vadd.f32 %v7814_v35, %v7810_v55  ;;  %v9614_v55 = vld [vmem:[%s13594_s14] sm:$0xf] }
0x105b   :  { %v7824_v52 = vadd.f32 %v7815_v24, %v7812_v30  ;;  %v7823_v49 = vadd.f32 %v7818_v46, %v7811_v43  ;;  %v9629_v30 = vld [vmem:[%s12167_s21] sm:$0xf]  ;;  %s12003_s21 = smov [#allocation23]  }
0x105c   :  { %v7825_v56 = vadd.f32 %v7819_v48, %v7813_v13  ;;  %v7826_v47 = vmax.f32 %v7822_v44, 0.0 }
0x105d   :  { %v7828_v4 = vmax.f32 %v7824_v52, 0.0  ;;  %v7827_v6 = vmax.f32 %v7823_v49, 0.0 }
0x105e   :  { %v7829_v7 = vmax.f32 %v7825_v56, 0.0 }
0x1063   :  { %v7926_v18 = vpop.f32.mrb[108].mxu1  ;;  %v7997_v21 = vpop.f32.mrb[84].mxu0 }
0x1064   :  { %v8002_v9 = vmul.f32 %v7926_v18, %v7826_v47  ;;  %v8010_v23 = vrot.slane %v7926_v18, 4  ;;  %v8004_v40 = vmul.f32 %v7997_v21, %v7828_v4  ;;  %v8012_v42 = vrot.slane %v7997_v21, 4  ;;  %v7928_v17 = vpop.f32.mrb[109].mxu1  ;;  %v7999_v26 = vpop.f32.mrb[85].mxu0 }
0x1065   :  { %v8003_v22 = vmul.f32 %v7928_v17, %v7827_v6  ;;  %v8011_v57 = vrot.slane %v7928_v17, 4  ;;  %v8005_v27 = vmul.f32 %v7999_v26, %v7829_v7  ;;  %v8013_v34 = vrot.slane %v7999_v26, 4 }
0x1066   :  { %v13288_v19 = vadd.f32 %v8010_v23, %v8002_v9  ;;  %v13290_v35 = vadd.f32 %v8012_v42, %v8004_v40 }
0x1067   :  { %v13292_v24 = vadd.f32 %v8011_v57, %v8003_v22  ;;  %v13294_v51 = vadd.f32 %v8013_v34, %v8005_v27 }
0x1068   :  { %8022 = vrot.lane.b32.xlu0 %v13288_v19, %s11997_s25 }
0x1069   :  { %8024 = vrot.lane.b32.xlu1 %v13292_v24, %s11997_s25 }
0x106c   :  { %8026 = vrot.lane.b32.xlu0 %v13290_v35, %s11997_s25 }
0x106d   :  { %8028 = vrot.lane.b32.xlu1 %v13294_v51, %s11997_s25 }
0x1070   :  { %8198 = vrot.lane.b32.xlu0 %v13288_v19, %s11984_s22 }
0x1071   :  { %8200 = vrot.lane.b32.xlu1 %v13292_v24, %s11984_s22 }
0x1074   :  { %8202 = vrot.lane.b32.xlu0 %v13290_v35, %s11984_s22 }
0x1075   :  { %8204 = vrot.lane.b32.xlu1 %v13294_v51, %s11984_s22  ;;  %s13595_s22 = sld [smem:[#allocation45_spill]] }
0x1078   :  { %8377 = vrot.lane.b32.xlu0 %v13288_v19, %s11998_s6 }
0x1079   :  { %8379 = vrot.lane.b32.xlu1 %v13292_v24, %s11998_s6 }
0x107b   :  { %v8034_v52 = vld [vmem:[%s13595_s22] sm:$0xf]  ;;  %v10099_v9 = vld [vmem:[%s13595_s22 + $0x4] sm:$0xf]  ;;  %v10106_v34 = vld [vmem:[%s13595_s22 + $0x8] sm:$0xf] }
0x107c   :  { %8381 = vrot.lane.b32.xlu0 %v13290_v35, %s11998_s6 }
0x107d   :  { %8383 = vrot.lane.b32.xlu1 %v13294_v51, %s11998_s6 }
0x1080   :  { %8556 = vrot.lane.b32.xlu0 %v13288_v19, %s11985_s20 }
0x1081   :  { %8558 = vrot.lane.b32.xlu1 %v13292_v24, %s11985_s20 }
0x1084   :  { %8560 = vrot.lane.b32.xlu0 %v13290_v35, %s11985_s20 }
0x1085   :  { %8562 = vrot.lane.b32.xlu1 %v13294_v51, %s11985_s20 }
0x1088   :  { %8898 = vrot.lane.b32.xlu0 %v13288_v19, %s11994_s11 }
0x1089   :  { %8900 = vrot.lane.b32.xlu1 %v13292_v24, %s11994_s11 }
0x108c   :  { %8902 = vrot.lane.b32.xlu0 %v13290_v35, %s11994_s11 }
0x108d   :  { %8904 = vrot.lane.b32.xlu1 %v13294_v51, %s11994_s11 }
0x1090   :  { %9077 = vrot.lane.b32.xlu0 %v13288_v19, %s11999_s3 }
0x1091   :  { %9079 = vrot.lane.b32.xlu1 %v13292_v24, %s11999_s3 }
0x1094   :  { %9081 = vrot.lane.b32.xlu0 %v13290_v35, %s11999_s3 }
0x1095   :  { %9083 = vrot.lane.b32.xlu1 %v13294_v51, %s11999_s3 }
0x1098   :  { %9256 = vrot.lane.b32.xlu0 %v13288_v19, %s12000_s23 }
0x1099   :  { %9258 = vrot.lane.b32.xlu1 %v13292_v24, %s12000_s23 }
0x109c   :  { %9260 = vrot.lane.b32.xlu0 %v13290_v35, %s12000_s23 }
0x109d   :  { %9262 = vrot.lane.b32.xlu1 %v13294_v51, %s12000_s23 }
0x10a0   :  { %9435 = vrot.lane.b32.xlu0 %v13288_v19, %s12001_s26 }
0x10a1   :  { %9437 = vrot.lane.b32.xlu1 %v13292_v24, %s12001_s26 }
0x10a4   :  { %9439 = vrot.lane.b32.xlu0 %v13290_v35, %s12001_s26 }
0x10a5   :  { %9441 = vrot.lane.b32.xlu1 %v13294_v51, %s12001_s26 }
0x10a8   :  { %9617 = vperm.xlu0 %11561, %v9614_v55  }
0x10a9   :  { %9632 = vperm.xlu1 %11562, %v9629_v30  }
0x10da   :  { %v8023_v43 = vpop.permute.xlu0 %8022 }
0x10db   :  { %v8025_v13 = vpop.permute.xlu1 %8024 }
0x10dc   :  { %v8032_v46 = vsel %vm6139_vm6, %v8023_v43, %v8025_v13 }
0x10dd   :  { %10093 = vmatprep.subr.msk.mxu1 %vm8039_vm14, %v8032_v46 }
0x10de   :  { %v8027_v48 = vpop.permute.xlu0 %8026 }
0x10df   :  { %v8029_v44 = vpop.permute.xlu1 %8028  ;;  %v8031_v47 = vsel %vm6139_vm6, %v8025_v13, %v8027_v48 }
0x10e0   :  { %v8030_v49 = vsel %vm6139_vm6, %v8027_v48, %v8029_v44  ;;  %v8033_v56 = vsel %vm6139_vm6, %v8029_v44, %v8023_v43 }
0x10e1   :  { %10094 = vmatpush1.msk.msra.mxu1 %vm8039_vm14, %v8033_v56  ;;  %10096 = vmatprep.subr.msk.mxu0 %vm8039_vm14, %v8030_v49  ;;  %v10113_v49 = vld [vmem:[%s13595_s22 + $0xc] sm:$0xf] }
0x10e2   :  { %10097 = vmatpush1.msk.msra.mxu0 %vm8039_vm14, %v8031_v47  ;;  %v8199_v4 = vpop.permute.xlu0 %8198  ;;  %10095 = vmatmul.mubr.msk.f32.vlgmr.msra.gmra.mrb[110].mxu1 %vm8035_vm15, %v8034_v52 }
0x10e3   :  { %v8201_v18 = vpop.permute.xlu1 %8200  ;;  %10098 = vmatmul.mubr.msk.f32.vlgmr.msra.gmra.mrb[86].mxu0 %vm8035_vm15, %v8034_v52  ;;  %8291 = vmatprep.mubr.f32.mxu1 %v11990_v32 }
0x10e4   :  { %v8208_v21 = vsel %vm6324_vm7, %v8199_v4, %v8201_v18  ;;  %8362 = vmatprep.mubr.f32.mxu0 %v11990_v32 }
0x10e5   :  { %10100 = vmatprep.subr.msk.mxu1 %vm8039_vm14, %v8208_v21 }
0x10e6   :  { %v8203_v6 = vpop.permute.xlu0 %8202 }
0x10e7   :  { %v8205_v7 = vpop.permute.xlu1 %8204  ;;  %v8207_v42 = vsel %vm6324_vm7, %v8201_v18, %v8203_v6 }
0x10e8   :  { %v8206_v23 = vsel %vm6324_vm7, %v8203_v6, %v8205_v7  ;;  %v8209_v40 = vsel %vm6324_vm7, %v8205_v7, %v8199_v4  ;;  %v10120_v6 = vld [vmem:[%s13595_s22 + $0x10] sm:$0xf] }
0x10e9   :  { %10101 = vmatpush1.msk.msra.mxu1 %vm8039_vm14, %v8209_v40  ;;  %10103 = vmatprep.subr.msk.mxu0 %vm8039_vm14, %v8206_v23 }
0x10ea   :  { %10104 = vmatpush1.msk.msra.mxu0 %vm8039_vm14, %v8207_v42  ;;  %v8378_v17 = vpop.permute.xlu0 %8377  ;;  %10102 = vmatmul.mubr.msk.f32.vlgmr.msra.gmra.mrb[112].mxu1 %vm8035_vm15, %v10099_v9 }
0x10eb   :  { %v8380_v26 = vpop.permute.xlu1 %8379  ;;  %10105 = vmatmul.mubr.msk.f32.vlgmr.msra.gmra.mrb[88].mxu0 %vm8035_vm15, %v10099_v9  ;;  %8470 = vmatprep.mubr.f32.mxu1 %v11990_v32 }
0x10ec   :  { %v8387_v22 = vsel %vm6515_vm8, %v8378_v17, %v8380_v26  ;;  %8541 = vmatprep.mubr.f32.mxu0 %v11990_v32 }
0x10ed   :  { %10107 = vmatprep.subr.msk.mxu1 %vm8039_vm14, %v8387_v22 }
0x10ee   :  { %v8382_v57 = vpop.permute.xlu0 %8381 }
0x10ef   :  { %v8384_v27 = vpop.permute.xlu1 %8383  ;;  %v8386_v43 = vsel %vm6515_vm8, %v8380_v26, %v8382_v57 }
0x10f0   :  { %v8385_v55 = vsel %vm6515_vm8, %v8382_v57, %v8384_v27  ;;  %v8388_v30 = vsel %vm6515_vm8, %v8384_v27, %v8378_v17  ;;  %v10134_v57 = vld [vmem:[%s13595_s22 + $0x18] sm:$0xf] }
0x10f1   :  { %10108 = vmatpush1.msk.msra.mxu1 %vm8039_vm14, %v8388_v30  ;;  %10110 = vmatprep.subr.msk.mxu0 %vm8039_vm14, %v8385_v55 }
0x10f2   :  { %10111 = vmatpush1.msk.msra.mxu0 %vm8039_vm14, %v8386_v43  ;;  %v8557_v13 = vpop.permute.xlu0 %8556  ;;  %10109 = vmatmul.mubr.msk.f32.vlgmr.msra.gmra.mrb[114].mxu1 %vm8035_vm15, %v10106_v34 }
0x10f3   :  { %v8559_v46 = vpop.permute.xlu1 %8558  ;;  %10112 = vmatmul.mubr.msk.f32.vlgmr.msra.gmra.mrb[90].mxu0 %vm8035_vm15, %v10106_v34  ;;  %8649 = vmatprep.mubr.f32.mxu1 %v11990_v32 }
0x10f4   :  { %v8566_v48 = vsel %vm6706_vm9, %v8557_v13, %v8559_v46  ;;  %8720 = vmatprep.mubr.f32.mxu0 %v11990_v32 }
0x10f5   :  { %10114 = vmatprep.subr.msk.mxu1 %vm8039_vm14, %v8566_v48 }
0x10f6   :  { %v8561_v44 = vpop.permute.xlu0 %8560 }
0x10f7   :  { %v8563_v52 = vpop.permute.xlu1 %8562  ;;  %v8565_v4 = vsel %vm6706_vm9, %v8559_v46, %v8561_v44 }
0x10f8   :  { %v8564_v56 = vsel %vm6706_vm9, %v8561_v44, %v8563_v52  ;;  %v8567_v47 = vsel %vm6706_vm9, %v8563_v52, %v8557_v13  ;;  %v10141_v44 = vld [vmem:[%s13595_s22 + $0x1c] sm:$0xf] }
0x10f9   :  { %10115 = vmatpush1.msk.msra.mxu1 %vm8039_vm14, %v8567_v47  ;;  %10117 = vmatprep.subr.msk.mxu0 %vm8039_vm14, %v8564_v56 }
0x10fa   :  { %10116 = vmatmul.mubr.msk.f32.vlgmr.msra.gmra.mrb[116].mxu1 %vm8035_vm15, %v10113_v49  ;;  %10118 = vmatpush1.msk.msra.mxu0 %vm8039_vm14, %v8565_v4  ;;  %v8899_v18 = vpop.permute.xlu0 %8898 }
0x10fb   :  { %10121 = vmatprep.subr.msk.mxu1 %vm8039_vm14, %v13292_v24  ;;  %v8901_v21 = vpop.permute.xlu1 %8900  ;;  %10119 = vmatmul.mubr.msk.f32.vlgmr.msra.gmra.mrb[92].mxu0 %vm8035_vm15, %v10113_v49 }
0x10fc   :  { %10122 = vmatpush1.msk.msra.mxu1 %vm8039_vm14, %v13288_v19  ;;  %10124 = vmatprep.subr.msk.mxu0 %vm8039_vm14, %v13294_v51  ;;  %v10127_v19 = vld [vmem:[%s13595_s22 + $0x14] sm:$0xf]  ;;  %v8908_v51 = vsel %vm7048_vm10, %v8899_v18, %v8901_v21 }
0x10fd   :  { %10125 = vmatpush1.msk.msra.mxu0 %vm8039_vm14, %v13290_v35  ;;  %8816 = vmatprep.mubr.f32.mxu1 %v11990_v32 }
0x10fe   :  { %10123 = vmatmul.mubr.msk.f32.vlgmr.msra.gmra.mrb[118].mxu1 %vm8035_vm15, %v10120_v6  ;;  %8887 = vmatprep.mubr.f32.mxu0 %v11990_v32  ;;  %v8903_v24 = vpop.permute.xlu0 %8902 }
0x10ff   :  { %v8907_v7 = vsel %vm7048_vm10, %v8901_v21, %v8903_v24  ;;  %v8905_v9 = vpop.permute.xlu1 %8904  ;;  %10126 = vmatmul.mubr.msk.f32.vlgmr.msra.gmra.mrb[94].mxu0 %vm8035_vm15, %v10120_v6  ;;  %8991 = vmatprep.mubr.f32.mxu1 %v11990_v32 }
0x1100   :  { %v8906_v35 = vsel %vm7048_vm10, %v8903_v24, %v8905_v9  ;;  %v8909_v23 = vsel %vm7048_vm10, %v8905_v9, %v8899_v18  ;;  %10128 = vmatprep.subr.msk.mxu1 %vm8039_vm14, %v8907_v7  ;;  %9062 = vmatprep.mubr.f32.mxu0 %v11990_v32  ;;  %v10148_v24 = vld [vmem:[%s13595_s22 + $0x20] sm:$0xf] }
0x1101   :  { %10129 = vmatpush1.msk.msra.mxu1 %vm8039_vm14, %v8908_v51  ;;  %10131 = vmatprep.subr.msk.mxu0 %vm8039_vm14, %v8909_v23 }
0x1102   :  { %10130 = vmatmul.mubr.msk.f32.vlgmr.msra.gmra.mrb[120].mxu1 %vm8035_vm15, %v10127_v19  ;;  %10132 = vmatpush1.msk.msra.mxu0 %vm8039_vm14, %v8906_v35  ;;  %v9078_v40 = vpop.permute.xlu0 %9077 }
0x1103   :  { %v9080_v42 = vpop.permute.xlu1 %9079  ;;  %10133 = vmatmul.mubr.msk.f32.vlgmr.msra.gmra.mrb[96].mxu0 %vm8035_vm15, %v10127_v19  ;;  %9170 = vmatprep.mubr.f32.mxu1 %v11990_v32 }
0x1104   :  { %9241 = vmatprep.mubr.f32.mxu0 %v11990_v32  ;;  %v9087_v27 = vsel %vm7239_vm11, %v9078_v40, %v9080_v42 }
0x1106   :  { %v9082_v17 = vpop.permute.xlu0 %9081 }
0x1107   :  { %v9086_v26 = vsel %vm7239_vm11, %v9080_v42, %v9082_v17  ;;  %v9084_v22 = vpop.permute.xlu1 %9083 }
0x1108   :  { %v9085_v34 = vsel %vm7239_vm11, %v9082_v17, %v9084_v22  ;;  %v9088_v55 = vsel %vm7239_vm11, %v9084_v22, %v9078_v40  ;;  %10135 = vmatprep.subr.msk.mxu1 %vm8039_vm14, %v9086_v26 }
0x1109   :  { %10136 = vmatpush1.msk.msra.mxu1 %vm8039_vm14, %v9087_v27  ;;  %10138 = vmatprep.subr.msk.mxu0 %vm8039_vm14, %v9088_v55 }
0x110a   :  { %10137 = vmatmul.mubr.msk.f32.vlgmr.msra.gmra.mrb[122].mxu1 %vm8035_vm15, %v10134_v57  ;;  %10139 = vmatpush1.msk.msra.mxu0 %vm8039_vm14, %v9085_v34  ;;  %v9257_v30 = vpop.permute.xlu0 %9256 }
0x110b   :  { %v9259_v43 = vpop.permute.xlu1 %9258  ;;  %10140 = vmatmul.mubr.msk.f32.vlgmr.msra.gmra.mrb[98].mxu0 %vm8035_vm15, %v10134_v57  ;;  %9349 = vmatprep.mubr.f32.mxu1 %v11990_v32 }
0x110c   :  { %9420 = vmatprep.mubr.f32.mxu0 %v11990_v32  ;;  %v9266_v52 = vsel %vm7430_vm12, %v9257_v30, %v9259_v43 }
0x110e   :  { %v9261_v13 = vpop.permute.xlu0 %9260 }
0x110f   :  { %v9265_v46 = vsel %vm7430_vm12, %v9259_v43, %v9261_v13  ;;  %v9263_v48 = vpop.permute.xlu1 %9262 }
0x1110   :  { %v9264_v49 = vsel %vm7430_vm12, %v9261_v13, %v9263_v48  ;;  %v9267_v56 = vsel %vm7430_vm12, %v9263_v48, %v9257_v30  ;;  %10142 = vmatprep.subr.msk.mxu1 %vm8039_vm14, %v9265_v46 }
0x1111   :  { %10143 = vmatpush1.msk.msra.mxu1 %vm8039_vm14, %v9266_v52  ;;  %10145 = vmatprep.subr.msk.mxu0 %vm8039_vm14, %v9267_v56 }
0x1112   :  { %10144 = vmatmul.mubr.msk.f32.vlgmr.msra.gmra.mrb[124].mxu1 %vm8035_vm15, %v10141_v44  ;;  %10146 = vmatpush1.msk.msra.mxu0 %vm8039_vm14, %v9264_v49  ;;  %v9436_v47 = vpop.permute.xlu0 %9435 }
0x1113   :  { %v9438_v4 = vpop.permute.xlu1 %9437  ;;  %10147 = vmatmul.mubr.msk.f32.vlgmr.msra.gmra.mrb[100].mxu0 %vm8035_vm15, %v10141_v44  ;;  %9528 = vmatprep.mubr.f32.mxu1 %v11990_v32 }
0x1114   :  { %9599 = vmatprep.mubr.f32.mxu0 %v11990_v32  ;;  %v9445_v7 = vsel %vm7621_vm13, %v9436_v47, %v9438_v4 }
0x1116   :  { %v9440_v18 = vpop.permute.xlu0 %9439 }
0x1117   :  { %v9444_v21 = vsel %vm7621_vm13, %v9438_v4, %v9440_v18  ;;  %v9442_v6 = vpop.permute.xlu1 %9441 }
0x1118   :  { %v9443_v9 = vsel %vm7621_vm13, %v9440_v18, %v9442_v6  ;;  %v9446_v19 = vsel %vm7621_vm13, %v9442_v6, %v9436_v47  ;;  %10149 = vmatprep.subr.msk.mxu1 %vm8039_vm14, %v9444_v21 }
0x1119   :  { %10150 = vmatpush1.msk.msra.mxu1 %vm8039_vm14, %v9445_v7  ;;  %10152 = vmatprep.subr.msk.mxu0 %vm8039_vm14, %v9446_v19 }
0x111a   :  { %10151 = vmatmul.mubr.msk.f32.vlgmr.msra.gmra.mrb[126].mxu1 %vm8035_vm15, %v10148_v24  ;;  %10153 = vmatpush1.msk.msra.mxu0 %vm8039_vm14, %v9443_v9 }
0x111b   :  { %10154 = vmatmul.mubr.msk.f32.vlgmr.msra.gmra.mrb[102].mxu0 %vm8035_vm15, %v10148_v24  ;;  %9714 = vmatprep.mubr.f32.mxu1 %v11990_v32 }
0x111c   :  { %9785 = vmatprep.mubr.f32.mxu0 %v11990_v32 }
0x11b5   :  { %v8118_v51 = vpop.f32.mrb[110].mxu1 }
0x11b6   :  { %v8189_v35 = vpop.f32.mrb[86].mxu0  ;;  %v8120_v60 = vpop.f32.mrb[111].mxu1  ;;  %v8194_v40 = vmul.f32 %v8118_v51, %v13155_v59 }
0x11b7   :  { %v8191_v23 = vpop.f32.mrb[87].mxu0  ;;  %v8196_v42 = vmul.f32 %v8189_v35, %v13161_v5  ;;  %v8195_v17 = vmul.f32 %v8120_v60, %v13158_v25 }
0x11b8   :  { %v8197_v22 = vmul.f32 %v8191_v23, %v13167_v8 }
0x11bd   :  { %v8293_v26 = vpop.f32.mrb[112].mxu1 }
0x11be   :  { %v8369_v57 = vmul.f32 %v8293_v26, %v13164_v38  ;;  %v8364_v27 = vpop.f32.mrb[88].mxu0  ;;  %v8295_v34 = vpop.f32.mrb[113].mxu1 }
0x11bf   :  { %v8371_v55 = vmul.f32 %v8364_v27, %v13173_v29  ;;  %v8370_v32 = vmul.f32 %v8295_v34, %v13170_v28  ;;  %v8366_v30 = vpop.f32.mrb[89].mxu0 }
0x11c0   :  { %v8373_v43 = vadd.f32 %v8369_v57, %v8194_v40  ;;  %v8372_v13 = vmul.f32 %v8366_v30, %v13177_v20 }
0x11c1   :  { %v8375_v59 = vadd.f32 %v8371_v55, %v8196_v42  ;;  %v8374_v46 = vadd.f32 %v8370_v32, %v8195_v17 }
0x11c2   :  { %v8376_v5 = vadd.f32 %v8372_v13, %v8197_v22 }
0x11c5   :  { %v8472_v48 = vpop.f32.mrb[114].mxu1 }
0x11c6   :  { %v8548_v25 = vmul.f32 %v8472_v48, %v13188_v53  ;;  %v8543_v44 = vpop.f32.mrb[90].mxu0  ;;  %v8474_v8 = vpop.f32.mrb[115].mxu1 }
0x11c7   :  { %v8550_v38 = vmul.f32 %v8543_v44, %v13194_v61  ;;  %v8549_v52 = vmul.f32 %v8474_v8, %v13191_v39  ;;  %v8545_v49 = vpop.f32.mrb[91].mxu0 }
0x11c8   :  { %v8552_v29 = vadd.f32 %v8548_v25, %v8373_v43  ;;  %v8551_v28 = vmul.f32 %v8545_v49, %v13197_v63 }
0x11c9   :  { %v8554_v56 = vadd.f32 %v8550_v38, %v8375_v59  ;;  %v8553_v47 = vadd.f32 %v8549_v52, %v8374_v46 }
0x11ca   :  { %v8555_v4 = vadd.f32 %v8551_v28, %v8376_v5 }
0x11cd   :  { %v8651_v20 = vpop.f32.mrb[116].mxu1 }
0x11ce   :  { %v8727_v18 = vmul.f32 %v8651_v20, %v13205_v15  ;;  %v8722_v21 = vpop.f32.mrb[92].mxu0  ;;  %v8653_v6 = vpop.f32.mrb[117].mxu1 }
0x11cf   :  { %v8729_v53 = vmul.f32 %v8722_v21, %v13211_v1  ;;  %v8728_v24 = vmul.f32 %v8653_v6, %v13208_v16  ;;  %v8724_v7 = vpop.f32.mrb[93].mxu0 }
0x11d0   :  { %v8730_v61 = vmul.f32 %v8724_v7, %v13214_v31  ;;  %v8731_v39 = vadd.f32 %v8727_v18, %v8552_v29  ;;  %v9618_v7 = vpop.permute.xlu0 %9617 }
0x11d1   :  { %v8818_v9 = vpop.f32.mrb[118].mxu1  ;;  %v8732_v19 = vadd.f32 %v8728_v24, %v8553_v47  ;;  %v8733_v51 = vadd.f32 %v8729_v53, %v8554_v56 }
0x11d2   :  { %v8894_v63 = vadd.f32 %v8818_v9, %v8731_v39  ;;  %v8820_v35 = vpop.f32.mrb[119].mxu1  ;;  %v8889_v60 = vpop.f32.mrb[94].mxu0  ;;  %v8734_v23 = vadd.f32 %v8730_v61, %v8555_v4 }
0x11d3   :  { %v8895_v40 = vadd.f32 %v8820_v35, %v8732_v19  ;;  %v8896_v42 = vadd.f32 %v8889_v60, %v8733_v51  ;;  %v8891_v15 = vpop.f32.mrb[95].mxu0 }
0x11d4   :  { %v8897_v17 = vadd.f32 %v8891_v15, %v8734_v23  ;;  %v9628_v23 = vld [vmem:[%s12162_s8] sm:$0xf]  ;;  %s9812_s8 = sshll.u32 %s12003_s21, 4  ;;  %s9813_s8 = int_to_ptr.vmem [resolvable:$true] %s9812_s8 }
0x11d5   :  { %v8993_v26 = vpop.f32.mrb[120].mxu1  ;;  %s11900_s20 = scalar_lea.vmem %s9813_s8, 256  ;;  %p11905_p7 = scmp.lt.s32.totalorder %s9813_s8, %s9813_s8 }
0x11d6   :  { %v9069_v1 = vmul.f32 %v8993_v26, %v13222_v50  ;;  %v8995_v22 = vpop.f32.mrb[121].mxu1  ;;  %v9064_v16 = vpop.f32.mrb[96].mxu0  ;;  %p11901_p6 = scmp.ne.s32.totalorder %s9813_s8, %s11900_s20  ;;  %p11906_p8 = scmp.lt.s32.totalorder %s11900_s20, %s11900_s20 }
0x11d7   :  { %v9070_v57 = vmul.f32 %v8995_v22, %v13225_v45  ;;  %v9071_v31 = vmul.f32 %v9064_v16, %v13228_v62  ;;  %v9066_v27 = vpop.f32.mrb[97].mxu0 }
0x11d8   :  { %v9073_v34 = vadd.f32 %v9069_v1, %v8894_v63  ;;  %v9072_v55 = vmul.f32 %v9066_v27, %v13231_v36  ;;  %p11907_p9 = por %p11906_p8, %p11905_p7 }
0x11d9   :  { %v9074_v32 = vadd.f32 %v9070_v57, %v8895_v40  ;;  %v9075_v30 = vadd.f32 %v9071_v31, %v8896_v42 }
0x11da   :  { %v9076_v43 = vadd.f32 %v9072_v55, %v8897_v17  ;;  %p11908_p10 = pnand %p11907_p9, %p11901_p6 }
0x11dd   :  { %v9172_v13 = vpop.f32.mrb[122].mxu1 }
0x11de   :  { %v9248_v59 = vmul.f32 %v9172_v13, %v13239_v12  ;;  %v9174_v46 = vpop.f32.mrb[123].mxu1  ;;  %v9243_v5 = vpop.f32.mrb[98].mxu0 }
0x11df   :  { %v9249_v50 = vmul.f32 %v9174_v46, %v13242_v2  ;;  %v9250_v48 = vmul.f32 %v9243_v5, %v13245_v14  ;;  %v9245_v25 = vpop.f32.mrb[99].mxu0 }
0x11e0   :  { %v9252_v45 = vadd.f32 %v9248_v59, %v9073_v34  ;;  %v9251_v62 = vmul.f32 %v9245_v25, %v13248_v11 }
0x11e1   :  { %v9253_v44 = vadd.f32 %v9249_v50, %v9074_v32  ;;  %v9254_v8 = vadd.f32 %v9250_v48, %v9075_v30 }
0x11e2   :  { %v9255_v38 = vadd.f32 %v9251_v62, %v9076_v43 }
0x11e5   :  { %v9351_v36 = vpop.f32.mrb[124].mxu1 }
0x11e6   :  { %v9427_v52 = vmul.f32 %v9351_v36, %v13256_v33  ;;  %v9353_v49 = vpop.f32.mrb[125].mxu1  ;;  %v9422_v29 = vpop.f32.mrb[100].mxu0 }
0x11e7   :  { %v9428_v12 = vmul.f32 %v9353_v49, %v13259_v54  ;;  %v9429_v28 = vmul.f32 %v9422_v29, %v13262_v37  ;;  %v9424_v56 = vpop.f32.mrb[101].mxu0 }
0x11e8   :  { %v9431_v2 = vadd.f32 %v9427_v52, %v9252_v45  ;;  %v9430_v14 = vmul.f32 %v9424_v56, %v13265_v41 }
0x11e9   :  { %v9432_v47 = vadd.f32 %v9428_v12, %v9253_v44  ;;  %v9433_v4 = vadd.f32 %v9429_v28, %v9254_v8 }
0x11ea   :  { %v9434_v20 = vadd.f32 %v9430_v14, %v9255_v38 }
0x11ed   :  { %v9530_v11 = vpop.f32.mrb[126].mxu1 }
0x11ee   :  { %v9606_v18 = vmul.f32 %v9530_v11, %v13273_v10  ;;  %v9532_v21 = vpop.f32.mrb[127].mxu1  ;;  %v9601_v6 = vpop.f32.mrb[102].mxu0 }
0x11ef   :  { %v9607_v33 = vmul.f32 %v9532_v21, %v13276_v58  ;;  %v9608_v53 = vmul.f32 %v9601_v6, %v13279_v0  ;;  %v9603_v54 = vpop.f32.mrb[103].mxu0  ;;  %v9633_v0 = vpop.permute.xlu1 %9632 }
0x11f0   :  { %v9610_v24 = vadd.f32 %v9606_v18, %v9431_v2  ;;  %v9609_v37 = vmul.f32 %v9603_v54, %v13282_v3 }
0x11f1   :  { %v9611_v61 = vadd.f32 %v9607_v33, %v9432_v47  ;;  %v9612_v41 = vadd.f32 %v9608_v53, %v9433_v4 }
0x11f2   :  { %v9620_v39 = vadd.f32 %v9618_v7, %v9610_v24  ;;  %v9613_v9 = vadd.f32 %v9609_v37, %v9434_v20 }
0x11f3   :  { %v9621_v19 = vadd.f32 %v9618_v7, %v9611_v61  ;;  %v9622_v51 = vadd.f32 %v9618_v7, %v9612_v41 }
0x11f4   :  { %v9623_v63 = vadd.f32 %v9618_v7, %v9613_v9  ;;  %v9624_v35 = vmax.f32 %v9620_v39, 0.0 }
0x11f5   :  { %v9625_v10 = vmax.f32 %v9621_v19, 0.0  ;;  %v9626_v58 = vmax.f32 %v9622_v51, 0.0 }
0x11f6   :  { %v9627_v60 = vmax.f32 %v9623_v63, 0.0 }
0x11f7   :  { %10155 = vmatprep.subr.msk.mxu1 %vm8039_vm14, %v9625_v10 }
0x11f8   :  { %10156 = vmatpush1.msk.msra.mxu1 %vm8039_vm14, %v9624_v35  ;;  %10158 = vmatprep.subr.msk.mxu0 %vm8039_vm14, %v9627_v60 }
0x11f9   :  { %10157 = vmatmul.mubr.msk.f32.vlgmr.msra.gmra.mrb[128].mxu1 %vm8035_vm15, %v9628_v23  ;;  %10159 = vmatpush1.msk.msra.mxu0 %vm8039_vm14, %v9626_v58 }
0x11fa   :  { %10160 = vmatmul.mubr.msk.f32.vlgmr.msra.gmra.mrb[104].mxu0 %vm8035_vm15, %v9628_v23 }
0x12cc   :  { %v9716_v3 = vpop.f32.mrb[128].mxu1 }
0x12cd   :  { %v9717_v40 = vadd.f32 %v9716_v3, %v9633_v0  ;;  %v9718_v42 = vpop.f32.mrb[129].mxu1  ;;  %v9787_v15 = vpop.f32.mrb[104].mxu0 }
0x12ce   :  { %v9719_v17 = vadd.f32 %v9718_v42, %v9633_v0  ;;  %v9788_v26 = vadd.f32 %v9787_v15, %v9633_v0  ;;  %v9789_v1 = vpop.f32.mrb[105].mxu0 }
0x12cf   :  { %11606 = vtanh.f32 %v9717_v40  ;;  %v9790_v22 = vadd.f32 %v9789_v1, %v9633_v0 }
0x12d0   :  { %11608 = vtanh.f32 %v9719_v17 }
0x12d1   :  { %11610 = vtanh.f32 %v9788_v26 }
0x12d2   :  { %11612 = vtanh.f32 %v9790_v22 }
0x12d9   :  { %v11607_v16 = vpop.eup %11606 }
0x12da   :  { %v11609_v57 = vpop.eup %11608 }
0x12db   :  { %v11611_v31 = vpop.eup %11610  ;;  %v9800_v27 = vcombine.low %v11607_v16, %v11609_v57 }
0x12dc   :  { %v11613_v34 = vpop.eup %11612 }
0x12dd   :  { %v9801_v55 = vcombine.low %v11611_v31, %v11613_v34  ;;  %9804 = vst [vmem:[#allocation23] sm:$0xff] %v9800_v27 }
0x12df   :  { %9805 = vst [vmem:[#allocation23 + $0x8] sm:$0xff] %v9801_v55 }
0x12e0   :  { %11911 = shalt.err (!%p11908_p10)
}
0x12e1   :  { %s11912_s1 = scalar_lea.hbm %s12172_s13, 256 }
0x12e2   :  { %p11913_p11 = scmp.ne.s32.totalorder %s12172_s13, %s11912_s1  ;;  %p11916_p12 = scmp.lt.u32.totalorder %s11912_s1, %s12172_s13 }
0x12e4   :  { %p11918_p13 = pnand %p11916_p12, %p11913_p11 }
0x12e6   :  { %11921 = shalt.err (!%p11918_p13)
}
0x12e7   :  { %9815 = dma.vmem_to_hbm [thread:$0]  %s9813_s8, 256, %s12172_s13, [#allocation4]  }
0x12e8   :  { %11936 = dma.done.wait [#allocation4], 256  }
0x12e9   :  { %11937 = vsyncadd [#allocation4], 4294967040 }
0x12ea   :  { %9819 = vsyncpa [#allocation3], 1 }
0x12eb   :  { %9820 = vsyncpa [#allocation6], 1 }
0x12ec   :  { %9821 = vsyncpa [#allocation9], 1 }
0x12ed   :  { %9822 = vsyncpa [#allocation12], 1 }
0x12ee   :  { %9823 = vsyncpa [#allocation15], 1 }
0x12ef   :  { %9824 = vsyncpa [#allocation18], 1 }
0x12f0   :  { %9825 = vsyncpa [#allocation21], 1 }
0x12f1   :  { %9826 = vsyncpa [#allocation4], 1 }

</bundles_post_ra>
